<compile_context>
chip_gen: v5e
topology: v5e:2x2
jax: 0.10.0
libtpu: 0.0.40
codegen_flags: <defaults>
</compile_context>

<pallas_src>
import functools

import jax
import jax.numpy as jnp
import numpy as np
from jax import lax
from jax.experimental import pallas as pl
from jax.experimental.pallas import tpu as pltpu


def _cbam_kernel(x_ref, w1_ref, w2_ref, wsp_ref, bsp_ref, o_ref, *, K, H, W):
    """One batch tile: full CBAM forward.

    x_ref   : (Bt, C, H*W) VMEM   -- lane-dense input block
    w1_ref  : (C_hid, C)   VMEM   -- SE 1x1 conv #1 (no bias)
    w2_ref  : (C, C_hid)   VMEM   -- SE 1x1 conv #2 (no bias)
    wsp_ref : (2*K*K,)     SMEM   -- spatial conv weight, flat [max-ch, avg-ch]
    bsp_ref : (1,)         SMEM   -- spatial conv bias
    o_ref   : (Bt, C, H*W) VMEM
    """
    Bt, C, HW = x_ref.shape
    KK = K * K
    pad = K // 2
    Hp = H + 2 * pad

    w1 = w1_ref[...].astype(jnp.float32)          # (C_hid, C)
    w2 = w2_ref[...].astype(jnp.float32)          # (C, C_hid)

    # ---------------- Channel attention (fused SE over all Bt images) --------
    max_cols, sum_cols = [], []
    for b in range(Bt):
        xb = x_ref[b].astype(jnp.float32)         # (C, HW)
        max_cols.append(jnp.max(xb, axis=1, keepdims=True))   # (C, 1), lane reduce
        sum_cols.append(jnp.sum(xb, axis=1, keepdims=True))
    pooled = jnp.concatenate(
        max_cols + [s * (1.0 / HW) for s in sum_cols], axis=1)  # (C, 2*Bt)

    h = jnp.maximum(
        jnp.dot(w1, pooled, preferred_element_type=jnp.float32), 0.0)  # (C_hid, 2Bt)
    se = jnp.dot(w2, h, preferred_element_type=jnp.float32)            # (C, 2Bt)

    # ---------------- Hoisted spatial-conv constants --------------------------
    w_max = [wsp_ref[t] for t in range(KK)]       # SMEM scalars, read once
    w_avg = [wsp_ref[KK + t] for t in range(KK)]
    bias = bsp_ref[0]
    zrow = jnp.zeros((pad, W), jnp.float32)       # hoisted zero blocks
    zcol = jnp.zeros((Hp, pad), jnp.float32)

    def to_padded_2d(m_flat):                     # (1, HW) -> (Hp, Wp) zero-padded
        m2 = jnp.concatenate([m_flat[:, r * W:(r + 1) * W] for r in range(H)],
                             axis=0)              # (H, W)
        m2 = jnp.concatenate([zrow, m2, zrow], axis=0)          # (Hp, W)
        return jnp.concatenate([zcol, m2, zcol], axis=1)        # (Hp, Wp)

    # ---------------- Per-image spatial attention + fused output -------------
    for b in range(Bt):
        xb = x_ref[b].astype(jnp.float32)                       # (C, HW)
        ca = jax.nn.sigmoid(se[:, b:b + 1] + se[:, Bt + b:Bt + b + 1])  # (C, 1)

        # xc only lives long enough to build the channel-wise max/mean maps.
        xc = xb * ca                                            # (C, HW)
        max_map = jnp.max(xc, axis=0, keepdims=True)            # (1, HW)
        avg_map = jnp.sum(xc, axis=0, keepdims=True) * (1.0 / C)

        pm = to_padded_2d(max_map)                              # (Hp, Wp)
        pa = to_padded_2d(avg_map)

        acc = jnp.zeros((H, W), jnp.float32)
        for kh in range(K):
            for kw in range(K):
                t = kh * K + kw
                acc = (acc
                       + w_max[t] * pm[kh:kh + H, kw:kw + W]
                       + w_avg[t] * pa[kh:kh + H, kw:kw + W])
        conv = jax.nn.sigmoid(acc + bias)                       # (H, W)
        sa = jnp.concatenate([conv[r:r + 1, :] for r in range(H)], axis=1)  # (1, HW)

        # out = xc * sa + x  ==  x * (1 + ca * sa)
        out_b = xb * (1.0 + ca * sa)                            # (C, HW)
        o_ref[b] = out_b.astype(o_ref.dtype)


def _pick_batch_tile(B, C, HW, itemsize, vmem_budget_bytes=8 << 20):
    """Largest divisor of B that fits the VMEM budget and keeps >= 2 grid steps."""
    slab = C * HW * max(itemsize, 4)
    cap = max(1, vmem_budget_bytes // (6 * slab))   # in+out double-buffered + temps
    if B >= 2:
        cap = min(cap, max(1, B // 2))              # keep megacore fed
    bt = 1
    for d in range(1, min(B, cap) + 1):
        if B % d == 0:
            bt = d
    return bt


def cbam_forward(x, w1, w2, w_sp, b_sp, kernel_size):
    """x: (B, C, H, W) f32; w1: (C_hid, C); w2: (C, C_hid);
    w_sp: (1, 2, K, K); b_sp: (1,)."""
    B, C, H, W = x.shape
    C_hid = w1.shape[0]
    K = kernel_size
    HW = H * W

    x2 = x.reshape(B, C, HW)                      # lane-dense last dim
    wsp_flat = w_sp.reshape(-1).astype(jnp.float32)   # (2*K*K,), max-channel first
    bsp = b_sp.astype(jnp.float32)

    Bt = _pick_batch_tile(B, C, HW, jnp.dtype(x.dtype).itemsize)
    grid = (B // Bt,)

    block_bytes = Bt * C * HW * 4
    vmem_limit = int(min(48 << 20, max(32 << 20, 8 * block_bytes)))

    kernel = functools.partial(_cbam_kernel, K=K, H=H, W=W)
    out2 = pl.pallas_call(
        kernel,
        out_shape=jax.ShapeDtypeStruct((B, C, HW), x.dtype),
        grid_spec=pltpu.PrefetchScalarGridSpec(
            num_scalar_prefetch=0,
            grid=grid,
            in_specs=[
                pl.BlockSpec((Bt, C, HW), lambda b: (b, 0, 0)),
                pl.BlockSpec((C_hid, C), lambda b: (0, 0)),
                pl.BlockSpec((C, C_hid), lambda b: (0, 0)),
                pl.BlockSpec(memory_space=pltpu.MemorySpace.SMEM),
                pl.BlockSpec(memory_space=pltpu.MemorySpace.SMEM),
            ],
            out_specs=pl.BlockSpec((Bt, C, HW), lambda b: (b, 0, 0)),
        ),
        compiler_params=pltpu.CompilerParams(
            dimension_semantics=("parallel",),
            vmem_limit_bytes=vmem_limit,
        ),
    )(x2, w1, w2, wsp_flat, bsp)
    return out2.reshape(B, C, H, W)


def cbam_ref(x, w1, w2, w_sp, b_sp, K):
    """Pure-JAX reference mirroring the PyTorch forward."""
    maxp = jnp.max(x, axis=(2, 3))                # (B, C)
    avgp = jnp.mean(x, axis=(2, 3))               # (B, C)

    def se(v):
        h = jnp.maximum(v @ w1.T, 0.0)
        return h @ w2.T

    ca = jax.nn.sigmoid(se(maxp) + se(avgp))[:, :, None, None]
    xc = x * ca
    maxc = jnp.max(xc, axis=1, keepdims=True)
    avgc = jnp.mean(xc, axis=1, keepdims=True)
    cat = jnp.concatenate([maxc, avgc], axis=1)   # (B, 2, H, W)
    conv = lax.conv_general_dilated(
        cat, w_sp, window_strides=(1, 1),
        padding=[(K // 2, K // 2), (K // 2, K // 2)],
        dimension_numbers=("NCHW", "OIHW", "NCHW")) + b_sp[0]
    sa = jax.nn.sigmoid(conv)
    return xc * sa + x


if __name__ == "__main__":
    # Small shapes consistent with the module (in_chan divisible by reduction).
    B, C, H, W = 2, 32, 16, 16
    reduction = 4
    K = 7                                         # SpatialAttention kernel_size
    C_hid = C // reduction

    key = jax.random.PRNGKey(0)
    k1, k2, k3, k4, k5 = jax.random.split(key, 5)
    x = jax.random.normal(k1, (B, C, H, W), jnp.float32)
    # Deterministic synthetic params (kaiming-ish scales); no checkpoint loading.
    w1 = jax.random.normal(k2, (C_hid, C), jnp.float32) * (2.0 / C) ** 0.5
    w2 = jax.random.normal(k3, (C, C_hid), jnp.float32) * (2.0 / C_hid) ** 0.5
    w_sp = jax.random.normal(k4, (1, 2, K, K), jnp.float32) * 0.05
    b_sp = jax.random.normal(k5, (1,), jnp.float32) * 0.1

    out = cbam_forward(x, w1, w2, w_sp, b_sp, K)
    out = jax.block_until_ready(out)

    ref = cbam_ref(x, w1, w2, w_sp, b_sp, K)
    np.testing.assert_allclose(np.asarray(out), np.asarray(ref), rtol=1e-4, atol=1e-4)

    print("KERNEL_OK")
</pallas_src>

<mosaic_0001>
module attributes {stable_mosaic.version = 11 : i64} {
  func.func @_cbam_kernel(%arg0: i32, %arg1: memref<1x32x256xf32, #tpu.memory_space<vmem>>, %arg2: memref<8x32xf32, #tpu.memory_space<vmem>>, %arg3: memref<32x8xf32, #tpu.memory_space<vmem>>, %arg4: memref<98xf32, #tpu.memory_space<smem>>, %arg5: memref<1xf32, #tpu.memory_space<smem>>, %arg6: memref<1x32x256xf32, #tpu.memory_space<vmem>>) attributes {dimension_semantics = [#tpu.dimension_semantics<parallel>], iteration_bounds = array<i64: 2>, scalar_prefetch = 0 : i64, scratch_operands = 0 : i64, tpu.core_type = #tpu.core_type<tc>, window_params = [{transform_indices = @transform_0, window_bounds = array<i64: 1, 32, 256>}, {pipeline_mode = #tpu.pipeline_mode<synchronous>, transform_indices = @transform_1, window_bounds = array<i64: 8, 32>}, {pipeline_mode = #tpu.pipeline_mode<synchronous>, transform_indices = @transform_2, window_bounds = array<i64: 32, 8>}, {transform_indices = @transform_3, window_bounds = array<i64: 98>}, {transform_indices = @transform_4, window_bounds = array<i64: 1>}, {transform_indices = @transform_5, window_bounds = array<i64: 1, 32, 256>}]} {
    %c0 = arith.constant 0 : index
    %c0_0 = arith.constant 0 : index
    %0 = vector.load %arg2[%c0, %c0_0] : memref<8x32xf32, #tpu.memory_space<vmem>>, vector<8x32xf32>
    %c0_1 = arith.constant 0 : index
    %c0_2 = arith.constant 0 : index
    %1 = vector.load %arg3[%c0_1, %c0_2] : memref<32x8xf32, #tpu.memory_space<vmem>>, vector<32x8xf32>
    %c0_3 = arith.constant 0 : index
    %c0_4 = arith.constant 0 : index
    %c0_5 = arith.constant 0 : index
    %2 = vector.load %arg1[%c0_3, %c0_4, %c0_5] : memref<1x32x256xf32, #tpu.memory_space<vmem>>, vector<1x32x256xf32>
    %3 = vector.shape_cast %2 : vector<1x32x256xf32> to vector<32x256xf32>
    %cst = arith.constant dense<0xFF800000> : vector<32xf32>
    %4 = vector.multi_reduction <maximumf>, %3, %cst [1] : vector<32x256xf32> to vector<32xf32>
    %5 = vector.shape_cast %4 : vector<32xf32> to vector<32x1xf32>
    %cst_6 = arith.constant dense<0.000000e+00> : vector<32xf32>
    %6 = vector.multi_reduction <add>, %3, %cst_6 [1] : vector<32x256xf32> to vector<32xf32>
    %7 = vector.shape_cast %6 : vector<32xf32> to vector<32x1xf32>
    %cst_7 = arith.constant 3.906250e-03 : f32
    %8 = vector.broadcast %cst_7 : f32 to vector<32x1xf32>
    %9 = arith.mulf %7, %8 : vector<32x1xf32>
    %10 = tpu.concatenate %5, %9 in 1 : vector<32x1xf32>, vector<32x1xf32> -> vector<32x2xf32>
    %cst_8 = arith.constant dense<0.000000e+00> : vector<8x2xf32>
    %11 = tpu.matmul %0, %10, %cst_8 {dimension_numbers = #tpu.dot_dimension_numbers<[1], [0], [0], [1], [0, 0, 1, 1], [], []>} : vector<8x32xf32>, vector<32x2xf32>, vector<8x2xf32> -> vector<8x2xf32>
    %cst_9 = arith.constant 0.000000e+00 : f32
    %12 = vector.broadcast %cst_9 : f32 to vector<8x2xf32>
    %13 = arith.maximumf %11, %12 : vector<8x2xf32>
    %cst_10 = arith.constant dense<0.000000e+00> : vector<32x2xf32>
    %14 = tpu.matmul %1, %13, %cst_10 {dimension_numbers = #tpu.dot_dimension_numbers<[1], [0], [0], [1], [0, 0, 1, 1], [], []>} : vector<32x8xf32>, vector<8x2xf32>, vector<32x2xf32> -> vector<32x2xf32>
    %c0_11 = arith.constant 0 : index
    %15 = memref.load %arg4[%c0_11] : memref<98xf32, #tpu.memory_space<smem>>
    %c1 = arith.constant 1 : index
    %16 = memref.load %arg4[%c1] : memref<98xf32, #tpu.memory_space<smem>>
    %c2 = arith.constant 2 : index
    %17 = memref.load %arg4[%c2] : memref<98xf32, #tpu.memory_space<smem>>
    %c3 = arith.constant 3 : index
    %18 = memref.load %arg4[%c3] : memref<98xf32, #tpu.memory_space<smem>>
    %c4 = arith.constant 4 : index
    %19 = memref.load %arg4[%c4] : memref<98xf32, #tpu.memory_space<smem>>
    %c5 = arith.constant 5 : index
    %20 = memref.load %arg4[%c5] : memref<98xf32, #tpu.memory_space<smem>>
    %c6 = arith.constant 6 : index
    %21 = memref.load %arg4[%c6] : memref<98xf32, #tpu.memory_space<smem>>
    %c7 = arith.constant 7 : index
    %22 = memref.load %arg4[%c7] : memref<98xf32, #tpu.memory_space<smem>>
    %c8 = arith.constant 8 : index
    %23 = memref.load %arg4[%c8] : memref<98xf32, #tpu.memory_space<smem>>
    %c9 = arith.constant 9 : index
    %24 = memref.load %arg4[%c9] : memref<98xf32, #tpu.memory_space<smem>>
    %c10 = arith.constant 10 : index
    %25 = memref.load %arg4[%c10] : memref<98xf32, #tpu.memory_space<smem>>
    %c11 = arith.constant 11 : index
    %26 = memref.load %arg4[%c11] : memref<98xf32, #tpu.memory_space<smem>>
    %c12 = arith.constant 12 : index
    %27 = memref.load %arg4[%c12] : memref<98xf32, #tpu.memory_space<smem>>
    %c13 = arith.constant 13 : index
    %28 = memref.load %arg4[%c13] : memref<98xf32, #tpu.memory_space<smem>>
    %c14 = arith.constant 14 : index
    %29 = memref.load %arg4[%c14] : memref<98xf32, #tpu.memory_space<smem>>
    %c15 = arith.constant 15 : index
    %30 = memref.load %arg4[%c15] : memref<98xf32, #tpu.memory_space<smem>>
    %c16 = arith.constant 16 : index
    %31 = memref.load %arg4[%c16] : memref<98xf32, #tpu.memory_space<smem>>
    %c17 = arith.constant 17 : index
    %32 = memref.load %arg4[%c17] : memref<98xf32, #tpu.memory_space<smem>>
    %c18 = arith.constant 18 : index
    %33 = memref.load %arg4[%c18] : memref<98xf32, #tpu.memory_space<smem>>
    %c19 = arith.constant 19 : index
    %34 = memref.load %arg4[%c19] : memref<98xf32, #tpu.memory_space<smem>>
    %c20 = arith.constant 20 : index
    %35 = memref.load %arg4[%c20] : memref<98xf32, #tpu.memory_space<smem>>
    %c21 = arith.constant 21 : index
    %36 = memref.load %arg4[%c21] : memref<98xf32, #tpu.memory_space<smem>>
    %c22 = arith.constant 22 : index
    %37 = memref.load %arg4[%c22] : memref<98xf32, #tpu.memory_space<smem>>
    %c23 = arith.constant 23 : index
    %38 = memref.load %arg4[%c23] : memref<98xf32, #tpu.memory_space<smem>>
    %c24 = arith.constant 24 : index
    %39 = memref.load %arg4[%c24] : memref<98xf32, #tpu.memory_space<smem>>
    %c25 = arith.constant 25 : index
    %40 = memref.load %arg4[%c25] : memref<98xf32, #tpu.memory_space<smem>>
    %c26 = arith.constant 26 : index
    %41 = memref.load %arg4[%c26] : memref<98xf32, #tpu.memory_space<smem>>
    %c27 = arith.constant 27 : index
    %42 = memref.load %arg4[%c27] : memref<98xf32, #tpu.memory_space<smem>>
    %c28 = arith.constant 28 : index
    %43 = memref.load %arg4[%c28] : memref<98xf32, #tpu.memory_space<smem>>
    %c29 = arith.constant 29 : index
    %44 = memref.load %arg4[%c29] : memref<98xf32, #tpu.memory_space<smem>>
    %c30 = arith.constant 30 : index
    %45 = memref.load %arg4[%c30] : memref<98xf32, #tpu.memory_space<smem>>
    %c31 = arith.constant 31 : index
    %46 = memref.load %arg4[%c31] : memref<98xf32, #tpu.memory_space<smem>>
    %c32 = arith.constant 32 : index
    %47 = memref.load %arg4[%c32] : memref<98xf32, #tpu.memory_space<smem>>
    %c33 = arith.constant 33 : index
    %48 = memref.load %arg4[%c33] : memref<98xf32, #tpu.memory_space<smem>>
    %c34 = arith.constant 34 : index
    %49 = memref.load %arg4[%c34] : memref<98xf32, #tpu.memory_space<smem>>
    %c35 = arith.constant 35 : index
    %50 = memref.load %arg4[%c35] : memref<98xf32, #tpu.memory_space<smem>>
    %c36 = arith.constant 36 : index
    %51 = memref.load %arg4[%c36] : memref<98xf32, #tpu.memory_space<smem>>
    %c37 = arith.constant 37 : index
    %52 = memref.load %arg4[%c37] : memref<98xf32, #tpu.memory_space<smem>>
    %c38 = arith.constant 38 : index
    %53 = memref.load %arg4[%c38] : memref<98xf32, #tpu.memory_space<smem>>
    %c39 = arith.constant 39 : index
    %54 = memref.load %arg4[%c39] : memref<98xf32, #tpu.memory_space<smem>>
    %c40 = arith.constant 40 : index
    %55 = memref.load %arg4[%c40] : memref<98xf32, #tpu.memory_space<smem>>
    %c41 = arith.constant 41 : index
    %56 = memref.load %arg4[%c41] : memref<98xf32, #tpu.memory_space<smem>>
    %c42 = arith.constant 42 : index
    %57 = memref.load %arg4[%c42] : memref<98xf32, #tpu.memory_space<smem>>
    %c43 = arith.constant 43 : index
    %58 = memref.load %arg4[%c43] : memref<98xf32, #tpu.memory_space<smem>>
    %c44 = arith.constant 44 : index
    %59 = memref.load %arg4[%c44] : memref<98xf32, #tpu.memory_space<smem>>
    %c45 = arith.constant 45 : index
    %60 = memref.load %arg4[%c45] : memref<98xf32, #tpu.memory_space<smem>>
    %c46 = arith.constant 46 : index
    %61 = memref.load %arg4[%c46] : memref<98xf32, #tpu.memory_space<smem>>
    %c47 = arith.constant 47 : index
    %62 = memref.load %arg4[%c47] : memref<98xf32, #tpu.memory_space<smem>>
    %c48 = arith.constant 48 : index
    %63 = memref.load %arg4[%c48] : memref<98xf32, #tpu.memory_space<smem>>
    %c49 = arith.constant 49 : index
    %64 = memref.load %arg4[%c49] : memref<98xf32, #tpu.memory_space<smem>>
    %c50 = arith.constant 50 : index
    %65 = memref.load %arg4[%c50] : memref<98xf32, #tpu.memory_space<smem>>
    %c51 = arith.constant 51 : index
    %66 = memref.load %arg4[%c51] : memref<98xf32, #tpu.memory_space<smem>>
    %c52 = arith.constant 52 : index
    %67 = memref.load %arg4[%c52] : memref<98xf32, #tpu.memory_space<smem>>
    %c53 = arith.constant 53 : index
    %68 = memref.load %arg4[%c53] : memref<98xf32, #tpu.memory_space<smem>>
    %c54 = arith.constant 54 : index
    %69 = memref.load %arg4[%c54] : memref<98xf32, #tpu.memory_space<smem>>
    %c55 = arith.constant 55 : index
    %70 = memref.load %arg4[%c55] : memref<98xf32, #tpu.memory_space<smem>>
    %c56 = arith.constant 56 : index
    %71 = memref.load %arg4[%c56] : memref<98xf32, #tpu.memory_space<smem>>
    %c57 = arith.constant 57 : index
    %72 = memref.load %arg4[%c57] : memref<98xf32, #tpu.memory_space<smem>>
    %c58 = arith.constant 58 : index
    %73 = memref.load %arg4[%c58] : memref<98xf32, #tpu.memory_space<smem>>
    %c59 = arith.constant 59 : index
    %74 = memref.load %arg4[%c59] : memref<98xf32, #tpu.memory_space<smem>>
    %c60 = arith.constant 60 : index
    %75 = memref.load %arg4[%c60] : memref<98xf32, #tpu.memory_space<smem>>
    %c61 = arith.constant 61 : index
    %76 = memref.load %arg4[%c61] : memref<98xf32, #tpu.memory_space<smem>>
    %c62 = arith.constant 62 : index
    %77 = memref.load %arg4[%c62] : memref<98xf32, #tpu.memory_space<smem>>
    %c63 = arith.constant 63 : index
    %78 = memref.load %arg4[%c63] : memref<98xf32, #tpu.memory_space<smem>>
    %c64 = arith.constant 64 : index
    %79 = memref.load %arg4[%c64] : memref<98xf32, #tpu.memory_space<smem>>
    %c65 = arith.constant 65 : index
    %80 = memref.load %arg4[%c65] : memref<98xf32, #tpu.memory_space<smem>>
    %c66 = arith.constant 66 : index
    %81 = memref.load %arg4[%c66] : memref<98xf32, #tpu.memory_space<smem>>
    %c67 = arith.constant 67 : index
    %82 = memref.load %arg4[%c67] : memref<98xf32, #tpu.memory_space<smem>>
    %c68 = arith.constant 68 : index
    %83 = memref.load %arg4[%c68] : memref<98xf32, #tpu.memory_space<smem>>
    %c69 = arith.constant 69 : index
    %84 = memref.load %arg4[%c69] : memref<98xf32, #tpu.memory_space<smem>>
    %c70 = arith.constant 70 : index
    %85 = memref.load %arg4[%c70] : memref<98xf32, #tpu.memory_space<smem>>
    %c71 = arith.constant 71 : index
    %86 = memref.load %arg4[%c71] : memref<98xf32, #tpu.memory_space<smem>>
    %c72 = arith.constant 72 : index
    %87 = memref.load %arg4[%c72] : memref<98xf32, #tpu.memory_space<smem>>
    %c73 = arith.constant 73 : index
    %88 = memref.load %arg4[%c73] : memref<98xf32, #tpu.memory_space<smem>>
    %c74 = arith.constant 74 : index
    %89 = memref.load %arg4[%c74] : memref<98xf32, #tpu.memory_space<smem>>
    %c75 = arith.constant 75 : index
    %90 = memref.load %arg4[%c75] : memref<98xf32, #tpu.memory_space<smem>>
    %c76 = arith.constant 76 : index
    %91 = memref.load %arg4[%c76] : memref<98xf32, #tpu.memory_space<smem>>
    %c77 = arith.constant 77 : index
    %92 = memref.load %arg4[%c77] : memref<98xf32, #tpu.memory_space<smem>>
    %c78 = arith.constant 78 : index
    %93 = memref.load %arg4[%c78] : memref<98xf32, #tpu.memory_space<smem>>
    %c79 = arith.constant 79 : index
    %94 = memref.load %arg4[%c79] : memref<98xf32, #tpu.memory_space<smem>>
    %c80 = arith.constant 80 : index
    %95 = memref.load %arg4[%c80] : memref<98xf32, #tpu.memory_space<smem>>
    %c81 = arith.constant 81 : index
    %96 = memref.load %arg4[%c81] : memref<98xf32, #tpu.memory_space<smem>>
    %c82 = arith.constant 82 : index
    %97 = memref.load %arg4[%c82] : memref<98xf32, #tpu.memory_space<smem>>
    %c83 = arith.constant 83 : index
    %98 = memref.load %arg4[%c83] : memref<98xf32, #tpu.memory_space<smem>>
    %c84 = arith.constant 84 : index
    %99 = memref.load %arg4[%c84] : memref<98xf32, #tpu.memory_space<smem>>
    %c85 = arith.constant 85 : index
    %100 = memref.load %arg4[%c85] : memref<98xf32, #tpu.memory_space<smem>>
    %c86 = arith.constant 86 : index
    %101 = memref.load %arg4[%c86] : memref<98xf32, #tpu.memory_space<smem>>
    %c87 = arith.constant 87 : index
    %102 = memref.load %arg4[%c87] : memref<98xf32, #tpu.memory_space<smem>>
    %c88 = arith.constant 88 : index
    %103 = memref.load %arg4[%c88] : memref<98xf32, #tpu.memory_space<smem>>
    %c89 = arith.constant 89 : index
    %104 = memref.load %arg4[%c89] : memref<98xf32, #tpu.memory_space<smem>>
    %c90 = arith.constant 90 : index
    %105 = memref.load %arg4[%c90] : memref<98xf32, #tpu.memory_space<smem>>
    %c91 = arith.constant 91 : index
    %106 = memref.load %arg4[%c91] : memref<98xf32, #tpu.memory_space<smem>>
    %c92 = arith.constant 92 : index
    %107 = memref.load %arg4[%c92] : memref<98xf32, #tpu.memory_space<smem>>
    %c93 = arith.constant 93 : index
    %108 = memref.load %arg4[%c93] : memref<98xf32, #tpu.memory_space<smem>>
    %c94 = arith.constant 94 : index
    %109 = memref.load %arg4[%c94] : memref<98xf32, #tpu.memory_space<smem>>
    %c95 = arith.constant 95 : index
    %110 = memref.load %arg4[%c95] : memref<98xf32, #tpu.memory_space<smem>>
    %c96 = arith.constant 96 : index
    %111 = memref.load %arg4[%c96] : memref<98xf32, #tpu.memory_space<smem>>
    %c97 = arith.constant 97 : index
    %112 = memref.load %arg4[%c97] : memref<98xf32, #tpu.memory_space<smem>>
    %c0_12 = arith.constant 0 : index
    %113 = memref.load %arg5[%c0_12] : memref<1xf32, #tpu.memory_space<smem>>
    %cst_13 = arith.constant 0.000000e+00 : f32
    %114 = vector.broadcast %cst_13 : f32 to vector<3x16xf32>
    %cst_14 = arith.constant 0.000000e+00 : f32
    %115 = vector.broadcast %cst_14 : f32 to vector<22x3xf32>
    %c0_15 = arith.constant 0 : index
    %c0_16 = arith.constant 0 : index
    %c0_17 = arith.constant 0 : index
    %116 = vector.load %arg1[%c0_15, %c0_16, %c0_17] : memref<1x32x256xf32, #tpu.memory_space<vmem>>, vector<1x32x256xf32>
    %117 = vector.shape_cast %116 : vector<1x32x256xf32> to vector<32x256xf32>
    %118 = vector.extract_strided_slice %14 {offsets = [0, 0], sizes = [32, 1], strides = [1, 1]} : vector<32x2xf32> to vector<32x1xf32>
    %119 = vector.extract_strided_slice %14 {offsets = [0, 1], sizes = [32, 1], strides = [1, 1]} : vector<32x2xf32> to vector<32x1xf32>
    %120 = arith.addf %118, %119 : vector<32x1xf32>
    %121 = arith.negf %120 : vector<32x1xf32>
    %122 = math.exp %121 : vector<32x1xf32>
    %cst_18 = arith.constant 1.000000e+00 : f32
    %123 = vector.broadcast %cst_18 : f32 to vector<32x1xf32>
    %124 = arith.addf %123, %122 : vector<32x1xf32>
    %125 = arith.divf %123, %124 : vector<32x1xf32>
    %126 = vector.broadcast %125 : vector<32x1xf32> to vector<32x256xf32>
    %127 = arith.mulf %117, %126 : vector<32x256xf32>
    %cst_19 = arith.constant dense<0xFF800000> : vector<256xf32>
    %128 = vector.multi_reduction <maximumf>, %127, %cst_19 [0] : vector<32x256xf32> to vector<256xf32>
    %129 = vector.shape_cast %128 : vector<256xf32> to vector<1x256xf32>
    %cst_20 = arith.constant dense<0.000000e+00> : vector<256xf32>
    %130 = vector.multi_reduction <add>, %127, %cst_20 [0] : vector<32x256xf32> to vector<256xf32>
    %131 = vector.shape_cast %130 : vector<256xf32> to vector<1x256xf32>
    %cst_21 = arith.constant 3.125000e-02 : f32
    %132 = vector.broadcast %cst_21 : f32 to vector<1x256xf32>
    %133 = arith.mulf %131, %132 : vector<1x256xf32>
    %134 = vector.extract_strided_slice %129 {offsets = [0, 0], sizes = [1, 16], strides = [1, 1]} : vector<1x256xf32> to vector<1x16xf32>
    %135 = vector.extract_strided_slice %129 {offsets = [0, 16], sizes = [1, 16], strides = [1, 1]} : vector<1x256xf32> to vector<1x16xf32>
    %136 = vector.extract_strided_slice %129 {offsets = [0, 32], sizes = [1, 16], strides = [1, 1]} : vector<1x256xf32> to vector<1x16xf32>
    %137 = vector.extract_strided_slice %129 {offsets = [0, 48], sizes = [1, 16], strides = [1, 1]} : vector<1x256xf32> to vector<1x16xf32>
    %138 = vector.extract_strided_slice %129 {offsets = [0, 64], sizes = [1, 16], strides = [1, 1]} : vector<1x256xf32> to vector<1x16xf32>
    %139 = vector.extract_strided_slice %129 {offsets = [0, 80], sizes = [1, 16], strides = [1, 1]} : vector<1x256xf32> to vector<1x16xf32>
    %140 = vector.extract_strided_slice %129 {offsets = [0, 96], sizes = [1, 16], strides = [1, 1]} : vector<1x256xf32> to vector<1x16xf32>
    %141 = vector.extract_strided_slice %129 {offsets = [0, 112], sizes = [1, 16], strides = [1, 1]} : vector<1x256xf32> to vector<1x16xf32>
    %142 = vector.extract_strided_slice %129 {offsets = [0, 128], sizes = [1, 16], strides = [1, 1]} : vector<1x256xf32> to vector<1x16xf32>
    %143 = vector.extract_strided_slice %129 {offsets = [0, 144], sizes = [1, 16], strides = [1, 1]} : vector<1x256xf32> to vector<1x16xf32>
    %144 = vector.extract_strided_slice %129 {offsets = [0, 160], sizes = [1, 16], strides = [1, 1]} : vector<1x256xf32> to vector<1x16xf32>
    %145 = vector.extract_strided_slice %129 {offsets = [0, 176], sizes = [1, 16], strides = [1, 1]} : vector<1x256xf32> to vector<1x16xf32>
    %146 = vector.extract_strided_slice %129 {offsets = [0, 192], sizes = [1, 16], strides = [1, 1]} : vector<1x256xf32> to vector<1x16xf32>
    %147 = vector.extract_strided_slice %129 {offsets = [0, 208], sizes = [1, 16], strides = [1, 1]} : vector<1x256xf32> to vector<1x16xf32>
    %148 = vector.extract_strided_slice %129 {offsets = [0, 224], sizes = [1, 16], strides = [1, 1]} : vector<1x256xf32> to vector<1x16xf32>
    %149 = vector.extract_strided_slice %129 {offsets = [0, 240], sizes = [1, 16], strides = [1, 1]} : vector<1x256xf32> to vector<1x16xf32>
    %150 = tpu.concatenate %134, %135, %136, %137, %138, %139, %140, %141, %142, %143, %144, %145, %146, %147, %148, %149 in 0 : vector<1x16xf32>, vector<1x16xf32>, vector<1x16xf32>, vector<1x16xf32>, vector<1x16xf32>, vector<1x16xf32>, vector<1x16xf32>, vector<1x16xf32>, vector<1x16xf32>, vector<1x16xf32>, vector<1x16xf32>, vector<1x16xf32>, vector<1x16xf32>, vector<1x16xf32>, vector<1x16xf32>, vector<1x16xf32> -> vector<16x16xf32>
    %151 = tpu.concatenate %114, %150, %114 in 0 : vector<3x16xf32>, vector<16x16xf32>, vector<3x16xf32> -> vector<22x16xf32>
    %152 = tpu.concatenate %115, %151, %115 in 1 : vector<22x3xf32>, vector<22x16xf32>, vector<22x3xf32> -> vector<22x22xf32>
    %153 = vector.extract_strided_slice %133 {offsets = [0, 0], sizes = [1, 16], strides = [1, 1]} : vector<1x256xf32> to vector<1x16xf32>
    %154 = vector.extract_strided_slice %133 {offsets = [0, 16], sizes = [1, 16], strides = [1, 1]} : vector<1x256xf32> to vector<1x16xf32>
    %155 = vector.extract_strided_slice %133 {offsets = [0, 32], sizes = [1, 16], strides = [1, 1]} : vector<1x256xf32> to vector<1x16xf32>
    %156 = vector.extract_strided_slice %133 {offsets = [0, 48], sizes = [1, 16], strides = [1, 1]} : vector<1x256xf32> to vector<1x16xf32>
    %157 = vector.extract_strided_slice %133 {offsets = [0, 64], sizes = [1, 16], strides = [1, 1]} : vector<1x256xf32> to vector<1x16xf32>
    %158 = vector.extract_strided_slice %133 {offsets = [0, 80], sizes = [1, 16], strides = [1, 1]} : vector<1x256xf32> to vector<1x16xf32>
    %159 = vector.extract_strided_slice %133 {offsets = [0, 96], sizes = [1, 16], strides = [1, 1]} : vector<1x256xf32> to vector<1x16xf32>
    %160 = vector.extract_strided_slice %133 {offsets = [0, 112], sizes = [1, 16], strides = [1, 1]} : vector<1x256xf32> to vector<1x16xf32>
    %161 = vector.extract_strided_slice %133 {offsets = [0, 128], sizes = [1, 16], strides = [1, 1]} : vector<1x256xf32> to vector<1x16xf32>
    %162 = vector.extract_strided_slice %133 {offsets = [0, 144], sizes = [1, 16], strides = [1, 1]} : vector<1x256xf32> to vector<1x16xf32>
    %163 = vector.extract_strided_slice %133 {offsets = [0, 160], sizes = [1, 16], strides = [1, 1]} : vector<1x256xf32> to vector<1x16xf32>
    %164 = vector.extract_strided_slice %133 {offsets = [0, 176], sizes = [1, 16], strides = [1, 1]} : vector<1x256xf32> to vector<1x16xf32>
    %165 = vector.extract_strided_slice %133 {offsets = [0, 192], sizes = [1, 16], strides = [1, 1]} : vector<1x256xf32> to vector<1x16xf32>
    %166 = vector.extract_strided_slice %133 {offsets = [0, 208], sizes = [1, 16], strides = [1, 1]} : vector<1x256xf32> to vector<1x16xf32>
    %167 = vector.extract_strided_slice %133 {offsets = [0, 224], sizes = [1, 16], strides = [1, 1]} : vector<1x256xf32> to vector<1x16xf32>
    %168 = vector.extract_strided_slice %133 {offsets = [0, 240], sizes = [1, 16], strides = [1, 1]} : vector<1x256xf32> to vector<1x16xf32>
    %169 = tpu.concatenate %153, %154, %155, %156, %157, %158, %159, %160, %161, %162, %163, %164, %165, %166, %167, %168 in 0 : vector<1x16xf32>, vector<1x16xf32>, vector<1x16xf32>, vector<1x16xf32>, vector<1x16xf32>, vector<1x16xf32>, vector<1x16xf32>, vector<1x16xf32>, vector<1x16xf32>, vector<1x16xf32>, vector<1x16xf32>, vector<1x16xf32>, vector<1x16xf32>, vector<1x16xf32>, vector<1x16xf32>, vector<1x16xf32> -> vector<16x16xf32>
    %170 = tpu.concatenate %114, %169, %114 in 0 : vector<3x16xf32>, vector<16x16xf32>, vector<3x16xf32> -> vector<22x16xf32>
    %171 = tpu.concatenate %115, %170, %115 in 1 : vector<22x3xf32>, vector<22x16xf32>, vector<22x3xf32> -> vector<22x22xf32>
    %cst_22 = arith.constant 0.000000e+00 : f32
    %172 = vector.broadcast %cst_22 : f32 to vector<16x16xf32>
    %173 = vector.extract_strided_slice %152 {offsets = [0, 0], sizes = [16, 16], strides = [1, 1]} : vector<22x22xf32> to vector<16x16xf32>
    %174 = vector.broadcast %15 : f32 to vector<16x16xf32>
    %175 = arith.mulf %174, %173 : vector<16x16xf32>
    %176 = arith.addf %172, %175 : vector<16x16xf32>
    %177 = vector.extract_strided_slice %171 {offsets = [0, 0], sizes = [16, 16], strides = [1, 1]} : vector<22x22xf32> to vector<16x16xf32>
    %178 = vector.broadcast %64 : f32 to vector<16x16xf32>
    %179 = arith.mulf %178, %177 : vector<16x16xf32>
    %180 = arith.addf %176, %179 : vector<16x16xf32>
    %181 = vector.extract_strided_slice %152 {offsets = [0, 1], sizes = [16, 16], strides = [1, 1]} : vector<22x22xf32> to vector<16x16xf32>
    %182 = vector.broadcast %16 : f32 to vector<16x16xf32>
    %183 = arith.mulf %182, %181 : vector<16x16xf32>
    %184 = arith.addf %180, %183 : vector<16x16xf32>
    %185 = vector.extract_strided_slice %171 {offsets = [0, 1], sizes = [16, 16], strides = [1, 1]} : vector<22x22xf32> to vector<16x16xf32>
    %186 = vector.broadcast %65 : f32 to vector<16x16xf32>
    %187 = arith.mulf %186, %185 : vector<16x16xf32>
    %188 = arith.addf %184, %187 : vector<16x16xf32>
    %189 = vector.extract_strided_slice %152 {offsets = [0, 2], sizes = [16, 16], strides = [1, 1]} : vector<22x22xf32> to vector<16x16xf32>
    %190 = vector.broadcast %17 : f32 to vector<16x16xf32>
    %191 = arith.mulf %190, %189 : vector<16x16xf32>
    %192 = arith.addf %188, %191 : vector<16x16xf32>
    %193 = vector.extract_strided_slice %171 {offsets = [0, 2], sizes = [16, 16], strides = [1, 1]} : vector<22x22xf32> to vector<16x16xf32>
    %194 = vector.broadcast %66 : f32 to vector<16x16xf32>
    %195 = arith.mulf %194, %193 : vector<16x16xf32>
    %196 = arith.addf %192, %195 : vector<16x16xf32>
    %197 = vector.extract_strided_slice %152 {offsets = [0, 3], sizes = [16, 16], strides = [1, 1]} : vector<22x22xf32> to vector<16x16xf32>
    %198 = vector.broadcast %18 : f32 to vector<16x16xf32>
    %199 = arith.mulf %198, %197 : vector<16x16xf32>
    %200 = arith.addf %196, %199 : vector<16x16xf32>
    %201 = vector.extract_strided_slice %171 {offsets = [0, 3], sizes = [16, 16], strides = [1, 1]} : vector<22x22xf32> to vector<16x16xf32>
    %202 = vector.broadcast %67 : f32 to vector<16x16xf32>
    %203 = arith.mulf %202, %201 : vector<16x16xf32>
    %204 = arith.addf %200, %203 : vector<16x16xf32>
    %205 = vector.extract_strided_slice %152 {offsets = [0, 4], sizes = [16, 16], strides = [1, 1]} : vector<22x22xf32> to vector<16x16xf32>
    %206 = vector.broadcast %19 : f32 to vector<16x16xf32>
    %207 = arith.mulf %206, %205 : vector<16x16xf32>
    %208 = arith.addf %204, %207 : vector<16x16xf32>
    %209 = vector.extract_strided_slice %171 {offsets = [0, 4], sizes = [16, 16], strides = [1, 1]} : vector<22x22xf32> to vector<16x16xf32>
    %210 = vector.broadcast %68 : f32 to vector<16x16xf32>
    %211 = arith.mulf %210, %209 : vector<16x16xf32>
    %212 = arith.addf %208, %211 : vector<16x16xf32>
    %213 = vector.extract_strided_slice %152 {offsets = [0, 5], sizes = [16, 16], strides = [1, 1]} : vector<22x22xf32> to vector<16x16xf32>
    %214 = vector.broadcast %20 : f32 to vector<16x16xf32>
    %215 = arith.mulf %214, %213 : vector<16x16xf32>
    %216 = arith.addf %212, %215 : vector<16x16xf32>
    %217 = vector.extract_strided_slice %171 {offsets = [0, 5], sizes = [16, 16], strides = [1, 1]} : vector<22x22xf32> to vector<16x16xf32>
    %218 = vector.broadcast %69 : f32 to vector<16x16xf32>
    %219 = arith.mulf %218, %217 : vector<16x16xf32>
    %220 = arith.addf %216, %219 : vector<16x16xf32>
    %221 = vector.extract_strided_slice %152 {offsets = [0, 6], sizes = [16, 16], strides = [1, 1]} : vector<22x22xf32> to vector<16x16xf32>
    %222 = vector.broadcast %21 : f32 to vector<16x16xf32>
    %223 = arith.mulf %222, %221 : vector<16x16xf32>
    %224 = arith.addf %220, %223 : vector<16x16xf32>
    %225 = vector.extract_strided_slice %171 {offsets = [0, 6], sizes = [16, 16], strides = [1, 1]} : vector<22x22xf32> to vector<16x16xf32>
    %226 = vector.broadcast %70 : f32 to vector<16x16xf32>
    %227 = arith.mulf %226, %225 : vector<16x16xf32>
    %228 = arith.addf %224, %227 : vector<16x16xf32>
    %229 = vector.extract_strided_slice %152 {offsets = [1, 0], sizes = [16, 16], strides = [1, 1]} : vector<22x22xf32> to vector<16x16xf32>
    %230 = vector.broadcast %22 : f32 to vector<16x16xf32>
    %231 = arith.mulf %230, %229 : vector<16x16xf32>
    %232 = arith.addf %228, %231 : vector<16x16xf32>
    %233 = vector.extract_strided_slice %171 {offsets = [1, 0], sizes = [16, 16], strides = [1, 1]} : vector<22x22xf32> to vector<16x16xf32>
    %234 = vector.broadcast %71 : f32 to vector<16x16xf32>
    %235 = arith.mulf %234, %233 : vector<16x16xf32>
    %236 = arith.addf %232, %235 : vector<16x16xf32>
    %237 = vector.extract_strided_slice %152 {offsets = [1, 1], sizes = [16, 16], strides = [1, 1]} : vector<22x22xf32> to vector<16x16xf32>
    %238 = vector.broadcast %23 : f32 to vector<16x16xf32>
    %239 = arith.mulf %238, %237 : vector<16x16xf32>
    %240 = arith.addf %236, %239 : vector<16x16xf32>
    %241 = vector.extract_strided_slice %171 {offsets = [1, 1], sizes = [16, 16], strides = [1, 1]} : vector<22x22xf32> to vector<16x16xf32>
    %242 = vector.broadcast %72 : f32 to vector<16x16xf32>
    %243 = arith.mulf %242, %241 : vector<16x16xf32>
    %244 = arith.addf %240, %243 : vector<16x16xf32>
    %245 = vector.extract_strided_slice %152 {offsets = [1, 2], sizes = [16, 16], strides = [1, 1]} : vector<22x22xf32> to vector<16x16xf32>
    %246 = vector.broadcast %24 : f32 to vector<16x16xf32>
    %247 = arith.mulf %246, %245 : vector<16x16xf32>
    %248 = arith.addf %244, %247 : vector<16x16xf32>
    %249 = vector.extract_strided_slice %171 {offsets = [1, 2], sizes = [16, 16], strides = [1, 1]} : vector<22x22xf32> to vector<16x16xf32>
    %250 = vector.broadcast %73 : f32 to vector<16x16xf32>
    %251 = arith.mulf %250, %249 : vector<16x16xf32>
    %252 = arith.addf %248, %251 : vector<16x16xf32>
    %253 = vector.extract_strided_slice %152 {offsets = [1, 3], sizes = [16, 16], strides = [1, 1]} : vector<22x22xf32> to vector<16x16xf32>
    %254 = vector.broadcast %25 : f32 to vector<16x16xf32>
    %255 = arith.mulf %254, %253 : vector<16x16xf32>
    %256 = arith.addf %252, %255 : vector<16x16xf32>
    %257 = vector.extract_strided_slice %171 {offsets = [1, 3], sizes = [16, 16], strides = [1, 1]} : vector<22x22xf32> to vector<16x16xf32>
    %258 = vector.broadcast %74 : f32 to vector<16x16xf32>
    %259 = arith.mulf %258, %257 : vector<16x16xf32>
    %260 = arith.addf %256, %259 : vector<16x16xf32>
    %261 = vector.extract_strided_slice %152 {offsets = [1, 4], sizes = [16, 16], strides = [1, 1]} : vector<22x22xf32> to vector<16x16xf32>
    %262 = vector.broadcast %26 : f32 to vector<16x16xf32>
    %263 = arith.mulf %262, %261 : vector<16x16xf32>
    %264 = arith.addf %260, %263 : vector<16x16xf32>
    %265 = vector.extract_strided_slice %171 {offsets = [1, 4], sizes = [16, 16], strides = [1, 1]} : vector<22x22xf32> to vector<16x16xf32>
    %266 = vector.broadcast %75 : f32 to vector<16x16xf32>
    %267 = arith.mulf %266, %265 : vector<16x16xf32>
    %268 = arith.addf %264, %267 : vector<16x16xf32>
    %269 = vector.extract_strided_slice %152 {offsets = [1, 5], sizes = [16, 16], strides = [1, 1]} : vector<22x22xf32> to vector<16x16xf32>
    %270 = vector.broadcast %27 : f32 to vector<16x16xf32>
    %271 = arith.mulf %270, %269 : vector<16x16xf32>
    %272 = arith.addf %268, %271 : vector<16x16xf32>
    %273 = vector.extract_strided_slice %171 {offsets = [1, 5], sizes = [16, 16], strides = [1, 1]} : vector<22x22xf32> to vector<16x16xf32>
    %274 = vector.broadcast %76 : f32 to vector<16x16xf32>
    %275 = arith.mulf %274, %273 : vector<16x16xf32>
    %276 = arith.addf %272, %275 : vector<16x16xf32>
    %277 = vector.extract_strided_slice %152 {offsets = [1, 6], sizes = [16, 16], strides = [1, 1]} : vector<22x22xf32> to vector<16x16xf32>
    %278 = vector.broadcast %28 : f32 to vector<16x16xf32>
    %279 = arith.mulf %278, %277 : vector<16x16xf32>
    %280 = arith.addf %276, %279 : vector<16x16xf32>
    %281 = vector.extract_strided_slice %171 {offsets = [1, 6], sizes = [16, 16], strides = [1, 1]} : vector<22x22xf32> to vector<16x16xf32>
    %282 = vector.broadcast %77 : f32 to vector<16x16xf32>
    %283 = arith.mulf %282, %281 : vector<16x16xf32>
    %284 = arith.addf %280, %283 : vector<16x16xf32>
    %285 = vector.extract_strided_slice %152 {offsets = [2, 0], sizes = [16, 16], strides = [1, 1]} : vector<22x22xf32> to vector<16x16xf32>
    %286 = vector.broadcast %29 : f32 to vector<16x16xf32>
    %287 = arith.mulf %286, %285 : vector<16x16xf32>
    %288 = arith.addf %284, %287 : vector<16x16xf32>
    %289 = vector.extract_strided_slice %171 {offsets = [2, 0], sizes = [16, 16], strides = [1, 1]} : vector<22x22xf32> to vector<16x16xf32>
    %290 = vector.broadcast %78 : f32 to vector<16x16xf32>
    %291 = arith.mulf %290, %289 : vector<16x16xf32>
    %292 = arith.addf %288, %291 : vector<16x16xf32>
    %293 = vector.extract_strided_slice %152 {offsets = [2, 1], sizes = [16, 16], strides = [1, 1]} : vector<22x22xf32> to vector<16x16xf32>
    %294 = vector.broadcast %30 : f32 to vector<16x16xf32>
    %295 = arith.mulf %294, %293 : vector<16x16xf32>
    %296 = arith.addf %292, %295 : vector<16x16xf32>
    %297 = vector.extract_strided_slice %171 {offsets = [2, 1], sizes = [16, 16], strides = [1, 1]} : vector<22x22xf32> to vector<16x16xf32>
    %298 = vector.broadcast %79 : f32 to vector<16x16xf32>
    %299 = arith.mulf %298, %297 : vector<16x16xf32>
    %300 = arith.addf %296, %299 : vector<16x16xf32>
    %301 = vector.extract_strided_slice %152 {offsets = [2, 2], sizes = [16, 16], strides = [1, 1]} : vector<22x22xf32> to vector<16x16xf32>
    %302 = vector.broadcast %31 : f32 to vector<16x16xf32>
    %303 = arith.mulf %302, %301 : vector<16x16xf32>
    %304 = arith.addf %300, %303 : vector<16x16xf32>
    %305 = vector.extract_strided_slice %171 {offsets = [2, 2], sizes = [16, 16], strides = [1, 1]} : vector<22x22xf32> to vector<16x16xf32>
    %306 = vector.broadcast %80 : f32 to vector<16x16xf32>
    %307 = arith.mulf %306, %305 : vector<16x16xf32>
    %308 = arith.addf %304, %307 : vector<16x16xf32>
    %309 = vector.extract_strided_slice %152 {offsets = [2, 3], sizes = [16, 16], strides = [1, 1]} : vector<22x22xf32> to vector<16x16xf32>
    %310 = vector.broadcast %32 : f32 to vector<16x16xf32>
    %311 = arith.mulf %310, %309 : vector<16x16xf32>
    %312 = arith.addf %308, %311 : vector<16x16xf32>
    %313 = vector.extract_strided_slice %171 {offsets = [2, 3], sizes = [16, 16], strides = [1, 1]} : vector<22x22xf32> to vector<16x16xf32>
    %314 = vector.broadcast %81 : f32 to vector<16x16xf32>
    %315 = arith.mulf %314, %313 : vector<16x16xf32>
    %316 = arith.addf %312, %315 : vector<16x16xf32>
    %317 = vector.extract_strided_slice %152 {offsets = [2, 4], sizes = [16, 16], strides = [1, 1]} : vector<22x22xf32> to vector<16x16xf32>
    %318 = vector.broadcast %33 : f32 to vector<16x16xf32>
    %319 = arith.mulf %318, %317 : vector<16x16xf32>
    %320 = arith.addf %316, %319 : vector<16x16xf32>
    %321 = vector.extract_strided_slice %171 {offsets = [2, 4], sizes = [16, 16], strides = [1, 1]} : vector<22x22xf32> to vector<16x16xf32>
    %322 = vector.broadcast %82 : f32 to vector<16x16xf32>
    %323 = arith.mulf %322, %321 : vector<16x16xf32>
    %324 = arith.addf %320, %323 : vector<16x16xf32>
    %325 = vector.extract_strided_slice %152 {offsets = [2, 5], sizes = [16, 16], strides = [1, 1]} : vector<22x22xf32> to vector<16x16xf32>
    %326 = vector.broadcast %34 : f32 to vector<16x16xf32>
    %327 = arith.mulf %326, %325 : vector<16x16xf32>
    %328 = arith.addf %324, %327 : vector<16x16xf32>
    %329 = vector.extract_strided_slice %171 {offsets = [2, 5], sizes = [16, 16], strides = [1, 1]} : vector<22x22xf32> to vector<16x16xf32>
    %330 = vector.broadcast %83 : f32 to vector<16x16xf32>
    %331 = arith.mulf %330, %329 : vector<16x16xf32>
    %332 = arith.addf %328, %331 : vector<16x16xf32>
    %333 = vector.extract_strided_slice %152 {offsets = [2, 6], sizes = [16, 16], strides = [1, 1]} : vector<22x22xf32> to vector<16x16xf32>
    %334 = vector.broadcast %35 : f32 to vector<16x16xf32>
    %335 = arith.mulf %334, %333 : vector<16x16xf32>
    %336 = arith.addf %332, %335 : vector<16x16xf32>
    %337 = vector.extract_strided_slice %171 {offsets = [2, 6], sizes = [16, 16], strides = [1, 1]} : vector<22x22xf32> to vector<16x16xf32>
    %338 = vector.broadcast %84 : f32 to vector<16x16xf32>
    %339 = arith.mulf %338, %337 : vector<16x16xf32>
    %340 = arith.addf %336, %339 : vector<16x16xf32>
    %341 = vector.extract_strided_slice %152 {offsets = [3, 0], sizes = [16, 16], strides = [1, 1]} : vector<22x22xf32> to vector<16x16xf32>
    %342 = vector.broadcast %36 : f32 to vector<16x16xf32>
    %343 = arith.mulf %342, %341 : vector<16x16xf32>
    %344 = arith.addf %340, %343 : vector<16x16xf32>
    %345 = vector.extract_strided_slice %171 {offsets = [3, 0], sizes = [16, 16], strides = [1, 1]} : vector<22x22xf32> to vector<16x16xf32>
    %346 = vector.broadcast %85 : f32 to vector<16x16xf32>
    %347 = arith.mulf %346, %345 : vector<16x16xf32>
    %348 = arith.addf %344, %347 : vector<16x16xf32>
    %349 = vector.extract_strided_slice %152 {offsets = [3, 1], sizes = [16, 16], strides = [1, 1]} : vector<22x22xf32> to vector<16x16xf32>
    %350 = vector.broadcast %37 : f32 to vector<16x16xf32>
    %351 = arith.mulf %350, %349 : vector<16x16xf32>
    %352 = arith.addf %348, %351 : vector<16x16xf32>
    %353 = vector.extract_strided_slice %171 {offsets = [3, 1], sizes = [16, 16], strides = [1, 1]} : vector<22x22xf32> to vector<16x16xf32>
    %354 = vector.broadcast %86 : f32 to vector<16x16xf32>
    %355 = arith.mulf %354, %353 : vector<16x16xf32>
    %356 = arith.addf %352, %355 : vector<16x16xf32>
    %357 = vector.extract_strided_slice %152 {offsets = [3, 2], sizes = [16, 16], strides = [1, 1]} : vector<22x22xf32> to vector<16x16xf32>
    %358 = vector.broadcast %38 : f32 to vector<16x16xf32>
    %359 = arith.mulf %358, %357 : vector<16x16xf32>
    %360 = arith.addf %356, %359 : vector<16x16xf32>
    %361 = vector.extract_strided_slice %171 {offsets = [3, 2], sizes = [16, 16], strides = [1, 1]} : vector<22x22xf32> to vector<16x16xf32>
    %362 = vector.broadcast %87 : f32 to vector<16x16xf32>
    %363 = arith.mulf %362, %361 : vector<16x16xf32>
    %364 = arith.addf %360, %363 : vector<16x16xf32>
    %365 = vector.extract_strided_slice %152 {offsets = [3, 3], sizes = [16, 16], strides = [1, 1]} : vector<22x22xf32> to vector<16x16xf32>
    %366 = vector.broadcast %39 : f32 to vector<16x16xf32>
    %367 = arith.mulf %366, %365 : vector<16x16xf32>
    %368 = arith.addf %364, %367 : vector<16x16xf32>
    %369 = vector.extract_strided_slice %171 {offsets = [3, 3], sizes = [16, 16], strides = [1, 1]} : vector<22x22xf32> to vector<16x16xf32>
    %370 = vector.broadcast %88 : f32 to vector<16x16xf32>
    %371 = arith.mulf %370, %369 : vector<16x16xf32>
    %372 = arith.addf %368, %371 : vector<16x16xf32>
    %373 = vector.extract_strided_slice %152 {offsets = [3, 4], sizes = [16, 16], strides = [1, 1]} : vector<22x22xf32> to vector<16x16xf32>
    %374 = vector.broadcast %40 : f32 to vector<16x16xf32>
    %375 = arith.mulf %374, %373 : vector<16x16xf32>
    %376 = arith.addf %372, %375 : vector<16x16xf32>
    %377 = vector.extract_strided_slice %171 {offsets = [3, 4], sizes = [16, 16], strides = [1, 1]} : vector<22x22xf32> to vector<16x16xf32>
    %378 = vector.broadcast %89 : f32 to vector<16x16xf32>
    %379 = arith.mulf %378, %377 : vector<16x16xf32>
    %380 = arith.addf %376, %379 : vector<16x16xf32>
    %381 = vector.extract_strided_slice %152 {offsets = [3, 5], sizes = [16, 16], strides = [1, 1]} : vector<22x22xf32> to vector<16x16xf32>
    %382 = vector.broadcast %41 : f32 to vector<16x16xf32>
    %383 = arith.mulf %382, %381 : vector<16x16xf32>
    %384 = arith.addf %380, %383 : vector<16x16xf32>
    %385 = vector.extract_strided_slice %171 {offsets = [3, 5], sizes = [16, 16], strides = [1, 1]} : vector<22x22xf32> to vector<16x16xf32>
    %386 = vector.broadcast %90 : f32 to vector<16x16xf32>
    %387 = arith.mulf %386, %385 : vector<16x16xf32>
    %388 = arith.addf %384, %387 : vector<16x16xf32>
    %389 = vector.extract_strided_slice %152 {offsets = [3, 6], sizes = [16, 16], strides = [1, 1]} : vector<22x22xf32> to vector<16x16xf32>
    %390 = vector.broadcast %42 : f32 to vector<16x16xf32>
    %391 = arith.mulf %390, %389 : vector<16x16xf32>
    %392 = arith.addf %388, %391 : vector<16x16xf32>
    %393 = vector.extract_strided_slice %171 {offsets = [3, 6], sizes = [16, 16], strides = [1, 1]} : vector<22x22xf32> to vector<16x16xf32>
    %394 = vector.broadcast %91 : f32 to vector<16x16xf32>
    %395 = arith.mulf %394, %393 : vector<16x16xf32>
    %396 = arith.addf %392, %395 : vector<16x16xf32>
    %397 = vector.extract_strided_slice %152 {offsets = [4, 0], sizes = [16, 16], strides = [1, 1]} : vector<22x22xf32> to vector<16x16xf32>
    %398 = vector.broadcast %43 : f32 to vector<16x16xf32>
    %399 = arith.mulf %398, %397 : vector<16x16xf32>
    %400 = arith.addf %396, %399 : vector<16x16xf32>
    %401 = vector.extract_strided_slice %171 {offsets = [4, 0], sizes = [16, 16], strides = [1, 1]} : vector<22x22xf32> to vector<16x16xf32>
    %402 = vector.broadcast %92 : f32 to vector<16x16xf32>
    %403 = arith.mulf %402, %401 : vector<16x16xf32>
    %404 = arith.addf %400, %403 : vector<16x16xf32>
    %405 = vector.extract_strided_slice %152 {offsets = [4, 1], sizes = [16, 16], strides = [1, 1]} : vector<22x22xf32> to vector<16x16xf32>
    %406 = vector.broadcast %44 : f32 to vector<16x16xf32>
    %407 = arith.mulf %406, %405 : vector<16x16xf32>
    %408 = arith.addf %404, %407 : vector<16x16xf32>
    %409 = vector.extract_strided_slice %171 {offsets = [4, 1], sizes = [16, 16], strides = [1, 1]} : vector<22x22xf32> to vector<16x16xf32>
    %410 = vector.broadcast %93 : f32 to vector<16x16xf32>
    %411 = arith.mulf %410, %409 : vector<16x16xf32>
    %412 = arith.addf %408, %411 : vector<16x16xf32>
    %413 = vector.extract_strided_slice %152 {offsets = [4, 2], sizes = [16, 16], strides = [1, 1]} : vector<22x22xf32> to vector<16x16xf32>
    %414 = vector.broadcast %45 : f32 to vector<16x16xf32>
    %415 = arith.mulf %414, %413 : vector<16x16xf32>
    %416 = arith.addf %412, %415 : vector<16x16xf32>
    %417 = vector.extract_strided_slice %171 {offsets = [4, 2], sizes = [16, 16], strides = [1, 1]} : vector<22x22xf32> to vector<16x16xf32>
    %418 = vector.broadcast %94 : f32 to vector<16x16xf32>
    %419 = arith.mulf %418, %417 : vector<16x16xf32>
    %420 = arith.addf %416, %419 : vector<16x16xf32>
    %421 = vector.extract_strided_slice %152 {offsets = [4, 3], sizes = [16, 16], strides = [1, 1]} : vector<22x22xf32> to vector<16x16xf32>
    %422 = vector.broadcast %46 : f32 to vector<16x16xf32>
    %423 = arith.mulf %422, %421 : vector<16x16xf32>
    %424 = arith.addf %420, %423 : vector<16x16xf32>
    %425 = vector.extract_strided_slice %171 {offsets = [4, 3], sizes = [16, 16], strides = [1, 1]} : vector<22x22xf32> to vector<16x16xf32>
    %426 = vector.broadcast %95 : f32 to vector<16x16xf32>
    %427 = arith.mulf %426, %425 : vector<16x16xf32>
    %428 = arith.addf %424, %427 : vector<16x16xf32>
    %429 = vector.extract_strided_slice %152 {offsets = [4, 4], sizes = [16, 16], strides = [1, 1]} : vector<22x22xf32> to vector<16x16xf32>
    %430 = vector.broadcast %47 : f32 to vector<16x16xf32>
    %431 = arith.mulf %430, %429 : vector<16x16xf32>
    %432 = arith.addf %428, %431 : vector<16x16xf32>
    %433 = vector.extract_strided_slice %171 {offsets = [4, 4], sizes = [16, 16], strides = [1, 1]} : vector<22x22xf32> to vector<16x16xf32>
    %434 = vector.broadcast %96 : f32 to vector<16x16xf32>
    %435 = arith.mulf %434, %433 : vector<16x16xf32>
    %436 = arith.addf %432, %435 : vector<16x16xf32>
    %437 = vector.extract_strided_slice %152 {offsets = [4, 5], sizes = [16, 16], strides = [1, 1]} : vector<22x22xf32> to vector<16x16xf32>
    %438 = vector.broadcast %48 : f32 to vector<16x16xf32>
    %439 = arith.mulf %438, %437 : vector<16x16xf32>
    %440 = arith.addf %436, %439 : vector<16x16xf32>
    %441 = vector.extract_strided_slice %171 {offsets = [4, 5], sizes = [16, 16], strides = [1, 1]} : vector<22x22xf32> to vector<16x16xf32>
    %442 = vector.broadcast %97 : f32 to vector<16x16xf32>
    %443 = arith.mulf %442, %441 : vector<16x16xf32>
    %444 = arith.addf %440, %443 : vector<16x16xf32>
    %445 = vector.extract_strided_slice %152 {offsets = [4, 6], sizes = [16, 16], strides = [1, 1]} : vector<22x22xf32> to vector<16x16xf32>
    %446 = vector.broadcast %49 : f32 to vector<16x16xf32>
    %447 = arith.mulf %446, %445 : vector<16x16xf32>
    %448 = arith.addf %444, %447 : vector<16x16xf32>
    %449 = vector.extract_strided_slice %171 {offsets = [4, 6], sizes = [16, 16], strides = [1, 1]} : vector<22x22xf32> to vector<16x16xf32>
    %450 = vector.broadcast %98 : f32 to vector<16x16xf32>
    %451 = arith.mulf %450, %449 : vector<16x16xf32>
    %452 = arith.addf %448, %451 : vector<16x16xf32>
    %453 = vector.extract_strided_slice %152 {offsets = [5, 0], sizes = [16, 16], strides = [1, 1]} : vector<22x22xf32> to vector<16x16xf32>
    %454 = vector.broadcast %50 : f32 to vector<16x16xf32>
    %455 = arith.mulf %454, %453 : vector<16x16xf32>
    %456 = arith.addf %452, %455 : vector<16x16xf32>
    %457 = vector.extract_strided_slice %171 {offsets = [5, 0], sizes = [16, 16], strides = [1, 1]} : vector<22x22xf32> to vector<16x16xf32>
    %458 = vector.broadcast %99 : f32 to vector<16x16xf32>
    %459 = arith.mulf %458, %457 : vector<16x16xf32>
    %460 = arith.addf %456, %459 : vector<16x16xf32>
    %461 = vector.extract_strided_slice %152 {offsets = [5, 1], sizes = [16, 16], strides = [1, 1]} : vector<22x22xf32> to vector<16x16xf32>
    %462 = vector.broadcast %51 : f32 to vector<16x16xf32>
    %463 = arith.mulf %462, %461 : vector<16x16xf32>
    %464 = arith.addf %460, %463 : vector<16x16xf32>
    %465 = vector.extract_strided_slice %171 {offsets = [5, 1], sizes = [16, 16], strides = [1, 1]} : vector<22x22xf32> to vector<16x16xf32>
    %466 = vector.broadcast %100 : f32 to vector<16x16xf32>
    %467 = arith.mulf %466, %465 : vector<16x16xf32>
    %468 = arith.addf %464, %467 : vector<16x16xf32>
    %469 = vector.extract_strided_slice %152 {offsets = [5, 2], sizes = [16, 16], strides = [1, 1]} : vector<22x22xf32> to vector<16x16xf32>
    %470 = vector.broadcast %52 : f32 to vector<16x16xf32>
    %471 = arith.mulf %470, %469 : vector<16x16xf32>
    %472 = arith.addf %468, %471 : vector<16x16xf32>
    %473 = vector.extract_strided_slice %171 {offsets = [5, 2], sizes = [16, 16], strides = [1, 1]} : vector<22x22xf32> to vector<16x16xf32>
    %474 = vector.broadcast %101 : f32 to vector<16x16xf32>
    %475 = arith.mulf %474, %473 : vector<16x16xf32>
    %476 = arith.addf %472, %475 : vector<16x16xf32>
    %477 = vector.extract_strided_slice %152 {offsets = [5, 3], sizes = [16, 16], strides = [1, 1]} : vector<22x22xf32> to vector<16x16xf32>
    %478 = vector.broadcast %53 : f32 to vector<16x16xf32>
    %479 = arith.mulf %478, %477 : vector<16x16xf32>
    %480 = arith.addf %476, %479 : vector<16x16xf32>
    %481 = vector.extract_strided_slice %171 {offsets = [5, 3], sizes = [16, 16], strides = [1, 1]} : vector<22x22xf32> to vector<16x16xf32>
    %482 = vector.broadcast %102 : f32 to vector<16x16xf32>
    %483 = arith.mulf %482, %481 : vector<16x16xf32>
    %484 = arith.addf %480, %483 : vector<16x16xf32>
    %485 = vector.extract_strided_slice %152 {offsets = [5, 4], sizes = [16, 16], strides = [1, 1]} : vector<22x22xf32> to vector<16x16xf32>
    %486 = vector.broadcast %54 : f32 to vector<16x16xf32>
    %487 = arith.mulf %486, %485 : vector<16x16xf32>
    %488 = arith.addf %484, %487 : vector<16x16xf32>
    %489 = vector.extract_strided_slice %171 {offsets = [5, 4], sizes = [16, 16], strides = [1, 1]} : vector<22x22xf32> to vector<16x16xf32>
    %490 = vector.broadcast %103 : f32 to vector<16x16xf32>
    %491 = arith.mulf %490, %489 : vector<16x16xf32>
    %492 = arith.addf %488, %491 : vector<16x16xf32>
    %493 = vector.extract_strided_slice %152 {offsets = [5, 5], sizes = [16, 16], strides = [1, 1]} : vector<22x22xf32> to vector<16x16xf32>
    %494 = vector.broadcast %55 : f32 to vector<16x16xf32>
    %495 = arith.mulf %494, %493 : vector<16x16xf32>
    %496 = arith.addf %492, %495 : vector<16x16xf32>
    %497 = vector.extract_strided_slice %171 {offsets = [5, 5], sizes = [16, 16], strides = [1, 1]} : vector<22x22xf32> to vector<16x16xf32>
    %498 = vector.broadcast %104 : f32 to vector<16x16xf32>
    %499 = arith.mulf %498, %497 : vector<16x16xf32>
    %500 = arith.addf %496, %499 : vector<16x16xf32>
    %501 = vector.extract_strided_slice %152 {offsets = [5, 6], sizes = [16, 16], strides = [1, 1]} : vector<22x22xf32> to vector<16x16xf32>
    %502 = vector.broadcast %56 : f32 to vector<16x16xf32>
    %503 = arith.mulf %502, %501 : vector<16x16xf32>
    %504 = arith.addf %500, %503 : vector<16x16xf32>
    %505 = vector.extract_strided_slice %171 {offsets = [5, 6], sizes = [16, 16], strides = [1, 1]} : vector<22x22xf32> to vector<16x16xf32>
    %506 = vector.broadcast %105 : f32 to vector<16x16xf32>
    %507 = arith.mulf %506, %505 : vector<16x16xf32>
    %508 = arith.addf %504, %507 : vector<16x16xf32>
    %509 = vector.extract_strided_slice %152 {offsets = [6, 0], sizes = [16, 16], strides = [1, 1]} : vector<22x22xf32> to vector<16x16xf32>
    %510 = vector.broadcast %57 : f32 to vector<16x16xf32>
    %511 = arith.mulf %510, %509 : vector<16x16xf32>
    %512 = arith.addf %508, %511 : vector<16x16xf32>
    %513 = vector.extract_strided_slice %171 {offsets = [6, 0], sizes = [16, 16], strides = [1, 1]} : vector<22x22xf32> to vector<16x16xf32>
    %514 = vector.broadcast %106 : f32 to vector<16x16xf32>
    %515 = arith.mulf %514, %513 : vector<16x16xf32>
    %516 = arith.addf %512, %515 : vector<16x16xf32>
    %517 = vector.extract_strided_slice %152 {offsets = [6, 1], sizes = [16, 16], strides = [1, 1]} : vector<22x22xf32> to vector<16x16xf32>
    %518 = vector.broadcast %58 : f32 to vector<16x16xf32>
    %519 = arith.mulf %518, %517 : vector<16x16xf32>
    %520 = arith.addf %516, %519 : vector<16x16xf32>
    %521 = vector.extract_strided_slice %171 {offsets = [6, 1], sizes = [16, 16], strides = [1, 1]} : vector<22x22xf32> to vector<16x16xf32>
    %522 = vector.broadcast %107 : f32 to vector<16x16xf32>
    %523 = arith.mulf %522, %521 : vector<16x16xf32>
    %524 = arith.addf %520, %523 : vector<16x16xf32>
    %525 = vector.extract_strided_slice %152 {offsets = [6, 2], sizes = [16, 16], strides = [1, 1]} : vector<22x22xf32> to vector<16x16xf32>
    %526 = vector.broadcast %59 : f32 to vector<16x16xf32>
    %527 = arith.mulf %526, %525 : vector<16x16xf32>
    %528 = arith.addf %524, %527 : vector<16x16xf32>
    %529 = vector.extract_strided_slice %171 {offsets = [6, 2], sizes = [16, 16], strides = [1, 1]} : vector<22x22xf32> to vector<16x16xf32>
    %530 = vector.broadcast %108 : f32 to vector<16x16xf32>
    %531 = arith.mulf %530, %529 : vector<16x16xf32>
    %532 = arith.addf %528, %531 : vector<16x16xf32>
    %533 = vector.extract_strided_slice %152 {offsets = [6, 3], sizes = [16, 16], strides = [1, 1]} : vector<22x22xf32> to vector<16x16xf32>
    %534 = vector.broadcast %60 : f32 to vector<16x16xf32>
    %535 = arith.mulf %534, %533 : vector<16x16xf32>
    %536 = arith.addf %532, %535 : vector<16x16xf32>
    %537 = vector.extract_strided_slice %171 {offsets = [6, 3], sizes = [16, 16], strides = [1, 1]} : vector<22x22xf32> to vector<16x16xf32>
    %538 = vector.broadcast %109 : f32 to vector<16x16xf32>
    %539 = arith.mulf %538, %537 : vector<16x16xf32>
    %540 = arith.addf %536, %539 : vector<16x16xf32>
    %541 = vector.extract_strided_slice %152 {offsets = [6, 4], sizes = [16, 16], strides = [1, 1]} : vector<22x22xf32> to vector<16x16xf32>
    %542 = vector.broadcast %61 : f32 to vector<16x16xf32>
    %543 = arith.mulf %542, %541 : vector<16x16xf32>
    %544 = arith.addf %540, %543 : vector<16x16xf32>
    %545 = vector.extract_strided_slice %171 {offsets = [6, 4], sizes = [16, 16], strides = [1, 1]} : vector<22x22xf32> to vector<16x16xf32>
    %546 = vector.broadcast %110 : f32 to vector<16x16xf32>
    %547 = arith.mulf %546, %545 : vector<16x16xf32>
    %548 = arith.addf %544, %547 : vector<16x16xf32>
    %549 = vector.extract_strided_slice %152 {offsets = [6, 5], sizes = [16, 16], strides = [1, 1]} : vector<22x22xf32> to vector<16x16xf32>
    %550 = vector.broadcast %62 : f32 to vector<16x16xf32>
    %551 = arith.mulf %550, %549 : vector<16x16xf32>
    %552 = arith.addf %548, %551 : vector<16x16xf32>
    %553 = vector.extract_strided_slice %171 {offsets = [6, 5], sizes = [16, 16], strides = [1, 1]} : vector<22x22xf32> to vector<16x16xf32>
    %554 = vector.broadcast %111 : f32 to vector<16x16xf32>
    %555 = arith.mulf %554, %553 : vector<16x16xf32>
    %556 = arith.addf %552, %555 : vector<16x16xf32>
    %557 = vector.extract_strided_slice %152 {offsets = [6, 6], sizes = [16, 16], strides = [1, 1]} : vector<22x22xf32> to vector<16x16xf32>
    %558 = vector.broadcast %63 : f32 to vector<16x16xf32>
    %559 = arith.mulf %558, %557 : vector<16x16xf32>
    %560 = arith.addf %556, %559 : vector<16x16xf32>
    %561 = vector.extract_strided_slice %171 {offsets = [6, 6], sizes = [16, 16], strides = [1, 1]} : vector<22x22xf32> to vector<16x16xf32>
    %562 = vector.broadcast %112 : f32 to vector<16x16xf32>
    %563 = arith.mulf %562, %561 : vector<16x16xf32>
    %564 = arith.addf %560, %563 : vector<16x16xf32>
    %565 = vector.broadcast %113 : f32 to vector<16x16xf32>
    %566 = arith.addf %564, %565 : vector<16x16xf32>
    %567 = arith.negf %566 : vector<16x16xf32>
    %568 = math.exp %567 : vector<16x16xf32>
    %cst_23 = arith.constant 1.000000e+00 : f32
    %569 = vector.broadcast %cst_23 : f32 to vector<16x16xf32>
    %570 = arith.addf %569, %568 : vector<16x16xf32>
    %571 = arith.divf %569, %570 : vector<16x16xf32>
    %572 = vector.extract_strided_slice %571 {offsets = [0, 0], sizes = [1, 16], strides = [1, 1]} : vector<16x16xf32> to vector<1x16xf32>
    %573 = vector.extract_strided_slice %571 {offsets = [1, 0], sizes = [1, 16], strides = [1, 1]} : vector<16x16xf32> to vector<1x16xf32>
    %574 = vector.extract_strided_slice %571 {offsets = [2, 0], sizes = [1, 16], strides = [1, 1]} : vector<16x16xf32> to vector<1x16xf32>
    %575 = vector.extract_strided_slice %571 {offsets = [3, 0], sizes = [1, 16], strides = [1, 1]} : vector<16x16xf32> to vector<1x16xf32>
    %576 = vector.extract_strided_slice %571 {offsets = [4, 0], sizes = [1, 16], strides = [1, 1]} : vector<16x16xf32> to vector<1x16xf32>
    %577 = vector.extract_strided_slice %571 {offsets = [5, 0], sizes = [1, 16], strides = [1, 1]} : vector<16x16xf32> to vector<1x16xf32>
    %578 = vector.extract_strided_slice %571 {offsets = [6, 0], sizes = [1, 16], strides = [1, 1]} : vector<16x16xf32> to vector<1x16xf32>
    %579 = vector.extract_strided_slice %571 {offsets = [7, 0], sizes = [1, 16], strides = [1, 1]} : vector<16x16xf32> to vector<1x16xf32>
    %580 = vector.extract_strided_slice %571 {offsets = [8, 0], sizes = [1, 16], strides = [1, 1]} : vector<16x16xf32> to vector<1x16xf32>
    %581 = vector.extract_strided_slice %571 {offsets = [9, 0], sizes = [1, 16], strides = [1, 1]} : vector<16x16xf32> to vector<1x16xf32>
    %582 = vector.extract_strided_slice %571 {offsets = [10, 0], sizes = [1, 16], strides = [1, 1]} : vector<16x16xf32> to vector<1x16xf32>
    %583 = vector.extract_strided_slice %571 {offsets = [11, 0], sizes = [1, 16], strides = [1, 1]} : vector<16x16xf32> to vector<1x16xf32>
    %584 = vector.extract_strided_slice %571 {offsets = [12, 0], sizes = [1, 16], strides = [1, 1]} : vector<16x16xf32> to vector<1x16xf32>
    %585 = vector.extract_strided_slice %571 {offsets = [13, 0], sizes = [1, 16], strides = [1, 1]} : vector<16x16xf32> to vector<1x16xf32>
    %586 = vector.extract_strided_slice %571 {offsets = [14, 0], sizes = [1, 16], strides = [1, 1]} : vector<16x16xf32> to vector<1x16xf32>
    %587 = vector.extract_strided_slice %571 {offsets = [15, 0], sizes = [1, 16], strides = [1, 1]} : vector<16x16xf32> to vector<1x16xf32>
    %588 = tpu.concatenate %572, %573, %574, %575, %576, %577, %578, %579, %580, %581, %582, %583, %584, %585, %586, %587 in 1 : vector<1x16xf32>, vector<1x16xf32>, vector<1x16xf32>, vector<1x16xf32>, vector<1x16xf32>, vector<1x16xf32>, vector<1x16xf32>, vector<1x16xf32>, vector<1x16xf32>, vector<1x16xf32>, vector<1x16xf32>, vector<1x16xf32>, vector<1x16xf32>, vector<1x16xf32>, vector<1x16xf32>, vector<1x16xf32> -> vector<1x256xf32>
    %589 = vector.broadcast %125 : vector<32x1xf32> to vector<32x256xf32>
    %590 = vector.broadcast %588 : vector<1x256xf32> to vector<32x256xf32>
    %591 = arith.mulf %589, %590 : vector<32x256xf32>
    %cst_24 = arith.constant 1.000000e+00 : f32
    %592 = vector.broadcast %cst_24 : f32 to vector<32x256xf32>
    %593 = arith.addf %592, %591 : vector<32x256xf32>
    %594 = arith.mulf %117, %593 : vector<32x256xf32>
    %c0_25 = arith.constant 0 : index
    %c0_26 = arith.constant 0 : index
    %c0_27 = arith.constant 0 : index
    %595 = vector.load %arg6[%c0_25, %c0_26, %c0_27] : memref<1x32x256xf32, #tpu.memory_space<vmem>>, vector<1x32x256xf32>
    %596 = vector.shape_cast %595 : vector<1x32x256xf32> to vector<32x256xf32>
    %597 = vector.shape_cast %594 : vector<32x256xf32> to vector<1x32x256xf32>
    tpu.vector_store %arg6[%c0_25, %c0_26, %c0_27], %597 {strides = array<i32>} : memref<1x32x256xf32, #tpu.memory_space<vmem>>, vector<1x32x256xf32>,
    return
  }
  func.func @transform_0(%arg0: i32) -> (i32, i32, i32) {
    %c0_i32 = arith.constant 0 : i32
    %c0_i32_0 = arith.constant 0 : i32
    %c0_i32_1 = arith.constant 0 : i32
    return %arg0, %c0_i32, %c0_i32_0 : i32, i32, i32
  }
  func.func @transform_1(%arg0: i32) -> (i32, i32) {
    %c0_i32 = arith.constant 0 : i32
    %c0_i32_0 = arith.constant 0 : i32
    %c0_i32_1 = arith.constant 0 : i32
    return %c0_i32, %c0_i32_0 : i32, i32
  }
  func.func @transform_2(%arg0: i32) -> (i32, i32) {
    %c0_i32 = arith.constant 0 : i32
    %c0_i32_0 = arith.constant 0 : i32
    %c0_i32_1 = arith.constant 0 : i32
    return %c0_i32, %c0_i32_0 : i32, i32
  }
  func.func @transform_3(%arg0: i32) -> i32 {
    %c0_i32 = arith.constant 0 : i32
    %c0_i32_0 = arith.constant 0 : i32
    return %c0_i32 : i32
  }
  func.func @transform_4(%arg0: i32) -> i32 {
    %c0_i32 = arith.constant 0 : i32
    %c0_i32_0 = arith.constant 0 : i32
    return %c0_i32 : i32
  }
  func.func @transform_5(%arg0: i32) -> (i32, i32, i32) {
    %c0_i32 = arith.constant 0 : i32
    %c0_i32_0 = arith.constant 0 : i32
    %c0_i32_1 = arith.constant 0 : i32
    return %arg0, %c0_i32, %c0_i32_0 : i32, i32, i32
  }
}

</mosaic_0001>

<bundles_post_ra>
// kernel: tpu_custom_call.1
= control target key start
LH: loop header
LB: loop body
LE: loop exit
PB: predicated region body
PF: predicated region fallthrough
CT: control target
= control target key end

     0   :  { %s4731_s0 = inlined_call_operand.hbm [shape: f32[2,32,256], index: 0, kind: input, shape index: {}]   ;;  %s4732_s1 = inlined_call_operand.vmem [shape: f32[8,32], index: 1, kind: input, shape index: {}]   ;;  %s4733_s2 = inlined_call_operand.vmem [shape: f32[32,8], index: 2, kind: input, shape index: {}]   ;;  %s4734_s3 = inlined_call_operand.vmem [shape: f32[98], index: 3, kind: input, shape index: {}]   ;;  %s4735_s4 = inlined_call_operand.<no memory space> [shape: f32[1], index: 4, kind: input, shape index: {}]   ;;  %s4736_s5 = inlined_call_operand.hbm [shape: f32[2,32,256], index: 5, kind: output, shape index: {}]  }
   0x1   :  { %4756 = sst [smem:[#allocation62_spill]] %s4734_s3 }
   0x2   :  { %10 = sst [smem:[#allocation2]] %s4735_s4 }
   0x3   :  { %11 = vsyncpa [#allocation4], 0 }
   0x4   :  { %13 = vsyncpa [#allocation4 + $0x1], 0 }
   0x5   :  { %14 = vsyncpa [#allocation6], 0 }
   0x6   :  { %15 = vsyncpa [#allocation5], 0 }
   0x7   :  { %17 = vsyncpa [#allocation5 + $0x1], 0  ;;  %s3270_s20 = smov 0   ;;  %s3272_s21 = smov 0  }
   0x8   :  { %s3274_s22 = smov 0   ;;  %s3276_s23 = smov 0  }
   0x9 LB: > { %s3291_s4 = sadd.s32 4294967295, %s3216_s23   ;;  %s2863_s24 = sadd.s32 4294967294, %s3216_s23   ;;  %s3216_s23 = sphi %s3276_s23, %s4874_s23   ;;  %s3212_s22 = sphi %s3274_s22, %s4873_s22   ;;  %s3208_s21 = sphi %s3272_s21, %s4872_s21   ;;  %s3204_s20 = sphi %s3270_s20, %s4871_s20  }
   0xa   : > { %s3295_s25 = sadd.s32 1, %s3216_s23   ;;  %s30_s26 = sadd.s32 1, %s3212_s22 }
   0xb   : > { %s27_s27 = ssub.s32 %s3216_s23, %s3295_s25  ;;  %p37_p0 = scmp.ne.s32.totalorder %s3212_s22, %s3208_s21 }
   0xc   : > { %p28_p1 = scmp.eq.s32.totalorder %s27_s27, 0  ;;  %p38_p2 = scmp.eq.s32.totalorder %s3216_s23, 0 }
   0xd   : > { %p43_p3 = scmp.ne.s32.totalorder %s3208_s21, %s3204_s20  ;;  %p44_p4 = scmp.eq.s32.totalorder %s3291_s4, 0 }
   0xe   : > { %s3307_s28 = scalar_select %p28_p1, %s3212_s22, %s30_s26  }
   0xf   : > { %p3309_p5 = por %p38_p2, %p37_p0  ;;  %p3315_p6 = por %p44_p4, %p43_p3 }
  0x10   : > { %p151_p7 = scmp.eq.s32.totalorder %s3291_s4, 1  ;;  %p157_p8 = scmp.eq.s32.totalorder %s2863_s24, 1 }
  0x11   : > { %p2864_p9 = scmp.ge.s32.totalorder %s3216_s23, 1  ;;  %p164_p10 = scmp.lt.s32.totalorder %s3216_s23, 3 }
  0x12   : > { %p3322_p11 = por %p151_p7, %p37_p0  ;;  %p3326_p12 = por %p157_p8, %p43_p3 }
  0x13   : > { %p3330_p13 = pnand %p2864_p9, %p164_p10  ;;  %s4762_s3 = sld [smem:[#allocation62_spill]] }
  0x14   : > { %p3012_p2 = scmp.lt.s32.totalorder %s3216_s23, 2  ;;  %s196_s12 = sand.u32 1, %s3212_s22  }
  0x15   : > { %p2999_p1 = pneg %p3330_p13  ;;  %s2867_s14 = sshll.u32 %s196_s12, 6 }
  0x16   : > { %p3346_p3 = pnand %p3012_p2, %p3309_p5  ;;  %s3218_s15 = smov [#allocation7]  }
  0x17   : > { %p3000_p7 = pnand %p2999_p1, %p44_p4  ;;  %s2987_s16 = sshll.u32 %s3216_s23, 6 }
  0x18   : > { %s200_s17 = scalar_lea.vmem [#allocation3], %s2867_s14  ;;  %s205_s26 = scalar_lea.hbm %s4731_s0, %s2987_s16 }
  0x19   : > { %s182_s11 = sshll.u32 %s4762_s3, 4  ;;  %s208_s18 = sshll.u32 %s200_s17, 4  ;;  %s183_s11 = int_to_ptr.vmem [resolvable:$true] %s182_s11  ;;  %s209_s18 = int_to_ptr.vmem [resolvable:$true] %s208_s18 }
  0x1a   : > { %3002 = dma.vmem_to_smem (!%p3000_p7), %s183_s11, 16, %s3218_s15, [#allocation6]  }
  0x1b   : > { %s206_s27 = sshll.u32 %s205_s26, 4  ;;  %s197_s9 = scalar_lea.sflag [#allocation4], %s196_s12  ;;  %s207_s27 = int_to_ptr.hbm [resolvable:$true] %s206_s27 }
  0x1c   : > { %s3116_s29 = sshra.s32 %s207_s27, 4  ;;  %p3120_p8 = pneg %p3346_p3  ;;  %s3117_s29 = int_to_ptr.hbm [resolvable:$true] %s3116_s29 }
  0x1d   : > { %s3118_s10 = scalar_lea.hbm %s3117_s29, 64  ;;  %s3123_s14 = scalar_lea.hbm %s4731_s0, 128 }
  0x1e   : > { %p3119_p5 = scmp.ne.s32.totalorder %s3117_s29, %s3118_s10  ;;  %p3124_p1 = scmp.lt.s32.totalorder %s3117_s29, %s4731_s0 }
  0x1f   : > { %p3125_p2 = scmp.lt.s32.totalorder %s3123_s14, %s3118_s10 }
  0x20   : > { %p3121_p9 = pnand %p3120_p8, %p3119_p5 }
  0x21   : > { %p3126_p7 = por %p3125_p2, %p3124_p1 }
  0x22   : > { %p3122_p10 = pneg %p3121_p9 }
  0x24   : > { %p3127_p0 = pnand %p3126_p7, %p3122_p10 }
  0x26   : > { %3130 = shalt.err (!%p3127_p0)
}
  0x27   : > { %s3219_s12 = smov 256   ;;  %s3220_s16 = smov 16  }
  0x28   : > { %3006 = dma.hbm_to_vmem [thread:$0]  (!%p3346_p3), %s207_s27, 1024, %s209_s18, %s197_s9, %s3219_s12, %s3219_s12, %s3220_s16  }
  0x29   : > { %220 = sbr.rel (%p3330_p13) target bundleno = 1766 (0x6e6), region = 40 }
  0x2e   : > { %s3367_s19 = sand.u32 1, %s3208_s21  }
  0x2f   : > { %s4737_s3 = sshll.u32 %s3367_s19, 6  ;;  %s223_s24 = scalar_lea.sflag [#allocation4], %s3367_s19 }
  0x30   : > { %s3373_s26 = scalar_lea.vmem [#allocation3], %s4737_s3 }
  0x31   : > { %3191 = dma.done.wait (%p3315_p6), %s223_s24, 1024  }
  0x32   : > { %3193 = vsyncadd (%p3315_p6), %s223_s24, 4294966272 }
  0x33   : > { %3195 = dma.done.wait (%p44_p4), [#allocation6], 16  }
  0x34   : > { %3197 = vsyncadd (%p44_p4), [#allocation6], 4294967280 }
  0x35   : > { %237 = sfence }
  0x36   : > { %v3384_v0 = vld [vmem:[%s3373_s26 + $0x30] sm:$0xff]  ;;  %v3387_v1 = vld [vmem:[%s3373_s26 + $0x38] sm:$0xff]  ;;  %v3390_v2 = vld [vmem:[%s3373_s26 + $0x20] sm:$0xff]  ;;  %vm301_vm0 = vcmask 7168   ;;  %vm306_vm1 = vcmask 261120   ;;  %vm331_vm2 = vcmask 64512  }
  0x37   : > { %v294_v3 = vadd.f32 %v3387_v1, %v3384_v0  ;;  %v3395_v4 = vld [vmem:[%s3373_s26 + $0x28] sm:$0xff]  ;;  %v3398_v5 = vld [vmem:[%s3373_s26 + $0x10] sm:$0xff]  ;;  %v3401_v6 = vld [vmem:[%s3373_s26 + $0x18] sm:$0xff]  ;;  %v282_v9 = vmax.f32 %v3384_v0, %v3387_v1  ;;  %s3221_s14 = smov 127   ;;  %v3222_v43 = vmov 0   ;;  %s3223_s17 = smov 80  }
  0x38   : > { %v291_v7 = vadd.f32 %v3395_v4, %v3390_v2  ;;  %v288_v8 = vadd.f32 %v3401_v6, %v3398_v5  ;;  %v279_v10 = vmax.f32 %v3390_v2, %v3395_v4  ;;  %v276_v11 = vmax.f32 %v3398_v5, %v3401_v6  ;;  %v3414_v12 = vld [vmem:[%s3373_s26] sm:$0xff]  ;;  %v3417_v13 = vld [vmem:[%s3373_s26 + $0x8] sm:$0xff]  ;;  %v264_v37 = vld [vmem:[%s4733_s2 + $0x18] sm:$0xff]  ;;  %3066 = vset.pattern.permute.xlu0 %v3222_v43  ;;  %s4740_s12 = smov 96   ;;  %s4738_s16 = smov 112  }
  0x39   : > { %295 = vadd.xlane.f32.xlu0 %v294_v3  ;;  %v285_v14 = vadd.f32 %v3417_v13, %v3414_v12  ;;  %v273_v15 = vmax.f32 %v3414_v12, %v3417_v13  ;;  %v260_v31 = vld [vmem:[%s4732_s1] sm:$0xff]  ;;  %v262_v36 = vld [vmem:[%s4733_s2 + $0x8] sm:$0xff]  ;;  %v263_v38 = vld [vmem:[%s4733_s2 + $0x10] sm:$0xff]  ;;  %3067 = vset.pattern.permute.xlu2 %v3222_v43  ;;  %s3226_s24 = smov 32   ;;  %s3227_s30 = smov 48  }
  0x3a   : > { %292 = vadd.xlane.f32.xlu1 %v291_v7  ;;  %289 = vadd.xlane.f32.xlu2 %v288_v8  ;;  %v261_v35 = vld [vmem:[%s4733_s2] sm:$0xff]  ;;  %s4742_s8 = smov 64   ;;  %s3229_s13 = smov 16  }
  0x3b   : > { %3068 = vset.pattern.permute.xlu1 %v3222_v43  ;;  %s3230_s18 = smov 3   ;;  %s2879_s27 = sld [smem:[#allocation7 + $0x1]] }
  0x3c   : > { %s2881_s9 = sld [smem:[#allocation7 + $0x3]]  ;;  %s3231_s11 = smov 125  }
  0x3d   : > { %s2880_s29 = sld [smem:[#allocation7 + $0x2]]  ;;  %s3232_s15 = smov 126  }
  0x3e   : > { %s2882_s10 = sld [smem:[#allocation7 + $0x4]]  ;;  %s3235_s3 = smov 123  }
  0x41   : > { %283 = vmax.xlane.f32.xlu0 %v282_v9 }
  0x42   : > { %280 = vmax.xlane.f32.xlu1 %v279_v10  ;;  %277 = vmax.xlane.f32.xlu2 %v276_v11 }
  0x49   : > { %286 = vadd.xlane.f32.xlu0 %v285_v14 }
  0x4a   : > { %274 = vmax.xlane.f32.xlu1 %v273_v15 }
  0xac   : > { %v296_v16 = vpop.xlane.xlu0 %295 }
  0xad   : > { %v293_v17 = vpop.xlane.xlu1 %292  ;;  %v290_v18 = vpop.xlane.xlu2 %289  ;;  %v300_v19 = vmul.f32 0.00390625, %v296_v16 }
  0xae   : > { %v299_v21 = vmul.f32 0.00390625, %v293_v17  ;;  %v298_v22 = vmul.f32 0.00390625, %v290_v18 }
  0xb4   : > { %v284_v20 = vpop.xlane.xlu0 %283 }
  0xb5   : > { %v281_v23 = vpop.xlane.xlu1 %280  ;;  %v305_v24 = vsel %vm301_vm0, %v284_v20, %v300_v19  ;;  %v278_v25 = vpop.xlane.xlu2 %277 }
  0xb6   : > { %322 = vmatpush.msra.mxu0 %v305_v24  ;;  %v304_v26 = vsel %vm301_vm0, %v281_v23, %v299_v21  ;;  %v303_v27 = vsel %vm301_vm0, %v278_v25, %v298_v22 }
  0xb8   : > { %323 = vmatpush.msra.mxu0 %v304_v26 }
  0xba   : > { %324 = vmatpush.msra.mxu0 %v303_v27 }
  0xbc   : > { %v287_v28 = vpop.xlane.xlu0 %286 }
  0xbd   : > { %v297_v29 = vmul.f32 0.00390625, %v287_v28  ;;  %v275_v30 = vpop.xlane.xlu1 %274 }
  0xbf   : > { %v302_v32 = vsel %vm301_vm0, %v275_v30, %v297_v29 }
  0xc0   : > { %325 = vmatpush.msra.mxu0 %v302_v32 }
  0xc1   : > { %2874 = vmatmul.msk.f32.vlgmr.msra.gmra.mxu0 %vm306_vm1, %v260_v31 }
 0x13e   : > { %v327_v33 = vpop.f32.mrf.mxu0 }
 0x13f   : > { %v330_v34 = vmax.f32 %v327_v33, 0.0 }
 0x141   : > { %359 = vmatpush.msra.mxu1 %v330_v34  ;;  %2989 = vmatpush.msra.mxu2 %v330_v34 }
 0x142   : > { %2990 = vmatpush.msra.mxu3 %v330_v34  ;;  %2875 = vmatmul.msk.f32.vlgmr.msra.gmra.mxu1 %vm331_vm2, %v261_v35 }
 0x143   : > { %2876 = vmatmul.msk.f32.vlgmr.msra.gmra.mxu2 %vm331_vm2, %v262_v36  ;;  %2878 = vmatmul.msk.f32.vlgmr.msra.gmra.mxu3 %vm331_vm2, %v264_v37 }
 0x14b   : > { %2877 = vmatmul.msk.f32.gmra.mxu2 %vm331_vm2, %v263_v38 }
 0x1bf   : > { %v361_v39 = vpop.f32.mrf.mxu1 }
 0x1c0   : > { %476 = vrot.lane.b32.xlu2 %v361_v39, %s3221_s14 }
 0x1c6   : > { %v364_v40 = vpop.f32.mrf.mxu2  ;;  %v370_v41 = vpop.f32.mrf.mxu3 }
 0x1c7   : > { %478 = vrot.lane.b32.xlu0 %v364_v40, %s3221_s14 }
 0x1c8   : > { %482 = vrot.lane.b32.xlu2 %v370_v41, %s3221_s14 }
 0x1ce   : > { %v367_v42 = vpop.f32.mrf.mxu2 }
 0x1cf   : > { %480 = vrot.lane.b32.xlu1 %v367_v42, %s3221_s14 }
 0x21a   : > { %v477_v44 = vpop.permute.xlu2 %476 }
 0x21b   : > { %v488_v45 = vadd.f32 %v477_v44, %v361_v39 }
 0x21d   : > { %v2976_v46 = vmul.f32 -1.442695, %v488_v45 }
 0x21f   : > { %3069 = vpow2.f32 %v2976_v46 }
 0x222   : > { %v483_v49 = vpop.permute.xlu2 %482 }
 0x223   : > { %v491_v51 = vadd.f32 %v483_v49, %v370_v41 }
 0x225   : > { %v3070_v47 = vpop.eup %3069  ;;  %v2979_v54 = vmul.f32 -1.442695, %v491_v51 }
 0x226   : > { %v504_v48 = vadd.f32 1.0, %v3070_v47 }
 0x228   : > { %3071 = vrcp.f32 %v504_v48  ;;  %v519_v55 = vand.u32 2147483648, %v504_v48  ;;  %v517_v57 = vand.u32 2147483647, %v504_v48  ;;  %vm513_vm4 = vweird.f32 %v504_v48 }
 0x229   : > { %3073 = vpow2.f32 %v2979_v54 }
 0x22a   : > { %v520_v59 = vor.u32 1.1754944e-38, %v519_v55  ;;  %vm518_vm6 = vcmp.eq.f32.partialorder %v517_v57, 8.507059e+37 }
 0x22e   : > { %v3072_v50 = vpop.eup %3071 }
 0x22f   : > { %v509_v52 = vmul.f32 %v3072_v50, %v504_v48  ;;  %vm514_vm3 = vweird.f32 %v3072_v50  ;;  %v3074_v3 = vpop.eup %3073 }
 0x230   : > { %vm515_vm5 = vmor %vm513_vm4, %vm514_vm3  ;;  %v507_v8 = vadd.f32 1.0, %v3074_v3  ;;  %vm678_vm4 = vcmask 1040384  }
 0x231   : > { %v510_v53 = vsub.f32 1.0, %v509_v52 }
 0x232   : > { %vm558_vm12 = vweird.f32 %v507_v8  ;;  %v564_v37 = vand.u32 2147483648, %v507_v8 }
 0x233   : > { %v511_v56 = vmul.f32 %v3072_v50, %v510_v53 }
 0x234   : > { %v565_v44 = vor.u32 1.1754944e-38, %v564_v37 }
 0x235   : > { %v512_v58 = vadd.f32 %v3072_v50, %v511_v56 }
 0x237   : > { %v516_v60 = vsel %vm515_vm5, %v3072_v50, %v512_v58  ;;  %vm680_vm5 = vcmask 1041408  }
 0x238   : > { %v521_v61 = vsel %vm518_vm6, %v520_v59, %v516_v60  ;;  %vm682_vm6 = vcmask 1042432  }
 0x239   : > { %v479_v62 = vpop.permute.xlu0 %478  ;;  %570 = vperm.xlu0 %3066, %v521_v61  }
 0x23a   : > { %v489_v63 = vadd.f32 %v479_v62, %v364_v40  ;;  %v562_v40 = vand.u32 2147483647, %v507_v8 }
 0x23c   : > { %v2977_v7 = vmul.f32 -1.442695, %v489_v63  ;;  %vm563_vm3 = vcmp.eq.f32.partialorder %v562_v40, 8.507059e+37 }
 0x23e   : > { %3075 = vpow2.f32 %v2977_v7 }
 0x23f   : > { %3077 = vrcp.f32 %v507_v8 }
 0x241   : > { %v481_v9 = vpop.permute.xlu1 %480 }
 0x242   : > { %v490_v10 = vadd.f32 %v481_v9, %v367_v42 }
 0x244   : > { %v3076_v11 = vpop.eup %3075  ;;  %v2978_v14 = vmul.f32 -1.442695, %v490_v10 }
 0x245   : > { %v505_v15 = vadd.f32 1.0, %v3076_v11  ;;  %v3078_v16 = vpop.eup %3077 }
 0x246   : > { %3079 = vpow2.f32 %v2978_v14  ;;  %v554_v18 = vmul.f32 %v3078_v16, %v507_v8  ;;  %vm559_vm11 = vweird.f32 %v3078_v16 }
 0x247   : > { %3081 = vrcp.f32 %v505_v15  ;;  %v534_v24 = vand.u32 2147483648, %v505_v15  ;;  %v532_v26 = vand.u32 2147483647, %v505_v15  ;;  %vm528_vm8 = vweird.f32 %v505_v15  ;;  %vm560_vm14 = vmor %vm558_vm12, %vm559_vm11 }
 0x248   : > { %v555_v23 = vsub.f32 1.0, %v554_v18  ;;  %vm719_vm11 = vcmask 23552   ;;  %vm723_vm12 = vcmask 154624  }
 0x249   : > { %v535_v30 = vor.u32 1.1754944e-38, %v534_v24  ;;  %vm533_vm10 = vcmp.eq.f32.partialorder %v532_v26, 8.507059e+37 }
 0x24a   : > { %v556_v28 = vmul.f32 %v3078_v16, %v555_v23 }
 0x24c   : > { %v3080_v17 = vpop.eup %3079  ;;  %v557_v35 = vadd.f32 %v3078_v16, %v556_v28 }
 0x24d   : > { %v3082_v19 = vpop.eup %3081  ;;  %v506_v20 = vadd.f32 1.0, %v3080_v17 }
 0x24e   : > { %v524_v21 = vmul.f32 %v3082_v19, %v505_v15  ;;  %vm529_vm7 = vweird.f32 %v3082_v19  ;;  %v561_v42 = vsel %vm560_vm14, %v3078_v16, %v557_v35 }
 0x24f   : > { %3083 = vrcp.f32 %v506_v20  ;;  %vm530_vm9 = vmor %vm528_vm8, %vm529_vm7  ;;  %v549_v36 = vand.u32 2147483648, %v506_v20  ;;  %v547_v39 = vand.u32 2147483647, %v506_v20  ;;  %vm543_vm15 = vweird.f32 %v506_v20 }
 0x250   : > { %v525_v22 = vsub.f32 1.0, %v524_v21  ;;  %v566_v47 = vsel %vm563_vm3, %v565_v44, %v561_v42  ;;  %vm684_vm7 = vcmask 1043456   ;;  %vm686_vm8 = vcmask 1044480  }
 0x251   : > { %v550_v43 = vor.u32 1.1754944e-38, %v549_v36  ;;  %vm548_vm2 = vcmp.eq.f32.partialorder %v547_v39, 8.507059e+37 }
 0x252   : > { %v526_v25 = vmul.f32 %v3082_v19, %v525_v22 }
 0x254   : > { %v527_v27 = vadd.f32 %v3082_v19, %v526_v25 }
 0x255   : > { %v3084_v29 = vpop.eup %3083 }
 0x256   : > { %v531_v31 = vsel %vm530_vm9, %v3082_v19, %v527_v27  ;;  %v539_v32 = vmul.f32 %v3084_v29, %v506_v20  ;;  %vm544_vm13 = vweird.f32 %v3084_v29  ;;  %vm688_vm9 = vcmask 1045504  }
 0x257   : > { %v536_v33 = vsel %vm533_vm10, %v535_v30, %v531_v31  ;;  %vm545_vm0 = vmor %vm543_vm15, %vm544_vm13  ;;  %vm690_vm10 = vcmask 1046528  }
 0x258   : > { %575 = vperm.xlu2 %3067, %v536_v33   ;;  %v540_v34 = vsub.f32 1.0, %v539_v32 }
 0x25a   : > { %v541_v38 = vmul.f32 %v3084_v29, %v540_v34 }
 0x25c   : > { %v542_v41 = vadd.f32 %v3084_v29, %v541_v38 }
 0x25e   : > { %v546_v45 = vsel %vm545_vm0, %v3084_v29, %v542_v41 }
 0x25f   : > { %v551_v46 = vsel %vm548_vm2, %v550_v43, %v546_v45 }
 0x260   : > { %580 = vperm.xlu1 %3068, %v551_v46   ;;  %585 = vperm.xlu2 %3067, %v566_v47  }
 0x2ab   : > { %v3451_v50 = vpop.permute.xlu0 %570 }
 0x2ac   : > { %4766 = vst [vmem:[#allocation14_spill] sm:$0xff] %v3451_v50  ;;  %v588_v53 = vmul.f32 %v3451_v50, %v3414_v12  ;;  %v589_v57 = vmul.f32 %v3451_v50, %v3417_v13 }
 0x2b2   : > { %v3447_v48 = vpop.permute.xlu2 %575 }
 0x2b3   : > { %4764 = vst [vmem:[#allocation12_spill] sm:$0xff] %v3447_v48  ;;  %v590_v54 = vmul.f32 %v3447_v48, %v3398_v5  ;;  %v591_v12 = vmul.f32 %v3447_v48, %v3401_v6 }
 0x2b5   : > { %v614_v8 = vadd.f32 %v590_v54, %v588_v53  ;;  %v623_v21 = vadd.f32 %v591_v12, %v589_v57 }
 0x2ba   : > { %v3449_v49 = vpop.permute.xlu2 %585 }
 0x2bb   : > { %4765 = vst [vmem:[#allocation13_spill] sm:$0xff] %v3449_v49  ;;  %v594_v51 = vmul.f32 %v3449_v49, %v3384_v0  ;;  %v595_v0 = vmul.f32 %v3449_v49, %v3387_v1 }
 0x2bd   : > { %v597_v58 = vmax.f32 %v590_v54, %v594_v51  ;;  %v606_v5 = vmax.f32 %v591_v12, %v595_v0 }
 0x2d2   : > { %v3455_v52 = vpop.permute.xlu1 %580 }
 0x2d3   : > { %4767 = vst [vmem:[#allocation15_spill] sm:$0xff] %v3455_v52  ;;  %v592_v55 = vmul.f32 %v3455_v52, %v3390_v2  ;;  %v593_v56 = vmul.f32 %v3455_v52, %v3395_v4 }
 0x2d5   : > { %v596_v59 = vmax.f32 %v588_v53, %v592_v55  ;;  %v605_v61 = vmax.f32 %v589_v57, %v593_v56  ;;  %v615_v1 = vadd.f32 %v614_v8, %v592_v55  ;;  %v624_v23 = vadd.f32 %v623_v21, %v593_v56 }
 0x2d7   : > { %v598_v60 = vmax.f32 %v596_v59, %v597_v58  ;;  %v607_v2 = vmax.f32 %v605_v61, %v606_v5  ;;  %v616_v11 = vadd.f32 %v615_v1, %v594_v51  ;;  %v625_v25 = vadd.f32 %v624_v23, %v595_v0 }
 0x2d9   : > { %v599_v62 = vrot.slane %v598_v60, 4  ;;  %v608_v4 = vrot.slane %v607_v2, 4  ;;  %v617_v15 = vrot.slane %v616_v11, 4  ;;  %v626_v26 = vrot.slane %v625_v25, 4 }
 0x2db   : > { %v600_v63 = vmax.f32 %v598_v60, %v599_v62  ;;  %v609_v10 = vmax.f32 %v607_v2, %v608_v4  ;;  %v618_v17 = vadd.f32 %v617_v15, %v616_v11  ;;  %v627_v28 = vadd.f32 %v626_v26, %v625_v25 }
 0x2dd   : > { %v601_v3 = vrot.slane %v600_v63, 2  ;;  %v610_v6 = vrot.slane %v609_v10, 2  ;;  %v619_v19 = vrot.slane %v618_v17, 2  ;;  %v628_v29 = vrot.slane %v627_v28, 2 }
 0x2df   : > { %v602_v7 = vmax.f32 %v600_v63, %v601_v3  ;;  %v611_v14 = vmax.f32 %v609_v10, %v610_v6  ;;  %v620_v20 = vadd.f32 %v619_v19, %v618_v17  ;;  %v629_v30 = vadd.f32 %v628_v29, %v627_v28 }
 0x2e1   : > { %v603_v9 = vrot.slane %v602_v7, 1  ;;  %v612_v16 = vrot.slane %v611_v14, 1  ;;  %v621_v22 = vrot.slane %v620_v20, 1  ;;  %v630_v31 = vrot.slane %v629_v30, 1 }
 0x2e3   : > { %v3471_v13 = vmax.f32 %v602_v7, %v603_v9  ;;  %v3485_v18 = vmax.f32 %v611_v14, %v612_v16  ;;  %v622_v24 = vadd.f32 %v621_v22, %v620_v20  ;;  %v631_v32 = vadd.f32 %v630_v31, %v629_v30 }
 0x2e5   : > { %641 = vrot.lane.b32.xlu2 %v3471_v13, %s3223_s17  ;;  %638 = vrot.lane.b32.xlu0 %v3471_v13, %s4740_s12  ;;  %v3499_v27 = vmul.f32 0.03125, %v622_v24  ;;  %v3519_v33 = vmul.f32 0.03125, %v631_v32 }
 0x2e6   : > { %635 = vrot.lane.b32.xlu1 %v3471_v13, %s4738_s16 }
 0x2ed   : > { %650 = vrot.lane.b32.xlu2 %v3471_v13, %s3226_s24  ;;  %647 = vrot.lane.b32.xlu0 %v3471_v13, %s3227_s30 }
 0x2ee   : > { %644 = vrot.lane.b32.xlu1 %v3471_v13, %s4742_s8 }
 0x2f5   : > { %660 = vrot.lane.b32.xlu2 %v3485_v18, %s4740_s12  ;;  %657 = vrot.lane.b32.xlu0 %v3485_v18, %s4738_s16 }
 0x2f6   : > { %653 = vrot.lane.b32.xlu1 %v3471_v13, %s3229_s13 }
 0x2fd   : > { %669 = vrot.lane.b32.xlu2 %v3485_v18, %s3227_s30  ;;  %666 = vrot.lane.b32.xlu0 %v3485_v18, %s4742_s8 }
 0x2fe   : > { %663 = vrot.lane.b32.xlu1 %v3485_v18, %s3223_s17 }
 0x305   : > { %728 = vrot.lane.b32.xlu2 %v3499_v27, %s4738_s16  ;;  %675 = vrot.lane.b32.xlu0 %v3485_v18, %s3229_s13 }
 0x306   : > { %672 = vrot.lane.b32.xlu1 %v3485_v18, %s3226_s24 }
 0x30d   : > { %737 = vrot.lane.b32.xlu2 %v3499_v27, %s4742_s8  ;;  %734 = vrot.lane.b32.xlu0 %v3499_v27, %s3223_s17 }
 0x30e   : > { %731 = vrot.lane.b32.xlu1 %v3499_v27, %s4740_s12 }
 0x315   : > { %746 = vrot.lane.b32.xlu2 %v3499_v27, %s3229_s13  ;;  %743 = vrot.lane.b32.xlu0 %v3499_v27, %s3226_s24 }
 0x316   : > { %740 = vrot.lane.b32.xlu1 %v3499_v27, %s3227_s30 }
 0x31d   : > { %756 = vrot.lane.b32.xlu2 %v3519_v33, %s3223_s17  ;;  %753 = vrot.lane.b32.xlu0 %v3519_v33, %s4740_s12  ;;  %s2933_s12 = sld [smem:[#allocation7 + $0x37]] }
 0x31e   : > { %750 = vrot.lane.b32.xlu1 %v3519_v33, %s4738_s16  ;;  %s2932_s16 = sld [smem:[#allocation7 + $0x36]] }
 0x325   : > { %765 = vrot.lane.b32.xlu2 %v3519_v33, %s3226_s24  ;;  %762 = vrot.lane.b32.xlu0 %v3519_v33, %s3227_s30 }
 0x326   : > { %759 = vrot.lane.b32.xlu1 %v3519_v33, %s4742_s8  ;;  %s2888_s8 = sld [smem:[#allocation7 + $0xa]] }
 0x32e   : > { %768 = vrot.lane.b32.xlu1 %v3519_v33, %s3229_s13 }
 0x33f   : > { %v642_v34 = vpop.permute.xlu2 %641 }
 0x347   : > { %v651_v36 = vpop.permute.xlu2 %650 }
 0x34f   : > { %v661_v43 = vpop.permute.xlu2 %660 }
 0x357   : > { %v639_v35 = vpop.permute.xlu0 %638  ;;  %v670_v55 = vpop.permute.xlu2 %669 }
 0x358   : > { %v636_v37 = vpop.permute.xlu1 %635 }
 0x359   : > { %v679_v38 = vsel %vm678_vm4, %v3471_v13, %v636_v37 }
 0x35a   : > { %v681_v39 = vsel %vm680_vm5, %v679_v38, %v639_v35 }
 0x35b   : > { %v683_v42 = vsel %vm682_vm6, %v681_v39, %v642_v34 }
 0x35f   : > { %v648_v40 = vpop.permute.xlu0 %647  ;;  %v729_v61 = vpop.permute.xlu2 %728 }
 0x360   : > { %v645_v41 = vpop.permute.xlu1 %644  ;;  %v771_v1 = vsel %vm678_vm4, %v3499_v27, %v729_v61 }
 0x361   : > { %v685_v44 = vsel %vm684_vm7, %v683_v42, %v645_v41  ;;  %v821_v41 = vstv %s2879_s27  ;;  %s2883_s27 = sld [smem:[#allocation7 + $0x5]] }
 0x362   : > { %v687_v45 = vsel %vm686_vm8, %v685_v44, %v648_v40 }
 0x363   : > { %v689_v47 = vsel %vm688_vm9, %v687_v45, %v651_v36 }
 0x367   : > { %v658_v46 = vpop.permute.xlu0 %657  ;;  %v738_v13 = vpop.permute.xlu2 %737 }
 0x368   : > { %v654_v51 = vpop.permute.xlu1 %653  ;;  %v692_v57 = vsel %vm678_vm4, %v3485_v18, %v658_v46 }
 0x369   : > { %v691_v53 = vsel %vm690_vm10, %v689_v47, %v654_v51  ;;  %v693_v59 = vsel %vm680_vm5, %v692_v57, %v661_v43  ;;  %v873_v51 = vstv %s2881_s9  ;;  %v899_v57 = vstv %s2882_s10  ;;  %s3233_s9 = smov 124   ;;  %s3234_s10 = smov 122  }
 0x36a   : > { %v701_v54 = vrot.slane %v691_v53, 5  ;;  %v847_v53 = vstv %s2880_s29  ;;  %s2928_s29 = sld [smem:[#allocation7 + $0x32]] }
 0x36c   : > { %v706_v56 = vsel %vm682_vm6, 0.0, %v701_v54 }
 0x36d   : > { %710 = vrot.lane.b32.xlu2 %v706_v56, %s3230_s18 }
 0x36f   : > { %v667_v0 = vpop.permute.xlu0 %666  ;;  %v747_v18 = vpop.permute.xlu2 %746 }
 0x370   : > { %v664_v58 = vpop.permute.xlu1 %663 }
 0x371   : > { %v694_v12 = vsel %vm682_vm6, %v693_v59, %v664_v58 }
 0x372   : > { %v695_v60 = vsel %vm684_vm7, %v694_v12, %v667_v0 }
 0x373   : > { %v696_v62 = vsel %vm686_vm8, %v695_v60, %v670_v55 }
 0x377   : > { %v676_v5 = vpop.permute.xlu0 %675  ;;  %v757_v26 = vpop.permute.xlu2 %756 }
 0x378   : > { %v673_v63 = vpop.permute.xlu1 %672 }
 0x379   : > { %v697_v2 = vsel %vm688_vm9, %v696_v62, %v673_v63 }
 0x37a   : > { %v698_v3 = vsel %vm690_vm10, %v697_v2, %v676_v5  ;;  %v925_v5 = vstv %s2883_s27  ;;  %s2931_s27 = sld [smem:[#allocation7 + $0x35]] }
 0x37b   : > { %v702_v7 = vrot.slane %v698_v3, 5 }
 0x37d   : > { %v707_v4 = vsel %vm682_vm6, %v702_v7, 0.0  ;;  %v703_v8 = vsel %vm682_vm6, %v701_v54, %v702_v7 }
 0x37e   : > { %714 = vrot.lane.b32.xlu0 %v707_v4, %s3230_s18  ;;  %712 = vrot.lane.b32.xlu1 %v703_v8, %s3230_s18  ;;  %v834_v4 = vstv %s2928_s29  ;;  %s2930_s29 = sld [smem:[#allocation7 + $0x34]] }
 0x37f   : > { %v735_v9 = vpop.permute.xlu0 %734  ;;  %v766_v34 = vpop.permute.xlu2 %765 }
 0x380   : > { %v732_v10 = vpop.permute.xlu1 %731 }
 0x381   : > { %v772_v6 = vsel %vm680_vm5, %v771_v1, %v732_v10 }
 0x382   : > { %v773_v11 = vsel %vm682_vm6, %v772_v6, %v735_v9 }
 0x383   : > { %v774_v15 = vsel %vm684_vm7, %v773_v11, %v738_v13 }
 0x387   : > { %v744_v14 = vpop.permute.xlu0 %743 }
 0x388   : > { %v741_v16 = vpop.permute.xlu1 %740 }
 0x389   : > { %v775_v17 = vsel %vm686_vm8, %v774_v15, %v741_v16 }
 0x38a   : > { %v776_v19 = vsel %vm688_vm9, %v775_v17, %v744_v14  ;;  %v912_v17 = vstv %s2931_s27  ;;  %s2887_s27 = sld [smem:[#allocation7 + $0x9]] }
 0x38b   : > { %v777_v20 = vsel %vm690_vm10, %v776_v19, %v747_v18  ;;  %v886_v18 = vstv %s2930_s29  ;;  %s2893_s29 = sld [smem:[#allocation7 + $0xf]] }
 0x38c   : > { %v787_v21 = vrot.slane %v777_v20, 5 }
 0x38e   : > { %v792_v22 = vsel %vm682_vm6, 0.0, %v787_v21 }
 0x38f   : > { %796 = vrot.lane.b32.xlu0 %v792_v22, %s3230_s18  ;;  %v754_v23 = vpop.permute.xlu0 %753  ;;  %v938_v22 = vstv %s2932_s16  ;;  %s2889_s16 = sld [smem:[#allocation7 + $0xb]] }
 0x390   : > { %v751_v24 = vpop.permute.xlu1 %750 }
 0x391   : > { %v778_v25 = vsel %vm678_vm4, %v3519_v33, %v751_v24 }
 0x392   : > { %v779_v27 = vsel %vm680_vm5, %v778_v25, %v754_v23 }
 0x393   : > { %v780_v29 = vsel %vm682_vm6, %v779_v27, %v757_v26 }
 0x397   : > { %v763_v30 = vpop.permute.xlu0 %762 }
 0x398   : > { %v760_v28 = vpop.permute.xlu1 %759 }
 0x399   : > { %v781_v31 = vsel %vm684_vm7, %v780_v29, %v760_v28 }
 0x39a   : > { %v782_v32 = vsel %vm686_vm8, %v781_v31, %v763_v30 }
 0x39b   : > { %v783_v35 = vsel %vm688_vm9, %v782_v32, %v766_v34  ;;  %v964_v32 = vstv %s2933_s12  ;;  %s2891_s12 = sld [smem:[#allocation7 + $0xd]] }
 0x3a0   : > { %v769_v36 = vpop.permute.xlu1 %768 }
 0x3a1   : > { %v784_v37 = vsel %vm690_vm10, %v783_v35, %v769_v36  ;;  %v1089_v35 = vstv %s2888_s8  ;;  %s2890_s8 = sld [smem:[#allocation7 + $0xc]] }
 0x3a2   : > { %v788_v38 = vrot.slane %v784_v37, 5 }
 0x3a4   : > { %v793_v33 = vsel %vm682_vm6, %v788_v38, 0.0  ;;  %v789_v39 = vsel %vm682_vm6, %v787_v21, %v788_v38 }
 0x3a5   : > { %800 = vrot.lane.b32.xlu1 %v793_v33, %s3230_s18  ;;  %798 = vrot.lane.b32.xlu2 %v789_v39, %s3230_s18  ;;  %s2884_s18 = sld [smem:[#allocation7 + $0x6]]  ;;  %v1049_v33 = vstv %s2887_s27 }
 0x3a6   : > { %s2894_s27 = sld [smem:[#allocation7 + $0x10]] }
 0x3ab   : > { %v951_v61 = vstv %s2884_s18  ;;  %s2929_s18 = sld [smem:[#allocation7 + $0x33]] }
 0x3b1   : > { %v860_v11 = vstv %s2929_s18  ;;  %s2886_s18 = sld [smem:[#allocation7 + $0x8]] }
 0x3b7   : > { %v1009_v25 = vstv %s2886_s18  ;;  %s2895_s18 = sld [smem:[#allocation7 + $0x11]] }
 0x3c7   : > { %v711_v40 = vpop.permute.xlu2 %710 }
 0x3c8   : > { %v720_v42 = vsel %vm719_vm11, 0.0, %v711_v40 }
 0x3c9   : > { %v3581_v43 = vsel %vm723_vm12, %v720_v42, 0.0 }
 0x3ca   : > { %v822_v44 = vmul.f32 %v821_v41, %v3581_v43  ;;  %v900_v0 = vmul.f32 %v899_v57, %v3581_v43  ;;  %v874_v58 = vmul.f32 %v873_v51, %v3581_v43  ;;  %v848_v59 = vmul.f32 %v847_v53, %v3581_v43 }
 0x3cb   : > { %v952_v13 = vmul.f32 %v951_v61, %v3581_v43  ;;  %v926_v10 = vmul.f32 %v925_v5, %v3581_v43  ;;  %v1010_v29 = vmul.f32 %v1009_v25, %v3581_v43 }
 0x3cc   : > { %826 = vrot.lane.b32.xlu0 %v822_v44, %s3221_s14 }
 0x3cd   : > { %v1016_v34 = vrot.slane %v1010_v29, 1 }
 0x3f0   : > { %v713_v45 = vpop.permute.xlu1 %712  ;;  %v715_v12 = vpop.permute.xlu0 %714 }
 0x3f1   : > { %v721_v46 = vsel %vm719_vm11, 0.0, %v713_v45  ;;  %v722_v28 = vsel %vm719_vm11, 0.0, %v715_v12 }
 0x3f2   : > { %v3587_v47 = vsel %vm723_vm12, %v721_v46, 0.0  ;;  %v3643_v30 = vsel %vm723_vm12, %v722_v28, 0.0 }
 0x3f3   : > { %v875_v54 = vmul.f32 %v873_v51, %v3587_v47  ;;  %v849_v55 = vmul.f32 %v847_v53, %v3587_v47  ;;  %v823_v56 = vmul.f32 %v821_v41, %v3587_v47  ;;  %v953_v62 = vmul.f32 %v951_v61, %v3587_v47 }
 0x3f4   : > { %v927_v63 = vmul.f32 %v925_v5, %v3587_v47  ;;  %v901_v2 = vmul.f32 %v899_v57, %v3587_v47  ;;  %v1011_v27 = vmul.f32 %v1009_v25, %v3587_v47  ;;  %v1091_v37 = vmul.f32 %v1089_v35, %v3587_v47 }
 0x3f5   : > { %880 = vrot.lane.b32.xlu0 %v875_v54, %s3231_s11  ;;  %854 = vrot.lane.b32.xlu1 %v849_v55, %s3232_s15  ;;  %v1092_v38 = vmul.f32 %v1089_v35, %v3643_v30  ;;  %v1051_v41 = vmul.f32 %v1049_v33, %v3587_v47  ;;  %v1052_v42 = vmul.f32 %v1049_v33, %v3643_v30  ;;  %v1129_v55 = vstv %s2889_s16  ;;  %s2896_s16 = sld [smem:[#allocation7 + $0x12]] }
 0x3f6   : > { %828 = vrot.lane.b32.xlu2 %v823_v56, %s3221_s14  ;;  %v1017_v31 = vrot.slane %v1011_v27, 1  ;;  %v1012_v44 = vmul.f32 %v1009_v25, %v3643_v30  ;;  %v1097_v45 = vrot.slane %v1091_v37, 1  ;;  %v1130_v12 = vmul.f32 %v1129_v55, %v3581_v43 }
 0x3f7   : > { %v1099_v46 = vrot.slane %v1092_v38, 1  ;;  %v1057_v51 = vrot.slane %v1051_v41, 1  ;;  %v1059_v53 = vrot.slane %v1052_v42, 1  ;;  %v1321_v37 = vstv %s2894_s27  ;;  %s2901_s27 = sld [smem:[#allocation7 + $0x17]] }
 0x3f8   : > { %v1018_v39 = vsel %vm690_vm10, %v1016_v34, %v1017_v31  ;;  %v1019_v54 = vrot.slane %v1012_v44, 1 }
 0x3f9   : > { %v1100_v56 = vsel %vm690_vm10, %v1097_v45, %v1099_v46  ;;  %v1060_v57 = vsel %vm690_vm10, %v1057_v51, %v1059_v53 }
 0x3fd   : > { %904 = vrot.lane.b32.xlu0 %v900_v0, %s3233_s9  ;;  %878 = vrot.lane.b32.xlu1 %v874_v58, %s3231_s11  ;;  %v1131_v0 = vmul.f32 %v1129_v55, %v3587_v47  ;;  %v1020_v58 = vsel %vm690_vm10, %v1017_v31, %v1019_v54 }
 0x3fe   : > { %852 = vrot.lane.b32.xlu2 %v848_v59, %s3232_s15  ;;  %v1090_v59 = vmul.f32 %v1089_v35, %v3581_v43 }
 0x3ff   : > { %v799_v60 = vpop.permute.xlu2 %798  ;;  %v1137_v61 = vrot.slane %v1131_v0, 1 }
 0x400   : > { %v806_v3 = vsel %vm719_vm11, 0.0, %v799_v60  ;;  %v1050_v60 = vmul.f32 %v1049_v33, %v3581_v43  ;;  %v1096_v5 = vrot.slane %v1090_v59, 1 }
 0x401   : > { %v3609_v7 = vsel %vm723_vm12, %v806_v3, 0.0  ;;  %v797_v8 = vpop.permute.xlu0 %796 }
 0x402   : > { %v836_v9 = vmul.f32 %v834_v4, %v3609_v7  ;;  %v805_v1 = vsel %vm719_vm11, 0.0, %v797_v8  ;;  %v862_v16 = vmul.f32 %v860_v11, %v3609_v7  ;;  %v914_v19 = vmul.f32 %v912_v17, %v3609_v7 }
 0x403   : > { %v3619_v6 = vsel %vm723_vm12, %v805_v1, 0.0  ;;  %v888_v20 = vmul.f32 %v886_v18, %v3609_v7  ;;  %v940_v26 = vmul.f32 %v938_v22, %v3609_v7  ;;  %v966_v36 = vmul.f32 %v964_v32, %v3609_v7 }
 0x404   : > { %v861_v14 = vmul.f32 %v860_v11, %v3619_v6  ;;  %v835_v15 = vmul.f32 %v834_v4, %v3619_v6  ;;  %v887_v21 = vmul.f32 %v886_v18, %v3619_v6  ;;  %v939_v23 = vmul.f32 %v938_v22, %v3619_v6 }
 0x405   : > { %958 = vrot.lane.b32.xlu0 %v953_v62, %s3234_s10  ;;  %932 = vrot.lane.b32.xlu1 %v927_v63, %s3235_s3  ;;  %v913_v24 = vmul.f32 %v912_v17, %v3619_v6  ;;  %v965_v40 = vmul.f32 %v964_v32, %v3619_v6  ;;  %v1136_v62 = vrot.slane %v1130_v12, 1  ;;  %v1209_v63 = vstv %s2891_s12  ;;  %s2898_s12 = sld [smem:[#allocation7 + $0x14]] }
 0x406   : > { %906 = vrot.lane.b32.xlu2 %v901_v2, %s3233_s9  ;;  %v1098_v2 = vsel %vm690_vm10, %v1096_v5, %v1097_v45  ;;  %v1056_v3 = vrot.slane %v1050_v60, 1  ;;  %v1211_v4 = vmul.f32 %v1209_v63, %v3587_v47  ;;  %v1169_v8 = vstv %s2890_s8  ;;  %s2897_s8 = sld [smem:[#allocation7 + $0x13]] }
 0x407   : > { %v1172_v1 = vmul.f32 %v1169_v8, %v3643_v30  ;;  %v1210_v25 = vmul.f32 %v1209_v63, %v3581_v43  ;;  %v1170_v27 = vmul.f32 %v1169_v8, %v3581_v43  ;;  %v1361_v32 = vstv %s2895_s18  ;;  %s2902_s18 = sld [smem:[#allocation7 + $0x18]] }
 0x408   : > { %v1058_v11 = vsel %vm690_vm10, %v1056_v3, %v1057_v51  ;;  %v1364_v33 = vmul.f32 %v1361_v32, %v3643_v30  ;;  %v1362_v59 = vmul.f32 %v1361_v32, %v3581_v43  ;;  %v1322_v60 = vmul.f32 %v1321_v37, %v3581_v43 }
 0x409   : > { %v1179_v18 = vrot.slane %v1172_v1, 1  ;;  %v1216_v29 = vrot.slane %v1210_v25, 1  ;;  %v1176_v35 = vrot.slane %v1170_v27, 1 }
 0x40a   : > { %v1371_v46 = vrot.slane %v1364_v33, 2 }
 0x40d   : > { %841 = vrot.lane.b32.xlu0 %v836_v9, %s3221_s14  ;;  %956 = vrot.lane.b32.xlu1 %v952_v13, %s3234_s10  ;;  %v1138_v9 = vsel %vm690_vm10, %v1136_v62, %v1137_v61  ;;  %v1212_v13 = vmul.f32 %v1209_v63, %v3643_v30  ;;  %v1368_v62 = vrot.slane %v1362_v59, 2 }
 0x40e   : > { %930 = vrot.lane.b32.xlu2 %v926_v10, %s3235_s3  ;;  %v1171_v10 = vmul.f32 %v1169_v8, %v3587_v47 }
 0x410   : > { %v1177_v17 = vrot.slane %v1171_v10, 1 }
 0x412   : > { %v1180_v22 = vsel %vm690_vm10, %v1177_v17, %v1179_v18  ;;  %v1178_v41 = vsel %vm690_vm10, %v1176_v35, %v1177_v17 }
 0x415   : > { %865 = vrot.lane.b32.xlu0 %v861_v14, %s3232_s15  ;;  %839 = vrot.lane.b32.xlu1 %v835_v15, %s3221_s14  ;;  %v1132_v14 = vmul.f32 %v1129_v55, %v3643_v30  ;;  %v1217_v15 = vrot.slane %v1211_v4, 1  ;;  %v1401_v55 = vstv %s2896_s16  ;;  %v1328_v4 = vrot.slane %v1322_v60, 2  ;;  %s2903_s16 = sld [smem:[#allocation7 + $0x19]] }
 0x416   : > { %867 = vrot.lane.b32.xlu2 %v862_v16, %s3232_s15  ;;  %v1219_v16 = vrot.slane %v1212_v13, 1  ;;  %v1403_v0 = vmul.f32 %v1401_v55, %v3587_v47  ;;  %v1402_v12 = vmul.f32 %v1401_v55, %v3581_v43 }
 0x417   : > { %v1218_v34 = vsel %vm690_vm10, %v1216_v29, %v1217_v15 }
 0x418   : > { %v1409_v5 = vrot.slane %v1403_v0, 2  ;;  %v1408_v63 = vrot.slane %v1402_v12, 2 }
 0x41a   : > { %v1410_v13 = vsel %vm688_vm9, %v1408_v63, %v1409_v5 }
 0x41b   : > { %v1673_v63 = vstv %s2903_s16  ;;  %s2910_s16 = sld [smem:[#allocation7 + $0x20]] }
 0x41d   : > { %919 = vrot.lane.b32.xlu0 %v914_v19, %s3233_s9  ;;  %893 = vrot.lane.b32.xlu1 %v888_v20, %s3231_s11  ;;  %v1139_v19 = vrot.slane %v1132_v14, 1  ;;  %v1281_v20 = vstv %s2893_s29  ;;  %s2900_s29 = sld [smem:[#allocation7 + $0x16]] }
 0x41e   : > { %891 = vrot.lane.b32.xlu2 %v887_v21, %s3231_s11  ;;  %v1220_v21 = vsel %vm690_vm10, %v1217_v15, %v1219_v16  ;;  %v1284_v42 = vmul.f32 %v1281_v20, %v3643_v30  ;;  %v1404_v15 = vmul.f32 %v1401_v55, %v3643_v30  ;;  %v3723_v16 = vpop.permute.xlu1 %800 }
 0x420   : > { %v1291_v54 = vrot.slane %v1284_v42, 2 }
 0x425   : > { %943 = vrot.lane.b32.xlu0 %v939_v23, %s3235_s3  ;;  %917 = vrot.lane.b32.xlu1 %v913_v24, %s3233_s9  ;;  %v1283_v23 = vmul.f32 %v1281_v20, %v3587_v47  ;;  %v1140_v24 = vsel %vm690_vm10, %v1137_v61, %v1139_v19 }
 0x426   : > { %945 = vrot.lane.b32.xlu2 %v940_v26, %s3235_s3  ;;  %v1282_v26 = vmul.f32 %v1281_v20, %v3581_v43 }
 0x427   : > { %v1289_v28 = vrot.slane %v1283_v23, 2  ;;  %v1411_v23 = vrot.slane %v1404_v15, 2 }
 0x428   : > { %v1288_v31 = vrot.slane %v1282_v26, 2 }
 0x42a   : > { %v1290_v38 = vsel %vm688_vm9, %v1288_v31, %v1289_v28 }
 0x42d   : > { %1021 = vrot.lane.b32.xlu0 %v1018_v39, %s3221_s14  ;;  %971 = vrot.lane.b32.xlu1 %v966_v36, %s3234_s10  ;;  %v1363_v36 = vmul.f32 %v1361_v32, %v3587_v47  ;;  %v1323_v39 = vmul.f32 %v1321_v37, %v3587_v47 }
 0x42e   : > { %969 = vrot.lane.b32.xlu2 %v965_v40, %s3234_s10  ;;  %v1324_v40 = vmul.f32 %v1321_v37, %v3643_v30 }
 0x42f   : > { %v1369_v45 = vrot.slane %v1363_v36, 2  ;;  %v1329_v51 = vrot.slane %v1323_v39, 2  ;;  %v1633_v39 = vstv %s2902_s18  ;;  %s2909_s18 = sld [smem:[#allocation7 + $0x1f]] }
 0x430   : > { %v1331_v53 = vrot.slane %v1324_v40, 2  ;;  %v1636_v42 = vmul.f32 %v1633_v39, %v3643_v30 }
 0x431   : > { %v1370_v3 = vsel %vm688_vm9, %v1368_v62, %v1369_v45  ;;  %v1330_v14 = vsel %vm688_vm9, %v1328_v4, %v1329_v51  ;;  %v1675_v4 = vmul.f32 %v1673_v63, %v3587_v47 }
 0x432   : > { %v1643_v12 = vrot.slane %v1636_v42, 3 }
 0x433   : > { %v1681_v15 = vrot.slane %v1675_v4, 3 }
 0x435   : > { %1103 = vrot.lane.b32.xlu0 %v1100_v56, %s3231_s11  ;;  %1063 = vrot.lane.b32.xlu1 %v1060_v57, %s3232_s15  ;;  %v1372_v56 = vsel %vm688_vm9, %v1369_v45, %v1371_v46  ;;  %v1332_v57 = vsel %vm688_vm9, %v1329_v51, %v1331_v53  ;;  %v1593_v45 = vstv %s2901_s27  ;;  %s2908_s27 = sld [smem:[#allocation7 + $0x1e]]  ;;  %v1905_v4 = vstv %s2909_s18 }
 0x436   : > { %1023 = vrot.lane.b32.xlu2 %v1020_v58, %s3221_s14  ;;  %v1292_v58 = vsel %vm688_vm9, %v1289_v28, %v1291_v54  ;;  %v1412_v28 = vsel %vm688_vm9, %v1409_v5, %v1411_v23  ;;  %v1595_v53 = vmul.f32 %v1593_v45, %v3587_v47  ;;  %v1596_v54 = vmul.f32 %v1593_v45, %v3643_v30  ;;  %s2916_s18 = sld [smem:[#allocation7 + $0x26]] }
 0x438   : > { %v1601_v60 = vrot.slane %v1595_v53, 3  ;;  %v1603_v5 = vrot.slane %v1596_v54, 3 }
 0x43d   : > { %1141 = vrot.lane.b32.xlu0 %v1138_v9, %s3233_s9  ;;  %1101 = vrot.lane.b32.xlu1 %v1098_v2, %s3231_s11  ;;  %v1481_v2 = vstv %s2898_s12  ;;  %v1441_v9 = vstv %s2897_s8  ;;  %s2905_s12 = sld [smem:[#allocation7 + $0x1b]] }
 0x43e   : > { %1061 = vrot.lane.b32.xlu2 %v1058_v11, %s3232_s15  ;;  %v1483_v8 = vmul.f32 %v1481_v2, %v3587_v47  ;;  %v1484_v10 = vmul.f32 %v1481_v2, %v3643_v30  ;;  %v1443_v1 = vmul.f32 %v1441_v9, %v3587_v47  ;;  %v1444_v11 = vmul.f32 %v1441_v9, %v3643_v30  ;;  %v3725_v17 = vpop.permute.xlu0 %826  ;;  %s2904_s8 = sld [smem:[#allocation7 + $0x1a]] }
 0x43f   : > { %v1482_v31 = vmul.f32 %v1481_v2, %v3581_v43  ;;  %v1442_v35 = vmul.f32 %v1441_v9, %v3581_v43  ;;  %v1634_v9 = vmul.f32 %v1633_v39, %v3581_v43 }
 0x440   : > { %v1489_v19 = vrot.slane %v1483_v8, 2  ;;  %v1491_v20 = vrot.slane %v1484_v10, 2 }
 0x441   : > { %v1488_v33 = vrot.slane %v1482_v31, 2  ;;  %v1448_v40 = vrot.slane %v1442_v35, 2  ;;  %v1676_v35 = vmul.f32 %v1673_v63, %v3643_v30 }
 0x442   : > { %v1492_v25 = vsel %vm688_vm9, %v1489_v19, %v1491_v20 }
 0x443   : > { %v1490_v51 = vsel %vm688_vm9, %v1488_v33, %v1489_v19  ;;  %v1640_v19 = vrot.slane %v1634_v9, 3 }
 0x445   : > { %1223 = vrot.lane.b32.xlu0 %v1220_v21, %s3234_s10  ;;  %1183 = vrot.lane.b32.xlu1 %v1180_v22, %s3235_s3  ;;  %v1449_v21 = vrot.slane %v1443_v1, 2  ;;  %v1451_v22 = vrot.slane %v1444_v11, 2  ;;  %v1594_v11 = vmul.f32 %v1593_v45, %v3581_v43  ;;  %v1683_v45 = vrot.slane %v1676_v35, 3 }
 0x446   : > { %1143 = vrot.lane.b32.xlu2 %v1140_v24, %s3233_s9  ;;  %v1553_v24 = vstv %s2900_s29  ;;  %s2907_s29 = sld [smem:[#allocation7 + $0x1d]] }
 0x447   : > { %v1452_v26 = vsel %vm688_vm9, %v1449_v21, %v1451_v22  ;;  %v1555_v27 = vmul.f32 %v1553_v24, %v3587_v47  ;;  %v1554_v29 = vmul.f32 %v1553_v24, %v3581_v43  ;;  %v1450_v55 = vsel %vm688_vm9, %v1448_v40, %v1449_v21 }
 0x448   : > { %v1753_v21 = vstv %s2905_s12  ;;  %v1600_v23 = vrot.slane %v1594_v11, 3  ;;  %v1865_v11 = vstv %s2908_s27  ;;  %s2912_s12 = sld [smem:[#allocation7 + $0x22]] }
 0x449   : > { %v1561_v37 = vrot.slane %v1555_v27, 3  ;;  %v1756_v27 = vmul.f32 %v1753_v21, %v3643_v30  ;;  %s2915_s27 = sld [smem:[#allocation7 + $0x25]] }
 0x44a   : > { %v1602_v31 = vsel %vm686_vm8, %v1600_v23, %v1601_v60 }
 0x44b   : > { %v1763_v40 = vrot.slane %v1756_v27, 3 }
 0x44d   : > { %1293 = vrot.lane.b32.xlu0 %v1290_v38, %s3221_s14  ;;  %1221 = vrot.lane.b32.xlu1 %v1218_v34, %s3234_s10  ;;  %v1560_v38 = vrot.slane %v1554_v29, 3 }
 0x44e   : > { %1181 = vrot.lane.b32.xlu2 %v1178_v41, %s3235_s3  ;;  %v1635_v41 = vmul.f32 %v1633_v39, %v3587_v47 }
 0x44f   : > { %v1562_v46 = vsel %vm686_vm8, %v1560_v38, %v1561_v37 }
 0x450   : > { %v3698_v44 = vpop.permute.xlu2 %828  ;;  %v1641_v59 = vrot.slane %v1635_v41, 3 }
 0x452   : > { %v1644_v2 = vsel %vm686_vm8, %v1641_v59, %v1643_v12  ;;  %v1642_v22 = vsel %vm686_vm8, %v1640_v19, %v1641_v59  ;;  %v1908_v19 = vmul.f32 %v1905_v4, %v3643_v30 }
 0x455   : > { %1375 = vrot.lane.b32.xlu0 %v1372_v56, %s3231_s11  ;;  %1335 = vrot.lane.b32.xlu1 %v1332_v57, %s3232_s15  ;;  %v1556_v56 = vmul.f32 %v1553_v24, %v3643_v30  ;;  %v1755_v24 = vmul.f32 %v1753_v21, %v3587_v47 }
 0x456   : > { %1295 = vrot.lane.b32.xlu2 %v1292_v58, %s3221_s14 }
 0x457   : > { %v1563_v62 = vrot.slane %v1556_v56, 3  ;;  %v1761_v39 = vrot.slane %v1755_v24, 3  ;;  %v1754_v56 = vmul.f32 %v1753_v21, %v3581_v43  ;;  %v1868_v21 = vmul.f32 %v1865_v11, %v3643_v30 }
 0x458   : > { %v3710_v61 = vpop.permute.xlu2 %852 }
 0x459   : > { %v1564_v8 = vsel %vm686_vm8, %v1561_v37, %v1563_v62 }
 0x45d   : > { %1413 = vrot.lane.b32.xlu0 %v1410_v13, %s3233_s9  ;;  %1373 = vrot.lane.b32.xlu1 %v1370_v3, %s3231_s11  ;;  %v1604_v3 = vsel %vm686_vm8, %v1601_v60, %v1603_v5  ;;  %v1674_v13 = vmul.f32 %v1673_v63, %v3581_v43 }
 0x45e   : > { %1333 = vrot.lane.b32.xlu2 %v1330_v14, %s3232_s15 }
 0x45f   : > { %v1680_v20 = vrot.slane %v1674_v13, 3  ;;  %v1907_v13 = vmul.f32 %v1905_v4, %v3587_v47 }
 0x460   : > { %v3727_v18 = vpop.permute.xlu2 %906 }
 0x461   : > { %v1913_v27 = vrot.slane %v1907_v13, 4 }
 0x465   : > { %1495 = vrot.lane.b32.xlu0 %v1492_v25, %s3234_s10  ;;  %1455 = vrot.lane.b32.xlu1 %v1452_v26, %s3235_s3  ;;  %v1713_v25 = vstv %s2904_s8  ;;  %v1682_v26 = vsel %vm686_vm8, %v1680_v20, %v1681_v15  ;;  %v1867_v20 = vmul.f32 %v1865_v11, %v3587_v47  ;;  %s2911_s8 = sld [smem:[#allocation7 + $0x21]] }
 0x466   : > { %1415 = vrot.lane.b32.xlu2 %v1412_v28, %s3233_s9  ;;  %v1715_v28 = vmul.f32 %v1713_v25, %v3587_v47  ;;  %v1716_v29 = vmul.f32 %v1713_v25, %v3643_v30  ;;  %v1714_v5 = vmul.f32 %v1713_v25, %v3581_v43 }
 0x467   : > { %v3738_v32 = vpop.permute.xlu0 %880  ;;  %v3740_v34 = vpop.permute.xlu1 %854 }
 0x468   : > { %v3743_v36 = vpop.permute.xlu2 %930  ;;  %v1721_v41 = vrot.slane %v1715_v28, 3  ;;  %v1723_v42 = vrot.slane %v1716_v29, 3  ;;  %v1720_v9 = vrot.slane %v1714_v5, 3  ;;  %v1915_v28 = vrot.slane %v1908_v19, 4 }
 0x469   : > { %v1873_v29 = vrot.slane %v1867_v20, 4 }
 0x46a   : > { %v1724_v53 = vsel %vm686_vm8, %v1721_v41, %v1723_v42 }
 0x46d   : > { %1565 = vrot.lane.b32.xlu0 %v1562_v46, %s3221_s14  ;;  %1493 = vrot.lane.b32.xlu1 %v1490_v51, %s3234_s10  ;;  %v1825_v46 = vstv %s2907_s29  ;;  %v1764_v51 = vsel %vm686_vm8, %v1761_v39, %v1763_v40  ;;  %s2914_s29 = sld [smem:[#allocation7 + $0x24]] }
 0x46e   : > { %1453 = vrot.lane.b32.xlu2 %v1450_v55, %s3235_s3  ;;  %v1827_v54 = vmul.f32 %v1825_v46, %v3587_v47  ;;  %v1684_v55 = vsel %vm686_vm8, %v1681_v15, %v1683_v45  ;;  %v1826_v59 = vmul.f32 %v1825_v46, %v3581_v43  ;;  %v1828_v23 = vmul.f32 %v1825_v46, %v3643_v30 }
 0x46f   : > { %v3756_v57 = vpop.permute.xlu0 %904  ;;  %v3758_v0 = vpop.permute.xlu1 %878 }
 0x470   : > { %v3760_v58 = vpop.permute.xlu2 %867  ;;  %v1833_v63 = vrot.slane %v1827_v54, 4  ;;  %v1835_v35 = vrot.slane %v1828_v23, 4 }
 0x472   : > { %v1836_v45 = vsel %vm684_vm7, %v1833_v63, %v1835_v35 }
 0x475   : > { %1647 = vrot.lane.b32.xlu0 %v1644_v2, %s3231_s11  ;;  %1607 = vrot.lane.b32.xlu1 %v1604_v3, %s3232_s15  ;;  %v1760_v2 = vrot.slane %v1754_v56, 3  ;;  %v1832_v3 = vrot.slane %v1826_v59, 4  ;;  %v1866_v56 = vmul.f32 %v1865_v11, %v3581_v43 }
 0x476   : > { %1567 = vrot.lane.b32.xlu2 %v1564_v8, %s3221_s14 }
 0x477   : > { %v3771_v10 = vpop.permute.xlu0 %958  ;;  %v3773_v1 = vpop.permute.xlu1 %932  ;;  %v1762_v8 = vsel %vm686_vm8, %v1760_v2, %v1761_v39  ;;  %v1834_v15 = vsel %vm684_vm7, %v1832_v3, %v1833_v63  ;;  %v1945_v39 = vstv %s2910_s16  ;;  %v2025_v3 = vstv %s2912_s12  ;;  %s2917_s16 = sld [smem:[#allocation7 + $0x27]] }
 0x478   : > { %v3776_v14 = vpop.permute.xlu2 %891  ;;  %v1947_v40 = vmul.f32 %v1945_v39, %v3587_v47  ;;  %v1946_v46 = vmul.f32 %v1945_v39, %v3581_v43  ;;  %v2027_v13 = vmul.f32 %v2025_v3, %v3587_v47  ;;  %s2919_s12 = sld [smem:[#allocation7 + $0x29]] }
 0x47a   : > { %v1952_v5 = vrot.slane %v1946_v46, 4 }
 0x47d   : > { %1685 = vrot.lane.b32.xlu0 %v1682_v26, %s3233_s9  ;;  %1645 = vrot.lane.b32.xlu1 %v1642_v22, %s3231_s11  ;;  %v1722_v22 = vsel %vm686_vm8, %v1720_v9, %v1721_v41  ;;  %v1916_v41 = vsel %vm684_vm7, %v1913_v27, %v1915_v28  ;;  %v1872_v9 = vrot.slane %v1866_v56, 4  ;;  %v2033_v28 = vrot.slane %v2027_v13, 4 }
 0x47e   : > { %1605 = vrot.lane.b32.xlu2 %v1602_v31, %s3232_s15  ;;  %v1875_v31 = vrot.slane %v1868_v21, 4  ;;  %v1948_v21 = vmul.f32 %v1945_v39, %v3643_v30 }
 0x47f   : > { %v3789_v37 = vpop.permute.xlu0 %841  ;;  %v3791_v38 = vpop.permute.xlu1 %956  ;;  %v1874_v20 = vsel %vm684_vm7, %v1872_v9, %v1873_v29 }
 0x480   : > { %v3793_v33 = vpop.permute.xlu2 %945  ;;  %v1876_v42 = vsel %vm684_vm7, %v1873_v29, %v1875_v31 }
 0x485   : > { %1767 = vrot.lane.b32.xlu0 %v1764_v51, %s3234_s10  ;;  %1727 = vrot.lane.b32.xlu1 %v1724_v53, %s3235_s3  ;;  %v1906_v51 = vmul.f32 %v1905_v4, %v3581_v43  ;;  %v1985_v4 = vstv %s2911_s8  ;;  %s2918_s8 = sld [smem:[#allocation7 + $0x28]] }
 0x486   : > { %1687 = vrot.lane.b32.xlu2 %v1684_v55, %s3233_s9  ;;  %v1953_v55 = vrot.slane %v1947_v40, 4  ;;  %v1987_v19 = vmul.f32 %v1985_v4, %v3587_v47  ;;  %v1988_v11 = vmul.f32 %v1985_v4, %v3643_v30 }
 0x487   : > { %v3804_v12 = vpop.permute.xlu0 %865  ;;  %v3806_v60 = vpop.permute.xlu1 %839  ;;  %v1912_v2 = vrot.slane %v1906_v51, 4  ;;  %v2026_v51 = vmul.f32 %v2025_v3, %v3581_v43 }
 0x488   : > { %v3809_v62 = vpop.permute.xlu2 %969  ;;  %v1954_v63 = vsel %vm684_vm7, %v1952_v5, %v1953_v55  ;;  %v1993_v35 = vrot.slane %v1987_v19, 4  ;;  %v1995_v40 = vrot.slane %v1988_v11, 4  ;;  %v2177_v19 = vstv %s2916_s18  ;;  %s2923_s18 = sld [smem:[#allocation7 + $0x2d]] }
 0x489   : > { %v2032_v13 = vrot.slane %v2026_v51, 4 }
 0x48a   : > { %v1996_v39 = vsel %vm684_vm7, %v1993_v35, %v1995_v40 }
 0x48d   : > { %1837 = vrot.lane.b32.xlu0 %v1834_v15, %s3221_s14  ;;  %1765 = vrot.lane.b32.xlu1 %v1762_v8, %s3234_s10  ;;  %v1914_v8 = vsel %vm684_vm7, %v1912_v2, %v1913_v27  ;;  %v2028_v15 = vmul.f32 %v2025_v3, %v3643_v30  ;;  %v2179_v3 = vmul.f32 %v2177_v19, %v3587_v47 }
 0x48e   : > { %1725 = vrot.lane.b32.xlu2 %v1722_v22, %s3235_s3 }
 0x48f   : > { %v3822_v24 = vpop.permute.xlu0 %919  ;;  %v3824_v25 = vpop.permute.xlu1 %893  ;;  %v2035_v31 = vrot.slane %v2028_v15, 4 }
 0x490   : > { %v3826_v26 = vpop.permute.xlu2 %1023 }
 0x491   : > { %v2036_v29 = vsel %vm684_vm7, %v2033_v28, %v2035_v31  ;;  %v2180_v31 = vmul.f32 %v2177_v19, %v3643_v30 }
 0x493   : > { %v2187_v51 = vrot.slane %v2180_v31, 5 }
 0x495   : > { %1919 = vrot.lane.b32.xlu0 %v1916_v41, %s3231_s11  ;;  %1879 = vrot.lane.b32.xlu1 %v1876_v42, %s3232_s15  ;;  %v1955_v41 = vrot.slane %v1948_v21, 4  ;;  %v2097_v42 = vstv %s2914_s29  ;;  %s2921_s29 = sld [smem:[#allocation7 + $0x2b]] }
 0x496   : > { %1839 = vrot.lane.b32.xlu2 %v1836_v45, %s3221_s14  ;;  %v2099_v45 = vmul.f32 %v2097_v42, %v3587_v47  ;;  %v2098_v56 = vmul.f32 %v2097_v42, %v3581_v43 }
 0x497   : > { %v3837_v53 = vpop.permute.xlu0 %943  ;;  %v3839_v54 = vpop.permute.xlu1 %917  ;;  %v1956_v46 = vsel %vm684_vm7, %v1953_v55, %v1955_v41  ;;  %v2034_v55 = vsel %vm684_vm7, %v2032_v13, %v2033_v28  ;;  %v2100_v28 = vmul.f32 %v2097_v42, %v3643_v30 }
 0x498   : > { %v3842_v59 = vpop.permute.xlu2 %1061  ;;  %v2105_v9 = vrot.slane %v2099_v45, 5  ;;  %v2104_v15 = vrot.slane %v2098_v56, 5 }
 0x499   : > { %v2107_v13 = vrot.slane %v2100_v28, 5 }
 0x49a   : > { %v2106_v21 = vsel %vm682_vm6, %v2104_v15, %v2105_v9  ;;  %v2217_v15 = vstv %s2917_s16  ;;  %s2924_s16 = sld [smem:[#allocation7 + $0x2e]] }
 0x49d   : > { %1957 = vrot.lane.b32.xlu0 %v1954_v63, %s3233_s9  ;;  %1917 = vrot.lane.b32.xlu1 %v1914_v8, %s3231_s11  ;;  %v1986_v63 = vmul.f32 %v1985_v4, %v3581_v43 }
 0x49e   : > { %1877 = vrot.lane.b32.xlu2 %v1874_v20, %s3232_s15  ;;  %v2137_v20 = vstv %s2915_s27  ;;  %s2922_s27 = sld [smem:[#allocation7 + $0x2c]] }
 0x49f   : > { %v3855_v22 = vpop.permute.xlu0 %1021  ;;  %v3857_v23 = vpop.permute.xlu1 %971  ;;  %v1992_v11 = vrot.slane %v1986_v63, 4  ;;  %v2139_v40 = vmul.f32 %v2137_v20, %v3587_v47  ;;  %v2140_v4 = vmul.f32 %v2137_v20, %v3643_v30 }
 0x4a0   : > { %v3859_v27 = vpop.permute.xlu2 %1143 }
 0x4a1   : > { %v1994_v41 = vsel %vm684_vm7, %v1992_v11, %v1993_v35  ;;  %v2145_v56 = vrot.slane %v2139_v40, 5  ;;  %v2147_v63 = vrot.slane %v2140_v4, 5  ;;  %v2108_v11 = vsel %vm682_vm6, %v2105_v9, %v2107_v13 }
 0x4a2   : > { %v2138_v4 = vmul.f32 %v2137_v20, %v3581_v43 }
 0x4a3   : > { %v2148_v42 = vsel %vm682_vm6, %v2145_v56, %v2147_v63 }
 0x4a4   : > { %v2144_v13 = vrot.slane %v2138_v4, 5 }
 0x4a5   : > { %2039 = vrot.lane.b32.xlu0 %v2036_v29, %s3234_s10  ;;  %1999 = vrot.lane.b32.xlu1 %v1996_v39, %s3235_s3 }
 0x4a6   : > { %1959 = vrot.lane.b32.xlu2 %v1956_v46, %s3233_s9  ;;  %v2185_v46 = vrot.slane %v2179_v3, 5  ;;  %v2178_v3 = vmul.f32 %v2177_v19, %v3581_v43 }
 0x4a7   : > { %v3870_v5 = vpop.permute.xlu0 %1103  ;;  %v3872_v2 = vpop.permute.xlu1 %1063 }
 0x4a8   : > { %v3875_v8 = vpop.permute.xlu2 %1181  ;;  %v2188_v35 = vsel %vm682_vm6, %v2185_v46, %v2187_v51  ;;  %v2184_v51 = vrot.slane %v2178_v3, 5 }
 0x4aa   : > { %v2186_v9 = vsel %vm682_vm6, %v2184_v51, %v2185_v46  ;;  %v2220_v46 = vmul.f32 %v2217_v15, %v3643_v30 }
 0x4ad   : > { %2109 = vrot.lane.b32.xlu0 %v2106_v21, %s3221_s14  ;;  %2037 = vrot.lane.b32.xlu1 %v2034_v55, %s3234_s10  ;;  %v2219_v55 = vmul.f32 %v2217_v15, %v3587_v47  ;;  %v2218_v21 = vmul.f32 %v2217_v15, %v3581_v43 }
 0x4ae   : > { %1997 = vrot.lane.b32.xlu2 %v1994_v41, %s3235_s3 }
 0x4af   : > { %v3888_v29 = vpop.permute.xlu0 %1141  ;;  %v3890_v39 = vpop.permute.xlu1 %1101  ;;  %v2225_v28 = vrot.slane %v2219_v55, 5  ;;  %v2224_v63 = vrot.slane %v2218_v21, 5  ;;  %v2146_v55 = vsel %vm682_vm6, %v2144_v13, %v2145_v56 }
 0x4b0   : > { %v3892_v45 = vpop.permute.xlu2 %1295 }
 0x4b1   : > { %4768 = vst [vmem:[#allocation16_spill] sm:$0xff] %v3892_v45 }
 0x4b5   : > { %2191 = vrot.lane.b32.xlu0 %v2188_v35, %s3231_s11  ;;  %2151 = vrot.lane.b32.xlu1 %v2148_v42, %s3232_s15  ;;  %v2297_v35 = vstv %s2919_s12  ;;  %v2257_v42 = vstv %s2918_s8  ;;  %s2925_s12 = sld [smem:[#allocation7 + $0x2f]] }
 0x4b6   : > { %2111 = vrot.lane.b32.xlu2 %v2108_v11, %s3221_s14  ;;  %v2299_v19 = vmul.f32 %v2297_v35, %v3587_v47  ;;  %v2226_v11 = vsel %vm682_vm6, %v2224_v63, %v2225_v28  ;;  %v2300_v49 = vmul.f32 %v2297_v35, %v3643_v30  ;;  %v2259_v52 = vmul.f32 %v2257_v42, %v3587_v47  ;;  %s2935_s8 = sld [smem:[#allocation7 + $0x39]] }
 0x4b7   : > { %v3903_v31 = vpop.permute.xlu0 %1223  ;;  %v3905_v40 = vpop.permute.xlu1 %1183  ;;  %v2260_v20 = vmul.f32 %v2257_v42, %v3643_v30 }
 0x4b8   : > { %4769 = vst [vmem:[#allocation17_spill] sm:$0xff] %v3903_v31  ;;  %v3908_v41 = vpop.permute.xlu2 %1333  ;;  %v2305_v51 = vrot.slane %v2299_v19, 5  ;;  %v2307_v63 = vrot.slane %v2300_v49, 5  ;;  %v2265_v48 = vrot.slane %v2259_v52, 5  ;;  %v2298_v49 = vmul.f32 %v2297_v35, %v3581_v43 }
 0x4b9   : > { %4770 = vst [vmem:[#allocation18_spill] sm:$0xff] %v3908_v41  ;;  %v2267_v50 = vrot.slane %v2260_v20, 5  ;;  %v2227_v41 = vrot.slane %v2220_v46, 5 }
 0x4ba   : > { %v2308_v56 = vsel %vm682_vm6, %v2305_v51, %v2307_v63  ;;  %v2304_v63 = vrot.slane %v2298_v49, 5 }
 0x4bb   : > { %v2268_v15 = vsel %vm682_vm6, %v2265_v48, %v2267_v50  ;;  %v2228_v13 = vsel %vm682_vm6, %v2225_v28, %v2227_v41  ;;  %v2258_v50 = vmul.f32 %v2257_v42, %v3581_v43 }
 0x4bc   : > { %v2306_v41 = vsel %vm682_vm6, %v2304_v63, %v2305_v51 }
 0x4bd   : > { %2229 = vrot.lane.b32.xlu0 %v2226_v11, %s3233_s9  ;;  %2189 = vrot.lane.b32.xlu1 %v2186_v9, %s3231_s11  ;;  %v2369_v11 = vstv %s2921_s29  ;;  %v2264_v28 = vrot.slane %v2258_v50, 5  ;;  %s2926_s29 = sld [smem:[#allocation7 + $0x30]] }
 0x4be   : > { %2149 = vrot.lane.b32.xlu2 %v2146_v55, %s3232_s15  ;;  %v2371_v9 = vmul.f32 %v2369_v11, %v3587_v47  ;;  %v2370_v52 = vmul.f32 %v2369_v11, %v3581_v43  ;;  %v2372_v51 = vmul.f32 %v2369_v11, %v3643_v30 }
 0x4bf   : > { %v3921_v3 = vpop.permute.xlu0 %1293  ;;  %v3923_v21 = vpop.permute.xlu1 %1221 }
 0x4c0   : > { %4771 = vst [vmem:[#allocation19_spill] sm:$0xff] %v3921_v3  ;;  %v3925_v4 = vpop.permute.xlu2 %1415  ;;  %v2377_v46 = vrot.slane %v2371_v9, 6  ;;  %v2266_v9 = vsel %vm682_vm6, %v2264_v28, %v2265_v48  ;;  %v2379_v45 = vrot.slane %v2372_v51, 6 }
 0x4c1   : > { %4772 = vst [vmem:[#allocation20_spill] sm:$0xff] %v3925_v4 }
 0x4c2   : > { %v2380_v28 = vsel %vm680_vm5, %v2377_v46, %v2379_v45 }
 0x4c5   : > { %2311 = vrot.lane.b32.xlu0 %v2308_v56, %s3234_s10  ;;  %2271 = vrot.lane.b32.xlu1 %v2268_v15, %s3235_s3  ;;  %v2376_v56 = vrot.slane %v2370_v52, 6  ;;  %v2449_v15 = vstv %s2923_s18  ;;  %s2936_s18 = sld [smem:[#allocation7 + $0x3a]] }
 0x4c6   : > { %2231 = vrot.lane.b32.xlu2 %v2228_v13, %s3233_s9  ;;  %v2451_v35 = vmul.f32 %v2449_v15, %v3587_v47  ;;  %v2409_v13 = vstv %s2922_s27  ;;  %s2938_s27 = sld [smem:[#allocation7 + $0x3c]] }
 0x4c7   : > { %v3936_v19 = vpop.permute.xlu0 %1375  ;;  %v3938_v20 = vpop.permute.xlu1 %1335  ;;  %v2378_v4 = vsel %vm680_vm5, %v2376_v56, %v2377_v46  ;;  %v2412_v42 = vmul.f32 %v2409_v13, %v3643_v30 }
 0x4c8   : > { %4773 = vst [vmem:[#allocation21_spill] sm:$0xff] %v3936_v19  ;;  %v3941_v55 = vpop.permute.xlu2 %1453  ;;  %v2452_v19 = vmul.f32 %v2449_v15, %v3643_v30  ;;  %v2457_v63 = vrot.slane %v2451_v35, 6 }
 0x4c9   : > { %4774 = vst [vmem:[#allocation22_spill] sm:$0xff] %v3938_v20  ;;  %v2411_v20 = vmul.f32 %v2409_v13, %v3587_v47  ;;  %v2419_v3 = vrot.slane %v2412_v42, 6 }
 0x4ca   : > { %4775 = vst [vmem:[#allocation23_spill] sm:$0xff] %v3941_v55  ;;  %v2459_v56 = vrot.slane %v2452_v19, 6  ;;  %v2450_v19 = vmul.f32 %v2449_v15, %v3581_v43 }
 0x4cb   : > { %v2417_v55 = vrot.slane %v2411_v20, 6  ;;  %v807_v20 = vsel %vm719_vm11, 0.0, %v3723_v16  ;;  %vm2717_vm11 = vcmask 785408  }
 0x4cc   : > { %v2460_v48 = vsel %vm680_vm5, %v2457_v63, %v2459_v56  ;;  %v3979_v45 = vsel %vm723_vm12, %v807_v20, 0.0  ;;  %v2456_v46 = vrot.slane %v2450_v19, 6 }
 0x4cd   : > { %2381 = vrot.lane.b32.xlu0 %v2378_v4, %s3221_s14  ;;  %2309 = vrot.lane.b32.xlu1 %v2306_v41, %s3234_s10  ;;  %v2489_v4 = vstv %s2924_s16  ;;  %v2420_v11 = vsel %vm680_vm5, %v2417_v55, %v2419_v3  ;;  %s2937_s16 = sld [smem:[#allocation7 + $0x3b]] }
 0x4ce   : > { %2269 = vrot.lane.b32.xlu2 %v2266_v9, %s3235_s3  ;;  %v2491_v41 = vmul.f32 %v2489_v4, %v3587_v47  ;;  %v2490_v35 = vmul.f32 %v2489_v4, %v3581_v43  ;;  %v2410_v9 = vmul.f32 %v2409_v13, %v3581_v43  ;;  %v2458_v16 = vsel %vm680_vm5, %v2456_v46, %v2457_v63 }
 0x4cf   : > { %v3954_v49 = vpop.permute.xlu0 %1413  ;;  %v3956_v52 = vpop.permute.xlu1 %1373  ;;  %v2492_v63 = vmul.f32 %v2489_v4, %v3643_v30 }
 0x4d0   : > { %4776 = vst [vmem:[#allocation24_spill] sm:$0xff] %v3954_v49  ;;  %v3958_v50 = vpop.permute.xlu2 %1567  ;;  %v2497_v56 = vrot.slane %v2491_v41, 6  ;;  %v2496_v15 = vrot.slane %v2490_v35, 6 }
 0x4d1   : > { %4777 = vst [vmem:[#allocation25_spill] sm:$0xff] %v3956_v52 }
 0x4d2   : > { %4778 = vst [vmem:[#allocation26_spill] sm:$0xff] %v3958_v50  ;;  %v2498_v50 = vsel %vm680_vm5, %v2496_v15, %v2497_v56 }
 0x4d5   : > { %2463 = vrot.lane.b32.xlu0 %v2460_v48, %s3231_s11  ;;  %2423 = vrot.lane.b32.xlu1 %v2420_v11, %s3232_s15  ;;  %v2416_v48 = vrot.slane %v2410_v9, 6  ;;  %v2529_v11 = vstv %s2925_s12  ;;  %s2939_s12 = sld [smem:[#allocation7 + $0x3d]] }
 0x4d6   : > { %2383 = vrot.lane.b32.xlu2 %v2380_v28, %s3221_s14  ;;  %v1029_v28 = vstv %s2935_s8  ;;  %v2532_v13 = vmul.f32 %v2529_v11, %v3643_v30  ;;  %s2942_s8 = sld [smem:[#allocation7 + $0x40]] }
 0x4d7   : > { %v3971_v42 = vpop.permute.xlu0 %1495  ;;  %v3973_v3 = vpop.permute.xlu1 %1455  ;;  %v1032_v41 = vmul.f32 %v1029_v28, %v3979_v45  ;;  %v2418_v19 = vsel %vm680_vm5, %v2416_v48, %v2417_v55  ;;  %v1031_v20 = vmul.f32 %v1029_v28, %v3609_v7  ;;  %v1069_v55 = vstv %s2936_s18  ;;  %s2943_s18 = sld [smem:[#allocation7 + $0x41]] }
 0x4d8   : > { %4779 = vst [vmem:[#allocation27_spill] sm:$0xff] %v3971_v42  ;;  %v3976_v51 = vpop.permute.xlu2 %1605  ;;  %v2531_v42 = vmul.f32 %v2529_v11, %v3587_v47 }
 0x4d9   : > { %4780 = vst [vmem:[#allocation28_spill] sm:$0xff] %v3973_v3  ;;  %v1039_v3 = vrot.slane %v1032_v41, 1  ;;  %v1037_v49 = vrot.slane %v1031_v20, 1 }
 0x4da   : > { %4781 = vst [vmem:[#allocation29_spill] sm:$0xff] %v3976_v51  ;;  %v2537_v15 = vrot.slane %v2531_v42, 6  ;;  %v2539_v51 = vrot.slane %v2532_v13, 6 }
 0x4db   : > { %v1040_v48 = vsel %vm690_vm10, %v1037_v49, %v1039_v3 }
 0x4dc   : > { %v2540_v4 = vsel %vm680_vm5, %v2537_v15, %v2539_v51  ;;  %v1071_v51 = vmul.f32 %v1069_v55, %v3609_v7 }
 0x4dd   : > { %2501 = vrot.lane.b32.xlu0 %v2498_v50, %s3233_s9  ;;  %2461 = vrot.lane.b32.xlu1 %v2458_v16, %s3231_s11  ;;  %v2499_v50 = vrot.slane %v2492_v63, 6  ;;  %v3998_v16 = vstv %s2926_s29  ;;  %v2530_v63 = vmul.f32 %v2529_v11, %v3581_v43  ;;  %s2940_s29 = sld [smem:[#allocation7 + $0x3e]] }
 0x4de   : > { %2421 = vrot.lane.b32.xlu2 %v2418_v19, %s3232_s15  ;;  %4785 = vst [vmem:[#allocation33_spill] sm:$0xff] %v3998_v16  ;;  %v4004_v19 = vmul.f32 %v3998_v16, %v3587_v47  ;;  %v2570_v13 = vmul.f32 %v3998_v16, %v3581_v43 }
 0x4df   : > { %v3992_v35 = vpop.permute.xlu0 %1565  ;;  %v3994_v9 = vpop.permute.xlu1 %1493  ;;  %v2500_v42 = vsel %vm680_vm5, %v2497_v56, %v2499_v50 }
 0x4e0   : > { %4782 = vst [vmem:[#allocation30_spill] sm:$0xff] %v3992_v35  ;;  %v3996_v46 = vpop.permute.xlu2 %1687  ;;  %v1070_v35 = vmul.f32 %v1069_v55, %v3619_v6  ;;  %v2576_v50 = vrot.slane %v2570_v13, 6  ;;  %v1072_v13 = vmul.f32 %v1069_v55, %v3979_v45 }
 0x4e1   : > { %4783 = vst [vmem:[#allocation31_spill] sm:$0xff] %v3994_v9 }
 0x4e2   : > { %4784 = vst [vmem:[#allocation32_spill] sm:$0xff] %v3996_v46  ;;  %v1076_v56 = vrot.slane %v1070_v35, 1  ;;  %v1149_v46 = vstv %s2938_s27  ;;  %s2945_s27 = sld [smem:[#allocation7 + $0x43]] }
 0x4e3   : > { %4786 = vst [vmem:[#allocation34_spill] sm:$0xff] %v4004_v19  ;;  %v1152_v11 = vmul.f32 %v1149_v46, %v3979_v45 }
 0x4e5   : > { %2543 = vrot.lane.b32.xlu1 %v2540_v4, %s3235_s3  ;;  %1043 = vrot.lane.b32.xlu0 %v1040_v48, %s3221_s14  ;;  %v4752_v4 = vrot.slane %v4004_v19, 6  ;;  %v1077_v48 = vrot.slane %v1071_v51, 1  ;;  %v1151_v51 = vmul.f32 %v1149_v46, %v3609_v7  ;;  %v1109_v19 = vstv %s2937_s16  ;;  %s2944_s16 = sld [smem:[#allocation7 + $0x42]] }
 0x4e6   : > { %2503 = vrot.lane.b32.xlu2 %v2500_v42, %s3233_s9  ;;  %v2536_v42 = vrot.slane %v2530_v63, 6 }
 0x4e7   : > { %v4014_v3 = vpop.permute.xlu0 %1647  ;;  %v4016_v41 = vpop.permute.xlu1 %1607  ;;  %v2578_v9 = vsel %vm680_vm5, %v2576_v50, %v4752_v4  ;;  %v1159_v4 = vrot.slane %v1152_v11, 1  ;;  %v1111_v11 = vmul.f32 %v1109_v19, %v3609_v7 }
 0x4e8   : > { %4787 = vst [vmem:[#allocation35_spill] sm:$0xff] %v4014_v3  ;;  %v4019_v20 = vpop.permute.xlu2 %1725  ;;  %v1078_v3 = vsel %vm690_vm10, %v1076_v56, %v1077_v48  ;;  %v2538_v35 = vsel %vm680_vm5, %v2536_v42, %v2537_v15  ;;  %v1189_v15 = vstv %s2939_s12  ;;  %v1112_v42 = vmul.f32 %v1109_v19, %v3979_v45  ;;  %s2946_s12 = sld [smem:[#allocation7 + $0x44]] }
 0x4e9   : > { %4788 = vst [vmem:[#allocation36_spill] sm:$0xff] %v4016_v41  ;;  %v1030_v41 = vmul.f32 %v1029_v28, %v3619_v6 }
 0x4ea   : > { %4789 = vst [vmem:[#allocation37_spill] sm:$0xff] %v4019_v20  ;;  %v1079_v20 = vrot.slane %v1072_v13, 1 }
 0x4eb   : > { %v1036_v28 = vrot.slane %v1030_v41, 1  ;;  %v1110_v41 = vmul.f32 %v1109_v19, %v3619_v6 }
 0x4ed   : > { %2581 = vrot.lane.b32.xlu1 %v2578_v9, %s3234_s10  ;;  %1081 = vrot.lane.b32.xlu0 %v1078_v3, %s3232_s15  ;;  %v1157_v9 = vrot.slane %v1151_v51, 1  ;;  %v1038_v3 = vsel %vm690_vm10, %v1036_v28, %v1037_v49  ;;  %v1191_v49 = vmul.f32 %v1189_v15, %v3609_v7  ;;  %v1119_v28 = vrot.slane %v1112_v42, 1 }
 0x4ee   : > { %2541 = vrot.lane.b32.xlu2 %v2538_v35, %s3235_s3  ;;  %v1190_v35 = vmul.f32 %v1189_v15, %v3619_v6  ;;  %v1192_v42 = vmul.f32 %v1189_v15, %v3979_v45 }
 0x4ef   : > { %v4034_v63 = vpop.permute.xlu0 %1685  ;;  %v4036_v50 = vpop.permute.xlu1 %1645  ;;  %v1160_v55 = vsel %vm690_vm10, %v1157_v9, %v1159_v4 }
 0x4f0   : > { %4790 = vst [vmem:[#allocation38_spill] sm:$0xff] %v4034_v63  ;;  %v4038_v56 = vpop.permute.xlu2 %1839  ;;  %v1080_v63 = vsel %vm690_vm10, %v1077_v48, %v1079_v20  ;;  %v1117_v20 = vrot.slane %v1111_v11, 1  ;;  %v1197_v48 = vrot.slane %v1191_v49, 1 }
 0x4f1   : > { %4791 = vst [vmem:[#allocation39_spill] sm:$0xff] %v4036_v50  ;;  %v1150_v50 = vmul.f32 %v1149_v46, %v3619_v6 }
 0x4f2   : > { %4792 = vst [vmem:[#allocation40_spill] sm:$0xff] %v4038_v56  ;;  %v1116_v56 = vrot.slane %v1110_v41, 1 }
 0x4f3   : > { %v1156_v46 = vrot.slane %v1150_v50, 1 }
 0x4f5   : > { %1041 = vrot.lane.b32.xlu1 %v1038_v3, %s3221_s14  ;;  %1163 = vrot.lane.b32.xlu0 %v1160_v55, %s3233_s9  ;;  %v1196_v3 = vrot.slane %v1190_v35, 1  ;;  %v1301_v55 = vstv %s2942_s8  ;;  %s2949_s8 = sld [smem:[#allocation7 + $0x47]] }
 0x4f6   : > { %1083 = vrot.lane.b32.xlu2 %v1080_v63, %s3232_s15  ;;  %v1120_v63 = vsel %vm690_vm10, %v1117_v20, %v1119_v28  ;;  %v1303_v35 = vmul.f32 %v1301_v55, %v3609_v7 }
 0x4f7   : > { %v4051_v13 = vpop.permute.xlu0 %1767  ;;  %v4053_v4 = vpop.permute.xlu1 %1727  ;;  %v1198_v19 = vsel %vm690_vm10, %v1196_v3, %v1197_v48  ;;  %v1199_v3 = vrot.slane %v1192_v42, 1 }
 0x4f8   : > { %4793 = vst [vmem:[#allocation41_spill] sm:$0xff] %v4051_v13  ;;  %v4055_v51 = vpop.permute.xlu2 %1877  ;;  %v1304_v13 = vmul.f32 %v1301_v55, %v3979_v45 }
 0x4f9   : > { %4794 = vst [vmem:[#allocation42_spill] sm:$0xff] %v4053_v4  ;;  %v1229_v4 = vstv %s2940_s29  ;;  %s2947_s29 = sld [smem:[#allocation7 + $0x45]] }
 0x4fa   : > { %4795 = vst [vmem:[#allocation43_spill] sm:$0xff] %v4055_v51  ;;  %v1118_v51 = vsel %vm690_vm10, %v1116_v56, %v1117_v20  ;;  %v1311_v28 = vrot.slane %v1304_v13, 2  ;;  %v1341_v56 = vstv %s2943_s18  ;;  %v1158_v20 = vsel %vm690_vm10, %v1156_v46, %v1157_v9  ;;  %s2950_s18 = sld [smem:[#allocation7 + $0x48]] }
 0x4fb   : > { %v1230_v50 = vmul.f32 %v1229_v4, %v3619_v6  ;;  %v1231_v13 = vmul.f32 %v1229_v4, %v3609_v7  ;;  %v1343_v9 = vmul.f32 %v1341_v56, %v3609_v7 }
 0x4fd   : > { %1123 = vrot.lane.b32.xlu1 %v1120_v63, %s3231_s11  ;;  %1201 = vrot.lane.b32.xlu0 %v1198_v19, %s3235_s3  ;;  %v1309_v63 = vrot.slane %v1303_v35, 2  ;;  %v1342_v19 = vmul.f32 %v1341_v56, %v3619_v6 }
 0x4fe   : > { %1121 = vrot.lane.b32.xlu2 %v1118_v51, %s3231_s11  ;;  %v1232_v51 = vmul.f32 %v1229_v4, %v3979_v45 }
 0x4ff   : > { %v4067_v41 = vpop.permute.xlu0 %1837  ;;  %v4069_v11 = vpop.permute.xlu1 %1765  ;;  %v1312_v15 = vsel %vm688_vm9, %v1309_v63, %v1311_v28 }
 0x500   : > { %4796 = vst [vmem:[#allocation44_spill] sm:$0xff] %v4067_v41  ;;  %v4071_v49 = vpop.permute.xlu2 %1959  ;;  %v1200_v41 = vsel %vm690_vm10, %v1197_v48, %v1199_v3  ;;  %v1239_v28 = vrot.slane %v1232_v51, 1  ;;  %v1237_v48 = vrot.slane %v1231_v13, 1  ;;  %v1349_v3 = vrot.slane %v1343_v9, 2 }
 0x501   : > { %4797 = vst [vmem:[#allocation45_spill] sm:$0xff] %v4069_v11  ;;  %v1302_v11 = vmul.f32 %v1301_v55, %v3619_v6  ;;  %v1344_v51 = vmul.f32 %v1341_v56, %v3979_v45 }
 0x502   : > { %4798 = vst [vmem:[#allocation46_spill] sm:$0xff] %v4071_v49  ;;  %v1236_v49 = vrot.slane %v1230_v50, 1 }
 0x503   : > { %v1308_v55 = vrot.slane %v1302_v11, 2 }
 0x505   : > { %1161 = vrot.lane.b32.xlu1 %v1158_v20, %s3233_s9  ;;  %1315 = vrot.lane.b32.xlu0 %v1312_v15, %s3221_s14  ;;  %v1348_v20 = vrot.slane %v1342_v19, 2  ;;  %v1421_v15 = vstv %s2945_s27  ;;  %s4127_s27 = sld [smem:[#allocation7 + $0x31]] }
 0x506   : > { %1203 = vrot.lane.b32.xlu2 %v1200_v41, %s3235_s3  ;;  %v1240_v41 = vsel %vm690_vm10, %v1237_v48, %v1239_v28  ;;  %v1423_v19 = vmul.f32 %v1421_v15, %v3609_v7 }
 0x507   : > { %v4084_v42 = vpop.permute.xlu0 %1919  ;;  %v4086_v35 = vpop.permute.xlu1 %1879  ;;  %v1350_v4 = vsel %vm688_vm9, %v1348_v20, %v1349_v3  ;;  %v1351_v20 = vrot.slane %v1344_v51, 2 }
 0x508   : > { %4799 = vst [vmem:[#allocation47_spill] sm:$0xff] %v4084_v42  ;;  %v4088_v46 = vpop.permute.xlu2 %1997  ;;  %v1424_v42 = vmul.f32 %v1421_v15, %v3979_v45 }
 0x509   : > { %4800 = vst [vmem:[#allocation48_spill] sm:$0xff] %v4086_v35  ;;  %v1381_v35 = vstv %s2944_s16  ;;  %s4143_s16 = sld [smem:[#allocation7]] }
 0x50a   : > { %4801 = vst [vmem:[#allocation49_spill] sm:$0xff] %v4088_v46  ;;  %v1238_v46 = vsel %vm690_vm10, %v1236_v49, %v1237_v48  ;;  %v1431_v28 = vrot.slane %v1424_v42, 2  ;;  %v1461_v49 = vstv %s2946_s12  ;;  %v1310_v48 = vsel %vm688_vm9, %v1308_v55, %v1309_v63  ;;  %s2952_s12 = sld [smem:[#allocation7 + $0x4a]] }
 0x50b   : > { %v1382_v11 = vmul.f32 %v1381_v35, %v3619_v6  ;;  %v1383_v42 = vmul.f32 %v1381_v35, %v3609_v7  ;;  %v1463_v63 = vmul.f32 %v1461_v49, %v3609_v7 }
 0x50d   : > { %1243 = vrot.lane.b32.xlu1 %v1240_v41, %s3234_s10  ;;  %1353 = vrot.lane.b32.xlu0 %v1350_v4, %s3232_s15  ;;  %v1429_v41 = vrot.slane %v1423_v19, 2  ;;  %v1462_v4 = vmul.f32 %v1461_v49, %v3619_v6 }
 0x50e   : > { %1241 = vrot.lane.b32.xlu2 %v1238_v46, %s3234_s10  ;;  %v1384_v46 = vmul.f32 %v1381_v35, %v3979_v45 }
 0x50f   : > { %v4100_v50 = vpop.permute.xlu0 %1957  ;;  %v4102_v13 = vpop.permute.xlu1 %1917  ;;  %v1432_v56 = vsel %vm688_vm9, %v1429_v41, %v1431_v28 }
 0x510   : > { %4802 = vst [vmem:[#allocation50_spill] sm:$0xff] %v4100_v50  ;;  %v4104_v9 = vpop.permute.xlu2 %2111  ;;  %v1352_v50 = vsel %vm688_vm9, %v1349_v3, %v1351_v20  ;;  %v1391_v28 = vrot.slane %v1384_v46, 2  ;;  %v1389_v3 = vrot.slane %v1383_v42, 2  ;;  %v1469_v20 = vrot.slane %v1463_v63, 2 }
 0x511   : > { %4803 = vst [vmem:[#allocation51_spill] sm:$0xff] %v4102_v13  ;;  %v1422_v13 = vmul.f32 %v1421_v15, %v3619_v6 }
 0x512   : > { %4804 = vst [vmem:[#allocation52_spill] sm:$0xff] %v4104_v9  ;;  %v1388_v9 = vrot.slane %v1382_v11, 2 }
 0x514   : > { %v1390_v46 = vsel %vm688_vm9, %v1388_v9, %v1389_v3 }
 0x515   : > { %1313 = vrot.lane.b32.xlu1 %v1310_v48, %s3221_s14  ;;  %1435 = vrot.lane.b32.xlu0 %v1432_v56, %s3233_s9  ;;  %v1468_v48 = vrot.slane %v1462_v4, 2  ;;  %v1573_v56 = vstv %s2949_s8  ;;  %v1464_v4 = vmul.f32 %v1461_v49, %v3979_v45  ;;  %v1501_v49 = vstv %s2947_s29  ;;  %s2951_s8 = sld [smem:[#allocation7 + $0x49]] }
 0x516   : > { %1355 = vrot.lane.b32.xlu2 %v1352_v50, %s3232_s15  ;;  %v1392_v50 = vsel %vm688_vm9, %v1389_v3, %v1391_v28  ;;  %v4135_v11 = vmul.f32 %v1573_v56, %v3609_v7  ;;  %v1428_v28 = vrot.slane %v1422_v13, 2  ;;  %v1574_v52 = vmul.f32 %v1573_v56, %v3619_v6  ;;  %s2953_s29 = sld [smem:[#allocation7 + $0x4b]] }
 0x517   : > { %v4117_v51 = vpop.permute.xlu0 %2039  ;;  %v4119_v19 = vpop.permute.xlu1 %1999  ;;  %v1470_v35 = vsel %vm688_vm9, %v1468_v48, %v1469_v20  ;;  %v1471_v9 = vrot.slane %v1464_v4, 2 }
 0x518   : > { %4805 = vst [vmem:[#allocation53_spill] sm:$0xff] %v4117_v51  ;;  %v4121_v55 = vpop.permute.xlu2 %2149  ;;  %v1576_v51 = vmul.f32 %v1573_v56, %v3979_v45  ;;  %v1581_v3 = vrot.slane %v4135_v11, 3 }
 0x519   : > { %4806 = vst [vmem:[#allocation54_spill] sm:$0xff] %v4119_v19  ;;  %v1472_v13 = vsel %vm688_vm9, %v1469_v20, %v1471_v9  ;;  %v811_v9 = vstv %s4143_s16  ;;  %s2957_s16 = sld [smem:[#allocation7 + $0x4f]] }
 0x51a   : > { %4807 = vst [vmem:[#allocation55_spill] sm:$0xff] %v4121_v55  ;;  %v1583_v48 = vrot.slane %v1576_v51, 3  ;;  %v1504_v55 = vmul.f32 %v1501_v49, %v3979_v45  ;;  %v1502_v51 = vmul.f32 %v1501_v49, %v3619_v6  ;;  %v813_v19 = vmul.f32 %v811_v9, %v3587_v47 }
 0x51d   : > { %1395 = vrot.lane.b32.xlu1 %v1392_v50, %s3231_s11  ;;  %1473 = vrot.lane.b32.xlu0 %v1470_v35, %s3235_s3  ;;  %v1613_v50 = vstv %s2950_s18  ;;  %v1430_v35 = vsel %vm688_vm9, %v1428_v28, %v1429_v41  ;;  %v1503_v41 = vmul.f32 %v1501_v49, %v3609_v7  ;;  %s2956_s18 = sld [smem:[#allocation7 + $0x4e]] }
 0x51e   : > { %1393 = vrot.lane.b32.xlu2 %v1390_v46, %s3231_s11  ;;  %v1584_v46 = vsel %vm686_vm8, %v1581_v3, %v1583_v48  ;;  %v1615_v4 = vmul.f32 %v1613_v50, %v3609_v7 }
 0x51f   : > { %v4137_v42 = vpop.permute.xlu0 %2109  ;;  %v4139_v15 = vpop.permute.xlu1 %2037  ;;  %v1509_v16 = vrot.slane %v1503_v41, 2 }
 0x520   : > { %4808 = vst [vmem:[#allocation56_spill] sm:$0xff] %v4137_v42  ;;  %v4141_v63 = vpop.permute.xlu2 %2231  ;;  %v1614_v42 = vmul.f32 %v1613_v50, %v3619_v6 }
 0x521   : > { %4809 = vst [vmem:[#allocation57_spill] sm:$0xff] %v4139_v15 }
 0x522   : > { %4810 = vst [vmem:[#allocation58_spill] sm:$0xff] %v4141_v63  ;;  %v816_v63 = vstv %s4127_s27  ;;  %v1620_v20 = vrot.slane %v1614_v42, 3  ;;  %s2954_s27 = sld [smem:[#allocation7 + $0x4c]] }
 0x523   : > { %v818_v48 = vmul.f32 %v816_v63, %v3609_v7  ;;  %v817_v49 = vmul.f32 %v816_v63, %v3619_v6  ;;  %v812_v63 = vmul.f32 %v811_v9, %v3581_v43 }
 0x525   : > { %1433 = vrot.lane.b32.xlu1 %v1430_v35, %s3233_s9  ;;  %1587 = vrot.lane.b32.xlu0 %v1584_v46, %s3221_s14  ;;  %v1511_v35 = vrot.slane %v1504_v55, 2  ;;  %v1508_v46 = vrot.slane %v1502_v51, 2  ;;  %v1616_v51 = vmul.f32 %v1613_v50, %v3979_v45 }
 0x526   : > { %1475 = vrot.lane.b32.xlu2 %v1472_v13, %s3235_s3  ;;  %v1621_v13 = vrot.slane %v1615_v4, 3 }
 0x527   : > { %v4158_v11 = vpop.permute.xlu0 %2191  ;;  %v4160_v28 = vpop.permute.xlu1 %2151  ;;  %v1512_v31 = vsel %vm688_vm9, %v1509_v16, %v1511_v35  ;;  %v1510_v42 = vsel %vm688_vm9, %v1508_v46, %v1509_v16  ;;  %v1623_v35 = vrot.slane %v1616_v51, 3 }
 0x528   : > { %4811 = vst [vmem:[#allocation59_spill] sm:$0xff] %v4158_v11  ;;  %v4163_v15 = vpop.permute.xlu2 %2269  ;;  %v1693_v11 = vstv %s2952_s12  ;;  %s2959_s12 = sld [smem:[#allocation7 + $0x51]] }
 0x529   : > { %4812 = vst [vmem:[#allocation60_spill] sm:$0xff] %v4160_v28  ;;  %v820_v28 = vadd.f32 %v818_v48, %v813_v19  ;;  %v1696_v55 = vmul.f32 %v1693_v11, %v3979_v45  ;;  %v4180_v19 = vmul.f32 %v1693_v11, %v3609_v7  ;;  %v819_v48 = vadd.f32 %v817_v49, %v812_v63 }
 0x52a   : > { %4813 = vst [vmem:[#allocation61_spill] sm:$0xff] %v4163_v15  ;;  %v1622_v15 = vsel %vm686_vm8, %v1620_v20, %v1621_v13 }
 0x52b   : > { %v833_v56 = vadd.f32 %v3698_v44, %v820_v28  ;;  %v1703_v50 = vrot.slane %v1696_v55, 3  ;;  %v832_v20 = vadd.f32 %v3725_v17, %v819_v48  ;;  %v1701_v44 = vrot.slane %v4180_v19, 3 }
 0x52c   : > { %v1653_v28 = vstv %s2951_s8  ;;  %v1624_v17 = vsel %vm686_vm8, %v1621_v13, %v1623_v35  ;;  %s2885_s8 = sld [smem:[#allocation7 + $0x7]] }
 0x52d   : > { %1515 = vrot.lane.b32.xlu1 %v1512_v31, %s3234_s10  ;;  %1625 = vrot.lane.b32.xlu0 %v1622_v15, %s3232_s15  ;;  %v1580_v31 = vrot.slane %v1574_v52, 3  ;;  %v846_v16 = vadd.f32 %v3789_v37, %v833_v56  ;;  %v1656_v46 = vmul.f32 %v1653_v28, %v3979_v45  ;;  %v845_v49 = vadd.f32 %v3806_v60, %v832_v20 }
 0x52e   : > { %1513 = vrot.lane.b32.xlu2 %v1510_v42, %s3234_s10  ;;  %v1733_v42 = vstv %s2953_s29  ;;  %v1704_v37 = vsel %vm686_vm8, %v1701_v44, %v1703_v50  ;;  %v1654_v51 = vmul.f32 %v1653_v28, %v3619_v6  ;;  %s2934_s29 = sld [smem:[#allocation7 + $0x38]] }
 0x52f   : > { %v4182_v41 = vpop.permute.xlu0 %2229  ;;  %v4184_v4 = vpop.permute.xlu1 %2189  ;;  %v1582_v9 = vsel %vm686_vm8, %v1580_v31, %v1581_v3  ;;  %v859_v52 = vadd.f32 %v3740_v34, %v846_v16  ;;  %v1734_v55 = vmul.f32 %v1733_v42, %v3619_v6  ;;  %v1655_v3 = vmul.f32 %v1653_v28, %v3609_v7 }
 0x530   : > { %v4187_v15 = vpop.permute.xlu2 %2383  ;;  %v1735_v34 = vmul.f32 %v1733_v42, %v3609_v7  ;;  %v1663_v56 = vrot.slane %v1656_v46, 3  ;;  %v858_v19 = vadd.f32 %v3710_v61, %v845_v49  ;;  %v1660_v50 = vrot.slane %v1654_v51, 3 }
 0x531   : > { %v872_v31 = vadd.f32 %v3760_v58, %v859_v52  ;;  %v1740_v48 = vrot.slane %v1734_v55, 3  ;;  %v1661_v16 = vrot.slane %v1655_v3, 3  ;;  %v1694_v28 = vmul.f32 %v1693_v11, %v3619_v6 }
 0x532   : > { %v1741_v35 = vrot.slane %v1735_v34, 3  ;;  %v1736_v49 = vmul.f32 %v1733_v42, %v3979_v45 }
 0x533   : > { %v1664_v20 = vsel %vm686_vm8, %v1661_v16, %v1663_v56  ;;  %v885_v46 = vadd.f32 %v3738_v32, %v872_v31  ;;  %v1662_v52 = vsel %vm686_vm8, %v1660_v50, %v1661_v16  ;;  %v1773_v31 = vstv %s2954_s27  ;;  %s4263_s27 = sld [smem:[#allocation7 + $0x52]] }
 0x534   : > { %v1742_v61 = vsel %vm686_vm8, %v1740_v48, %v1741_v35  ;;  %v1743_v56 = vrot.slane %v1736_v49, 3  ;;  %v1885_v48 = vstv %s2957_s16  ;;  %s4298_s16 = sld [smem:[#allocation7 + $0x55]] }
 0x535   : > { %1585 = vrot.lane.b32.xlu1 %v1582_v9, %s3221_s14  ;;  %1707 = vrot.lane.b32.xlu0 %v1704_v37, %s3233_s9  ;;  %v1845_v9 = vstv %s2956_s18  ;;  %v871_v37 = vadd.f32 %v3804_v12, %v858_v19  ;;  %v898_v11 = vadd.f32 %v3824_v25, %v885_v46  ;;  %s4258_s18 = sld [smem:[#allocation7 + $0x50]] }
 0x536   : > { %1627 = vrot.lane.b32.xlu2 %v1624_v17, %s3232_s15  ;;  %v1848_v58 = vmul.f32 %v1845_v9, %v3979_v45  ;;  %v4225_v12 = vmul.f32 %v1845_v9, %v3609_v7  ;;  %v1700_v17 = vrot.slane %v1694_v28, 3 }
 0x537   : > { %v4204_v63 = vpop.permute.xlu0 %2311  ;;  %v4206_v60 = vpop.permute.xlu1 %2271  ;;  %v884_v3 = vadd.f32 %v3758_v0, %v871_v37  ;;  %v911_v42 = vadd.f32 %v3727_v18, %v898_v11  ;;  %v1776_v0 = vmul.f32 %v1773_v31, %v3979_v45  ;;  %v1744_v18 = vsel %vm686_vm8, %v1741_v35, %v1743_v56 }
 0x538   : > { %v4210_v13 = vpop.permute.xlu2 %2421  ;;  %v1855_v34 = vrot.slane %v1848_v58, 4  ;;  %v1853_v25 = vrot.slane %v4225_v12, 4  ;;  %v1702_v19 = vsel %vm686_vm8, %v1700_v17, %v1701_v44  ;;  %v1774_v44 = vmul.f32 %v1773_v31, %v3619_v6 }
 0x539   : > { %v897_v16 = vadd.f32 %v3776_v14, %v884_v3  ;;  %v924_v28 = vadd.f32 %v3822_v24, %v911_v42  ;;  %v1775_v14 = vmul.f32 %v1773_v31, %v3609_v7  ;;  %v1887_v37 = vmul.f32 %v1885_v48, %v3609_v7 }
 0x53a   : > { %v1856_v50 = vsel %vm684_vm7, %v1853_v25, %v1855_v34  ;;  %v1783_v35 = vrot.slane %v1776_v0, 3  ;;  %v1780_v11 = vrot.slane %v1774_v44, 3  ;;  %v1846_v34 = vmul.f32 %v1845_v9, %v3619_v6 }
 0x53b   : > { %v910_v58 = vadd.f32 %v3756_v57, %v897_v16  ;;  %v937_v12 = vadd.f32 %v3773_v1, %v924_v28  ;;  %v1781_v17 = vrot.slane %v1775_v14, 3  ;;  %v1893_v3 = vrot.slane %v1887_v37, 4 }
 0x53c   : > { %v4261_v56 = vstv %s2959_s12  ;;  %v977_v57 = vstv %s2885_s8  ;;  %v1888_v9 = vmul.f32 %v1885_v48, %v3979_v45  ;;  %v1852_v28 = vrot.slane %v1846_v34, 4  ;;  %s2961_s12 = sld [smem:[#allocation7 + $0x53]] }
 0x53d   : > { %1667 = vrot.lane.b32.xlu1 %v1664_v20, %s3231_s11  ;;  %1745 = vrot.lane.b32.xlu0 %v1742_v61, %s3235_s3  ;;  %v1886_v20 = vmul.f32 %v1885_v48, %v3619_v6  ;;  %v923_v24 = vadd.f32 %v3839_v54, %v910_v58  ;;  %v1784_v42 = vsel %vm686_vm8, %v1781_v17, %v1783_v35  ;;  %v993_v14 = vstv %s2934_s29  ;;  %s2964_s8 = sld [smem:[#allocation7 + $0x56]] }
 0x53e   : > { %1665 = vrot.lane.b32.xlu2 %v1662_v52, %s3231_s11  ;;  %v1968_v54 = vmul.f32 %v4261_v56, %v3979_v45  ;;  %v4270_v1 = vmul.f32 %v977_v57, %v3587_v47  ;;  %v1782_v31 = vsel %vm686_vm8, %v1780_v11, %v1781_v17  ;;  %v980_v0 = vmul.f32 %v977_v57, %v3643_v30  ;;  %s2966_s29 = sld [smem:[#allocation7 + $0x58]] }
 0x53f   : > { %v4227_v32 = vpop.permute.xlu0 %2381  ;;  %v4229_v55 = vpop.permute.xlu1 %2309  ;;  %v1892_v49 = vrot.slane %v1886_v20, 4  ;;  %v936_v16 = vadd.f32 %v3743_v36, %v923_v24  ;;  %v4282_v20 = vmul.f32 %v4261_v56, %v3609_v7  ;;  %v1895_v37 = vrot.slane %v1888_v9, 4 }
 0x540   : > { %v4232_v51 = vpop.permute.xlu2 %2503  ;;  %v1975_v36 = vrot.slane %v1968_v54, 4  ;;  %v1854_v24 = vsel %vm684_vm7, %v1852_v28, %v1853_v25  ;;  %v1925_v17 = vstv %s4258_s18  ;;  %v2005_v34 = vstv %s4263_s27  ;;  %s2967_s18 = sld [smem:[#allocation7 + $0x59]] }
 0x541   : > { %v949_v58 = vadd.f32 %v3837_v53, %v936_v16  ;;  %v4755_v11 = vrot.slane %v4282_v20, 4  ;;  %v1928_v53 = vmul.f32 %v1925_v17, %v3979_v45  ;;  %v995_v54 = vmul.f32 %v993_v14, %v3609_v7  ;;  %s2965_s27 = sld [smem:[#allocation7 + $0x57]] }
 0x542   : > { %v1896_v25 = vsel %vm684_vm7, %v1893_v3, %v1895_v37  ;;  %v2007_v9 = vmul.f32 %v2005_v34, %v3609_v7  ;;  %v978_v16 = vmul.f32 %v977_v57, %v3581_v43 }
 0x544   : > { %v2013_v57 = vrot.slane %v2007_v9, 4 }
 0x545   : > { %1705 = vrot.lane.b32.xlu1 %v1702_v19, %s3233_s9  ;;  %1859 = vrot.lane.b32.xlu0 %v1856_v50, %s3221_s14  ;;  %v1894_v19 = vsel %vm684_vm7, %v1892_v49, %v1893_v3  ;;  %v950_v50 = vadd.f32 %v3793_v33, %v937_v12  ;;  %v985_v33 = vrot.slane %v4270_v1, 1  ;;  %v987_v49 = vrot.slane %v980_v0, 1 }
 0x546   : > { %1747 = vrot.lane.b32.xlu2 %v1744_v18, %s3235_s3  ;;  %v996_v12 = vmul.f32 %v993_v14, %v3979_v45  ;;  %v1926_v1 = vmul.f32 %v1925_v17, %v3619_v6 }
 0x547   : > { %v4249_v46 = vpop.permute.xlu0 %2463  ;;  %v4251_v61 = vpop.permute.xlu1 %2423  ;;  %v963_v35 = vadd.f32 %v3771_v10, %v950_v50  ;;  %v2006_v10 = vmul.f32 %v2005_v34, %v3619_v6  ;;  %v988_v50 = vsel %vm690_vm10, %v985_v33, %v987_v49  ;;  %v984_v49 = vrot.slane %v978_v16, 1 }
 0x548   : > { %v4254_v52 = vpop.permute.xlu2 %2541  ;;  %v1003_v28 = vrot.slane %v996_v12, 1 }
 0x54d   : > { %1787 = vrot.lane.b32.xlu1 %v1784_v42, %s3234_s10  ;;  %1897 = vrot.lane.b32.xlu0 %v1894_v19, %s3232_s15  ;;  %v976_v42 = vadd.f32 %v3857_v23, %v963_v35  ;;  %v1976_v19 = vsel %vm684_vm7, %v4755_v11, %v1975_v36  ;;  %v962_v23 = vadd.f32 %v3791_v38, %v949_v58  ;;  %v1935_v35 = vrot.slane %v1928_v53, 4 }
 0x54e   : > { %1785 = vrot.lane.b32.xlu2 %v1782_v31, %s3234_s10  ;;  %v1927_v31 = vmul.f32 %v1925_v17, %v3609_v7  ;;  %v2012_v38 = vrot.slane %v2006_v10, 4  ;;  %v994_v58 = vmul.f32 %v993_v14, %v3619_v6  ;;  %v1932_v17 = vrot.slane %v1926_v1, 4 }
 0x54f   : > { %v4284_v18 = vpop.permute.xlu0 %2501  ;;  %v4286_v44 = vpop.permute.xlu1 %2461  ;;  %v992_v36 = vadd.f32 %v988_v50, %v976_v42  ;;  %v1966_v11 = vmul.f32 %v4261_v56, %v3619_v6  ;;  %v2117_v42 = vstv %s4298_s16  ;;  %v2008_v56 = vmul.f32 %v2005_v34, %v3979_v45  ;;  %s4385_s16 = sld [smem:[#allocation7 + $0xe]] }
 0x550   : > { %v4288_v48 = vpop.permute.xlu2 %1083  ;;  %v2014_v14 = vsel %vm684_vm7, %v2012_v38, %v2013_v57  ;;  %v2120_v10 = vmul.f32 %v2117_v42, %v3979_v45 }
 0x555   : > { %1857 = vrot.lane.b32.xlu1 %v1854_v24, %s3221_s14  ;;  %1979 = vrot.lane.b32.xlu0 %v1976_v19, %s3233_s9  ;;  %v1001_v24 = vrot.slane %v995_v54, 1  ;;  %v975_v19 = vadd.f32 %v3809_v62, %v962_v23  ;;  %v986_v62 = vsel %vm690_vm10, %v984_v49, %v985_v33  ;;  %v1000_v54 = vrot.slane %v994_v58, 1 }
 0x556   : > { %1899 = vrot.lane.b32.xlu2 %v1896_v25, %s3232_s15  ;;  %v1933_v25 = vrot.slane %v1927_v31, 4  ;;  %v4337_v31 = vmul.f32 %v2117_v42, %v3609_v7  ;;  %v2015_v58 = vrot.slane %v2008_v56, 4  ;;  %v2157_v49 = vstv %s2964_s8  ;;  %s4399_s8 = sld [smem:[#allocation7 + $0x5c]] }
 0x557   : > { %v1044_v0 = vpop.permute.xlu0 %1043  ;;  %v4317_v3 = vpop.permute.xlu1 %2543  ;;  %v1004_v12 = vsel %vm690_vm10, %v1001_v24, %v1003_v28  ;;  %v991_v23 = vadd.f32 %v986_v62, %v975_v19  ;;  %v1002_v38 = vsel %vm690_vm10, %v1000_v54, %v1001_v24  ;;  %v2158_v24 = vmul.f32 %v2157_v49, %v3619_v6 }
 0x558   : > { %v4319_v37 = vpop.permute.xlu2 %1121  ;;  %v1008_v50 = vadd.f32 %v1004_v12, %v992_v36  ;;  %v1936_v53 = vsel %vm684_vm7, %v1933_v25, %v1935_v35  ;;  %v1934_v1 = vsel %vm684_vm7, %v1932_v17, %v1933_v25  ;;  %v1972_v36 = vrot.slane %v1966_v11, 4 }
 0x559   : > { %v2127_v35 = vrot.slane %v2120_v10, 5  ;;  %v1007_v17 = vadd.f32 %v1002_v38, %v991_v23  ;;  %v2125_v19 = vrot.slane %v4337_v31, 5  ;;  %v2045_v25 = vstv %s2961_s12  ;;  %s4394_s12 = sld [smem:[#allocation7 + $0x3f]] }
 0x55a   : > { %v1028_v33 = vadd.f32 %v3826_v26, %v1008_v50  ;;  %v4814_v12 = vrot.slane %v4282_v20, 4  ;;  %v2048_v11 = vmul.f32 %v2045_v25, %v3979_v45  ;;  %v2046_v50 = vmul.f32 %v2045_v25, %v3619_v6 }
 0x55b   : > { %v2128_v26 = vsel %vm682_vm6, %v2125_v19, %v2127_v35  ;;  %v1027_v20 = vadd.f32 %v3855_v22, %v1007_v17  ;;  %v2047_v10 = vmul.f32 %v2045_v25, %v3609_v7  ;;  %v2159_v62 = vmul.f32 %v2157_v49, %v3609_v7 }
 0x55c   : > { %v1048_v34 = vadd.f32 %v1044_v0, %v1028_v33  ;;  %v2016_v0 = vsel %vm684_vm7, %v2013_v57, %v2015_v58  ;;  %v2055_v57 = vrot.slane %v2048_v11, 4  ;;  %v2164_v33 = vrot.slane %v2158_v24, 5 }
 0x55d   : > { %1939 = vrot.lane.b32.xlu1 %v1936_v53, %s3231_s11  ;;  %2017 = vrot.lane.b32.xlu0 %v2014_v14, %s3235_s3  ;;  %v1974_v53 = vsel %vm684_vm7, %v1972_v36, %v4814_v12  ;;  %v2052_v36 = vrot.slane %v2046_v50, 4  ;;  %v2053_v35 = vrot.slane %v2047_v10, 4  ;;  %v2118_v58 = vmul.f32 %v2117_v42, %v3619_v6 }
 0x55e   : > { %1937 = vrot.lane.b32.xlu2 %v1934_v1, %s3231_s11  ;;  %v1068_v14 = vadd.f32 %v3872_v2, %v1048_v34  ;;  %v2165_v2 = vrot.slane %v2159_v62, 5  ;;  %v4368_v17 = vstv %s2966_s29  ;;  %v2197_v62 = vstv %s2965_s27  ;;  %s4425_s29 = sld [smem:[#allocation7 + $0x5a]] }
 0x55f   : > { %v1082_v9 = vpop.permute.xlu0 %1081  ;;  %v4339_v16 = vpop.permute.xlu1 %2581  ;;  %v2056_v25 = vsel %vm684_vm7, %v2053_v35, %v2055_v57  ;;  %v2200_v57 = vmul.f32 %v2197_v62, %v3979_v45  ;;  %s2973_s27 = sld [smem:[#allocation7 + $0x5f]]  ;;  %vm2719_vm10 = vcmask 916480  }
 0x560   : > { %v4342_v28 = vpop.permute.xlu2 %1203  ;;  %v1088_v38 = vadd.f32 %v4288_v48, %v1068_v14  ;;  %v2166_v12 = vsel %vm682_vm6, %v2164_v33, %v2165_v2  ;;  %v2160_v48 = vmul.f32 %v2157_v49, %v3979_v45  ;;  %v2277_v49 = vstv %s2967_s18  ;;  %s4431_s18 = sld [smem:[#allocation7 + $0x5d]] }
 0x561   : > { %v4397_v33 = vmul.f32 %v2277_v49, %v3609_v7 }
 0x562   : > { %v1108_v42 = vadd.f32 %v3870_v5, %v1088_v38  ;;  %v2167_v10 = vrot.slane %v2160_v48, 5  ;;  %v2278_v5 = vmul.f32 %v2277_v49, %v3619_v6  ;;  %v2198_v38 = vmul.f32 %v2197_v62, %v3619_v6 }
 0x565   : > { %1977 = vrot.lane.b32.xlu1 %v1974_v53, %s3233_s9  ;;  %2131 = vrot.lane.b32.xlu0 %v2128_v26, %s3221_s14  ;;  %v2240_v53 = vmul.f32 %v4368_v17, %v3979_v45 }
 0x566   : > { %2019 = vrot.lane.b32.xlu2 %v2016_v0, %s3235_s3 }
 0x567   : > { %v1164_v54 = vpop.permute.xlu0 %1163  ;;  %v1042_v1 = vpop.permute.xlu1 %1041  ;;  %v2247_v14 = vrot.slane %v2240_v53, 5  ;;  %v2285_v53 = vrot.slane %v4397_v33, 5 }
 0x568   : > { %v4363_v56 = vpop.permute.xlu2 %1241  ;;  %v1047_v23 = vadd.f32 %v1042_v1, %v1027_v20  ;;  %v2124_v20 = vrot.slane %v2118_v58, 5  ;;  %v2284_v58 = vrot.slane %v2278_v5, 5  ;;  %v4435_v5 = vstv %s4399_s8  ;;  %s2899_s8 = sld [smem:[#allocation7 + $0x15]] }
 0x56a   : > { %v1067_v22 = vadd.f32 %v3842_v59, %v1047_v23  ;;  %v2054_v59 = vsel %vm684_vm7, %v2052_v36, %v2053_v35  ;;  %v2168_v35 = vsel %vm682_vm6, %v2165_v2, %v2167_v10  ;;  %v1265_v10 = vstv %s4394_s12  ;;  %s2974_s12 = sld [smem:[#allocation7 + $0x60]] }
 0x56c   : > { %v1087_v34 = vadd.f32 %v1082_v9, %v1067_v22  ;;  %v4382_v9 = vmul.f32 %v4368_v17, %v3609_v7  ;;  %v2126_v22 = vsel %vm682_vm6, %v2124_v20, %v2125_v19  ;;  %v2207_v19 = vrot.slane %v2200_v57, 5 }
 0x56d   : > { %2059 = vrot.lane.b32.xlu1 %v2056_v25, %s3234_s10  ;;  %2169 = vrot.lane.b32.xlu0 %v2166_v12, %s3232_s15 }
 0x56e   : > { %2057 = vrot.lane.b32.xlu2 %v2054_v59, %s3234_s10  ;;  %v1107_v26 = vadd.f32 %v3890_v39, %v1087_v34  ;;  %v2245_v23 = vrot.slane %v4382_v9, 5  ;;  %v1249_v34 = vstv %s4385_s16  ;;  %s2972_s16 = sld [smem:[#allocation7 + $0x5e]] }
 0x56f   : > { %v1202_v11 = vpop.permute.xlu0 %1201  ;;  %v1124_v24 = vpop.permute.xlu1 %1123 }
 0x570   : > { %v4387_v0 = vpop.permute.xlu2 %1355  ;;  %v1128_v50 = vadd.f32 %v1124_v24, %v1108_v42  ;;  %v1127_v39 = vadd.f32 %v4319_v37, %v1107_v26  ;;  %v2199_v37 = vmul.f32 %v2197_v62, %v3609_v7  ;;  %v1251_v42 = vmul.f32 %v1249_v34, %v3587_v47 }
 0x571   : > { %v1252_v26 = vmul.f32 %v1249_v34, %v3643_v30  ;;  %v2286_v24 = vsel %vm682_vm6, %v2284_v58, %v2285_v53  ;;  %v1268_v62 = vmul.f32 %v1265_v10, %v3979_v45 }
 0x572   : > { %v1148_v1 = vadd.f32 %v3859_v27, %v1128_v50  ;;  %v2248_v27 = vsel %vm682_vm6, %v2245_v23, %v2247_v14  ;;  %v1147_v31 = vadd.f32 %v3888_v29, %v1127_v39  ;;  %v2205_v48 = vrot.slane %v2199_v37, 5 }
 0x573   : > { %v2204_v29 = vrot.slane %v2198_v38, 5  ;;  %v1266_v39 = vmul.f32 %v1265_v10, %v3619_v6  ;;  %v1257_v33 = vrot.slane %v1251_v42, 2  ;;  %v1275_v58 = vrot.slane %v1268_v62, 2 }
 0x574   : > { %v1168_v36 = vadd.f32 %v1164_v54, %v1148_v1  ;;  %v2208_v20 = vsel %vm682_vm6, %v2205_v48, %v2207_v19  ;;  %v2238_v1 = vmul.f32 %v4368_v17, %v3619_v6 }
 0x575   : > { %2129 = vrot.lane.b32.xlu1 %v2126_v22, %s3221_s14  ;;  %2251 = vrot.lane.b32.xlu0 %v2248_v27, %s3233_s9  ;;  %v1267_v22 = vmul.f32 %v1265_v10, %v3609_v7  ;;  %v2280_v27 = vmul.f32 %v2277_v49, %v3979_v45  ;;  %v2429_v10 = vstv %s4431_s18  ;;  %s2969_s18 = sld [smem:[#allocation7 + $0x5b]] }
 0x576   : > { %2171 = vrot.lane.b32.xlu2 %v2168_v35, %s3232_s15  ;;  %v1188_v54 = vadd.f32 %v3905_v40, %v1168_v36  ;;  %v1250_v40 = vmul.f32 %v1249_v34, %v3581_v43  ;;  %v1259_v36 = vrot.slane %v1252_v26, 2  ;;  %v4452_v35 = vmul.f32 %v4435_v5, %v3609_v7 }
 0x577   : > { %v4416_v25 = vpop.permute.xlu0 %1315  ;;  %v1162_v12 = vpop.permute.xlu1 %1161  ;;  %v2244_v19 = vrot.slane %v2238_v1, 5  ;;  %v1272_v34 = vrot.slane %v1266_v39, 2  ;;  %v1273_v42 = vrot.slane %v1267_v22, 2  ;;  %v2287_v26 = vrot.slane %v2280_v27, 5  ;;  %v4817_v27 = vld [vmem:[#allocation19_spill] sm:$0xff] }
 0x578   : > { %v4419_v2 = vpop.permute.xlu2 %1393  ;;  %v1167_v59 = vadd.f32 %v1162_v12, %v1147_v31  ;;  %v1208_v14 = vadd.f32 %v4342_v28, %v1188_v54  ;;  %v2206_v28 = vsel %vm682_vm6, %v2204_v29, %v2205_v48  ;;  %v1256_v54 = vrot.slane %v1250_v40, 2 }
 0x579   : > { %v1276_v40 = vsel %vm688_vm9, %v1273_v42, %v1275_v58  ;;  %v2246_v62 = vsel %vm682_vm6, %v2244_v19, %v2245_v23  ;;  %v1274_v1 = vsel %vm688_vm9, %v1272_v34, %v1273_v42  ;;  %v2431_v23 = vmul.f32 %v2429_v10, %v3609_v7 }
 0x57a   : > { %v1187_v50 = vadd.f32 %v3875_v8, %v1167_v59  ;;  %v2392_v8 = vmul.f32 %v4435_v5, %v3979_v45  ;;  %v1258_v29 = vsel %vm688_vm9, %v1256_v54, %v1257_v33 }
 0x57c   : > { %v1207_v57 = vadd.f32 %v1202_v11, %v1187_v50  ;;  %v4815_v11 = vld [vmem:[#allocation17_spill] sm:$0xff]  ;;  %v2399_v59 = vrot.slane %v2392_v8, 6  ;;  %v2288_v8 = vsel %vm682_vm6, %v2285_v53, %v2287_v26  ;;  %v4819_v26 = vld [vmem:[#allocation22_spill] sm:$0xff] }
 0x57d   : > { %2289 = vrot.lane.b32.xlu0 %v2286_v24, %s3235_s3  ;;  %2211 = vrot.lane.b32.xlu1 %v2208_v20, %s3231_s11  ;;  %v1228_v37 = vadd.f32 %v4815_v11, %v1208_v14  ;;  %v2317_v24 = vstv %s4425_s29  ;;  %v2397_v20 = vrot.slane %v4452_v35, 6  ;;  %s2948_s29 = sld [smem:[#allocation7 + $0x46]]  ;;  %v1521_v35 = vstv %s2899_s8 }
 0x57e   : > { %v1227_v17 = vadd.f32 %v3923_v21, %v1207_v57  ;;  %2209 = vrot.lane.b32.xlu2 %v2206_v28, %s3231_s11  ;;  %v1260_v21 = vsel %vm688_vm9, %v1257_v33, %v1259_v36  ;;  %v2320_v36 = vmul.f32 %v2317_v24, %v3979_v45  ;;  %v2318_v9 = vmul.f32 %v2317_v24, %v3619_v6  ;;  %v4816_v28 = vld [vmem:[#allocation16_spill] sm:$0xff] }
 0x57f   : > { %v1354_v38 = vpop.permute.xlu0 %1353  ;;  %v1244_v31 = vpop.permute.xlu1 %1243  ;;  %v2400_v57 = vsel %vm680_vm5, %v2397_v20, %v2399_v59  ;;  %v2319_v11 = vmul.f32 %v2317_v24, %v3609_v7  ;;  %v4818_v59 = vld [vmem:[#allocation18_spill] sm:$0xff]  ;;  %v4487_v24 = vstv %s2973_s27  ;;  %s471_s27 = sld [smem:[#allocation2]]  ;;  %vm2715_vm9 = vcmask 654336  }
 0x580   : > { %v4454_v12 = vpop.permute.xlu2 %1475  ;;  %v1248_v49 = vadd.f32 %v1244_v31, %v1228_v37  ;;  %v1247_v48 = vadd.f32 %v4363_v56, %v1227_v17  ;;  %v2430_v56 = vmul.f32 %v2429_v10, %v3619_v6  ;;  %v2327_v54 = vrot.slane %v2320_v36, 5 }
 0x581   : > { %v2325_v42 = vrot.slane %v2319_v11, 5 }
 0x582   : > { %v1264_v50 = vadd.f32 %v1260_v21, %v1248_v49  ;;  %v1263_v14 = vadd.f32 %v1258_v29, %v1247_v48  ;;  %v2436_v31 = vrot.slane %v2430_v56, 6  ;;  %v2324_v21 = vrot.slane %v2318_v9, 5 }
 0x583   : > { %v2437_v49 = vrot.slane %v2431_v23, 6 }
 0x584   : > { %v1280_v39 = vadd.f32 %v1276_v40, %v1264_v50  ;;  %v1279_v33 = vadd.f32 %v1274_v1, %v1263_v14  ;;  %v2390_v14 = vmul.f32 %v4435_v5, %v3619_v6  ;;  %v2512_v1 = vmul.f32 %v4487_v24, %v3979_v45  ;;  %v4820_v5 = vld [vmem:[#allocation21_spill] sm:$0xff] }
 0x585   : > { %2403 = vrot.lane.b32.xlu0 %v2400_v57, %s3221_s14  ;;  %2249 = vrot.lane.b32.xlu1 %v2246_v62, %s3233_s9  ;;  %v2438_v50 = vsel %vm680_vm5, %v2436_v31, %v2437_v49  ;;  %v2328_v62 = vsel %vm682_vm6, %v2325_v42, %v2327_v54  ;;  %v2326_v56 = vsel %vm682_vm6, %v2324_v21, %v2325_v42  ;;  %v2549_v54 = vstv %s2974_s12  ;;  %s4863_s12 = smov 96  }
 0x586   : > { %v1300_v22 = vadd.f32 %v4816_v28, %v1280_v39  ;;  %2291 = vrot.lane.b32.xlu2 %v2288_v8, %s3235_s3  ;;  %v1299_v17 = vadd.f32 %v4817_v27, %v1279_v33  ;;  %v2432_v39 = vmul.f32 %v2429_v10, %v3979_v45  ;;  %v4503_v57 = vmul.f32 %v4487_v24, %v3609_v7  ;;  %v4822_v10 = vld [vmem:[#allocation20_spill] sm:$0xff] }
 0x587   : > { %v1436_v37 = vpop.permute.xlu0 %1435  ;;  %v1314_v58 = vpop.permute.xlu1 %1313  ;;  %v2396_v9 = vrot.slane %v2390_v14, 6 }
 0x588   : > { %v4481_v53 = vpop.permute.xlu2 %1513  ;;  %v1319_v19 = vadd.f32 %v1314_v58, %v1299_v17  ;;  %v1320_v34 = vadd.f32 %v4416_v25, %v1300_v22  ;;  %v2519_v22 = vrot.slane %v2512_v1, 6  ;;  %v2439_v27 = vrot.slane %v2432_v39, 6 }
 0x589   : > { %v2517_v11 = vrot.slane %v4503_v57, 6  ;;  %v2398_v31 = vsel %vm680_vm5, %v2396_v9, %v2397_v20  ;;  %v4823_v20 = vld [vmem:[#allocation24_spill] sm:$0xff] }
 0x58a   : > { %v1339_v48 = vadd.f32 %v4818_v59, %v1319_v19  ;;  %v1340_v29 = vadd.f32 %v4819_v26, %v1320_v34  ;;  %v2469_v19 = vstv %s2972_s16  ;;  %v2550_v59 = vmul.f32 %v2549_v54, %v3619_v6  ;;  %s4862_s16 = smov 64  }
 0x58b   : > { %v2520_v21 = vsel %vm680_vm5, %v2517_v11, %v2519_v22  ;;  %v2440_v42 = vsel %vm680_vm5, %v2437_v49, %v2439_v27  ;;  %v2471_v26 = vmul.f32 %v2469_v19, %v3609_v7 }
 0x58c   : > { %v1359_v40 = vadd.f32 %v1354_v38, %v1339_v48  ;;  %v1360_v25 = vadd.f32 %v4387_v0, %v1340_v29  ;;  %v4821_v0 = vld [vmem:[#allocation25_spill] sm:$0xff]  ;;  %v2472_v48 = vmul.f32 %v2469_v19, %v3979_v45  ;;  %v2551_v29 = vmul.f32 %v2549_v54, %v3609_v7 }
 0x58d   : > { %2441 = vrot.lane.b32.xlu0 %v2438_v50, %s3232_s15  ;;  %2331 = vrot.lane.b32.xlu1 %v2328_v62, %s3234_s10  ;;  %v4824_v50 = vld [vmem:[#allocation28_spill] sm:$0xff]  ;;  %v1523_v62 = vmul.f32 %v1521_v35, %v3587_v47 }
 0x58e   : > { %2329 = vrot.lane.b32.xlu2 %v2326_v56, %s3234_s10  ;;  %v1380_v38 = vadd.f32 %v4820_v5, %v1360_v25  ;;  %v1379_v33 = vadd.f32 %v4821_v0, %v1359_v40  ;;  %v2556_v56 = vrot.slane %v2550_v59, 6  ;;  %v2479_v39 = vrot.slane %v2472_v48, 6 }
 0x58f   : > { %v1474_v36 = vpop.permute.xlu0 %1473  ;;  %v1396_v8 = vpop.permute.xlu1 %1395  ;;  %v1537_v0 = vstv %s2948_s29  ;;  %v2557_v22 = vrot.slane %v2551_v29, 6  ;;  %v2510_v48 = vmul.f32 %v4487_v24, %v3619_v6 }
 0x590   : > { %v4506_v23 = vpop.permute.xlu2 %1627  ;;  %v1400_v28 = vadd.f32 %v1396_v8, %v1380_v38  ;;  %v1399_v58 = vadd.f32 %v4419_v2, %v1379_v33  ;;  %v2470_v2 = vmul.f32 %v2469_v19, %v3619_v6  ;;  %v1524_v38 = vmul.f32 %v1521_v35, %v3643_v30  ;;  %v4825_v8 = vld [vmem:[#allocation23_spill] sm:$0xff] }
 0x591   : > { %v1522_v33 = vmul.f32 %v1521_v35, %v3581_v43  ;;  %v1538_v19 = vmul.f32 %v1537_v0, %v3619_v6  ;;  %v2552_v35 = vmul.f32 %v2549_v54, %v3979_v45 }
 0x592   : > { %v1420_v17 = vadd.f32 %v4822_v10, %v1400_v28  ;;  %v2476_v5 = vrot.slane %v2470_v2, 6  ;;  %v2477_v28 = vrot.slane %v2471_v26, 6  ;;  %v1529_v10 = vrot.slane %v1523_v62, 3 }
 0x593   : > { %v1539_v2 = vmul.f32 %v1537_v0, %v3609_v7  ;;  %v1544_v62 = vrot.slane %v1538_v19, 3 }
 0x594   : > { %v1440_v34 = vadd.f32 %v1436_v37, %v1420_v17  ;;  %v1419_v37 = vadd.f32 %v4823_v20, %v1399_v58  ;;  %v1540_v17 = vmul.f32 %v1537_v0, %v3979_v45  ;;  %v4826_v58 = vld [vmem:[#allocation33_spill] sm:$0xff]  ;;  %v2480_v59 = vsel %vm680_vm5, %v2477_v28, %v2479_v39  ;;  %v4827_v20 = vld [vmem:[#allocation31_spill] sm:$0xff] }
 0x595   : > { %2523 = vrot.lane.b32.xlu0 %v2520_v21, %s3233_s9  ;;  %2401 = vrot.lane.b32.xlu1 %v2398_v31, %s3221_s14  ;;  %v2572_v31 = vmul.f32 %v4826_v58, %v3643_v30  ;;  %s4541_s14 = sld [smem:[#allocation7 + $0x61]]  ;;  %v2558_v21 = vsel %vm680_vm5, %v2556_v56, %v2557_v22  ;;  %v2516_v39 = vrot.slane %v2510_v48, 6  ;;  %v2559_v0 = vrot.slane %v2552_v35, 6 }
 0x596   : > { %2443 = vrot.lane.b32.xlu2 %v2440_v42, %s3232_s15  ;;  %v1460_v14 = vadd.f32 %v4824_v50, %v1440_v34  ;;  %v1531_v42 = vrot.slane %v1524_v38, 3  ;;  %v1547_v50 = vrot.slane %v1540_v17, 3  ;;  %v1545_v38 = vrot.slane %v1539_v2, 3  ;;  %v4829_v17 = vld [vmem:[#allocation34_spill] sm:$0xff]  ;;  %s2913_s15 = sld [smem:[#allocation7 + $0x23]] }
 0x597   : > { %v4528_v40 = vpop.permute.xlu0 %1587  ;;  %v1434_v49 = vpop.permute.xlu1 %1433  ;;  %v4830_v58 = vrot.slane %v4829_v17, 6  ;;  %v4832_v2 = vld [vmem:[#allocation30_spill] sm:$0xff] }
 0x598   : > { %v4531_v25 = vpop.permute.xlu2 %1665  ;;  %v1439_v1 = vadd.f32 %v1434_v49, %v1419_v37  ;;  %v1480_v27 = vadd.f32 %v4454_v12, %v1460_v14  ;;  %v2478_v12 = vsel %vm680_vm5, %v2476_v5, %v2477_v28  ;;  %v4828_v37 = vld [vmem:[#allocation27_spill] sm:$0xff]  ;;  %v2579_v14 = vrot.slane %v2572_v31, 6 }
 0x599   : > { %v1528_v49 = vrot.slane %v1522_v33, 3  ;;  %v1532_v54 = vsel %vm686_vm8, %v1529_v10, %v1531_v42  ;;  %v1546_v31 = vsel %vm686_vm8, %v1544_v62, %v1545_v38  ;;  %v4834_v62 = vld [vmem:[#allocation36_spill] sm:$0xff] }
 0x59a   : > { %v1459_v9 = vadd.f32 %v4825_v8, %v1439_v1  ;;  %v1500_v26 = vadd.f32 %v4828_v37, %v1480_v27  ;;  %v1548_v27 = vsel %vm686_vm8, %v1545_v38, %v1547_v50  ;;  %v2580_v33 = vsel %vm680_vm5, %v4830_v58, %v2579_v14 }
 0x59b   : > { %v1530_v8 = vsel %vm686_vm8, %v1528_v49, %v1529_v10  ;;  %v2589_v19 = vstv %s4541_s14  ;;  %v2560_v10 = vsel %vm680_vm5, %v2557_v22, %v2559_v0  ;;  %v4835_v0 = vld [vmem:[#allocation35_spill] sm:$0xff]  ;;  %vm2713_vm8 = vcmask 523264  }
 0x59c   : > { %v1479_v34 = vadd.f32 %v1474_v36, %v1459_v9  ;;  %v2590_v48 = vmul.f32 %v2589_v19, %v3619_v6  ;;  %v2591_v57 = vmul.f32 %v2589_v19, %v3609_v7 }
 0x59d   : > { %2561 = vrot.lane.b32.xlu0 %v2558_v21, %s3235_s3  ;;  %2483 = vrot.lane.b32.xlu1 %v2480_v59, %s3231_s11  ;;  %v2592_v59 = vmul.f32 %v2589_v19, %v3979_v45  ;;  %v4838_v19 = vld [vmem:[#allocation38_spill] sm:$0xff] }
 0x59e   : > { %v1499_v36 = vadd.f32 %v4827_v20, %v1479_v34  ;;  %2481 = vrot.lane.b32.xlu2 %v2478_v12, %s3231_s11  ;;  %v4831_v12 = vld [vmem:[#allocation26_spill] sm:$0xff]  ;;  %v2596_v50 = vrot.slane %v2590_v48, 6  ;;  %v2597_v49 = vrot.slane %v2591_v57, 6  ;;  %s2955_s11 = sld [smem:[#allocation7 + $0x4d]]  ;;  %v4840_v57 = vld [vmem:[#allocation37_spill] sm:$0xff] }
 0x59f   : > { %v1626_v29 = vpop.permute.xlu0 %1625  ;;  %v1516_v24 = vpop.permute.xlu1 %1515 }
 0x5a0   : > { %v4555_v1 = vpop.permute.xlu2 %1747  ;;  %v1520_v56 = vadd.f32 %v1516_v24, %v1500_v26  ;;  %v1519_v5 = vadd.f32 %v4481_v53, %v1499_v36  ;;  %v2518_v53 = vsel %vm680_vm5, %v2516_v39, %v2517_v11  ;;  %v2599_v26 = vrot.slane %v2592_v59, 6  ;;  %v4833_v24 = vld [vmem:[#allocation29_spill] sm:$0xff] }
 0x5a1   : > { %v2598_v38 = vsel %vm680_vm5, %v2596_v50, %v2597_v49 }
 0x5a2   : > { %v1536_v9 = vadd.f32 %v1532_v54, %v1520_v56  ;;  %v1535_v28 = vadd.f32 %v1530_v8, %v1519_v5  ;;  %v2600_v5 = vsel %vm680_vm5, %v2597_v49, %v2599_v26 }
 0x5a4   : > { %v1552_v34 = vadd.f32 %v1548_v27, %v1536_v9  ;;  %v1551_v21 = vadd.f32 %v1546_v31, %v1535_v28 }
 0x5a5   : > { %2583 = vrot.lane.b32.xlu0 %v2580_v33, %s3234_s10  ;;  %2521 = vrot.lane.b32.xlu1 %v2518_v53, %s3233_s9  ;;  %v4839_v53 = vld [vmem:[#allocation42_spill] sm:$0xff]  ;;  %s2962_s9 = sld [smem:[#allocation7 + $0x54]] }
 0x5a6   : > { %v1572_v42 = vadd.f32 %v4831_v12, %v1552_v34  ;;  %2563 = vrot.lane.b32.xlu2 %v2560_v10, %s3235_s3  ;;  %v1571_v35 = vadd.f32 %v4832_v2, %v1551_v21  ;;  %s2906_s3 = sld [smem:[#allocation7 + $0x1c]] }
 0x5a7   : > { %v1708_v11 = vpop.permute.xlu0 %1707  ;;  %v1586_v20 = vpop.permute.xlu1 %1585 }
 0x5a8   : > { %v1786_v36 = vpop.permute.xlu2 %1785  ;;  %v1591_v37 = vadd.f32 %v1586_v20, %v1571_v35  ;;  %v1592_v22 = vadd.f32 %v4528_v40, %v1572_v42  ;;  %v4836_v40 = vld [vmem:[#allocation39_spill] sm:$0xff] }
 0x5aa   : > { %v1611_v14 = vadd.f32 %v4833_v24, %v1591_v37  ;;  %v1612_v56 = vadd.f32 %v4834_v62, %v1592_v22  ;;  %v4841_v62 = vld [vmem:[#allocation45_spill] sm:$0xff] }
 0x5ac   : > { %v1631_v39 = vadd.f32 %v1626_v29, %v1611_v14  ;;  %v1632_v54 = vadd.f32 %v4506_v23, %v1612_v56  ;;  %v4837_v29 = vld [vmem:[#allocation32_spill] sm:$0xff]  ;;  %v1793_v12 = vstv %s2906_s3 }
 0x5ad   : > { %2603 = vrot.lane.b32.xlu1 %v2600_v5, %s3234_s10  ;;  %v1795_v42 = vmul.f32 %v1793_v12, %v3587_v47  ;;  %v1796_v2 = vmul.f32 %v1793_v12, %v3643_v30  ;;  %v1794_v26 = vmul.f32 %v1793_v12, %v3581_v43 }
 0x5ae   : > { %2601 = vrot.lane.b32.xlu2 %v2598_v38, %s3234_s10  ;;  %v1652_v8 = vadd.f32 %v4835_v0, %v1632_v54  ;;  %v1651_v9 = vadd.f32 %v4836_v40, %v1631_v39  ;;  %v4842_v39 = vld [vmem:[#allocation41_spill] sm:$0xff]  ;;  %s2920_s10 = sld [smem:[#allocation7 + $0x2a]] }
 0x5af   : > { %v1746_v28 = vpop.permute.xlu0 %1745  ;;  %v1668_v27 = vpop.permute.xlu1 %1667  ;;  %v1801_v24 = vrot.slane %v1795_v42, 4  ;;  %v1803_v14 = vrot.slane %v1796_v2, 4 }
 0x5b0   : > { %v1900_v17 = vpop.permute.xlu2 %1899  ;;  %v1672_v58 = vadd.f32 %v1668_v27, %v1652_v8  ;;  %v1671_v31 = vadd.f32 %v4531_v25, %v1651_v9  ;;  %v1809_v25 = vstv %s2955_s11 }
 0x5b1   : > { %v1810_v22 = vmul.f32 %v1809_v25, %v3619_v6  ;;  %v1811_v49 = vmul.f32 %v1809_v25, %v3609_v7  ;;  %v1804_v27 = vsel %vm684_vm7, %v1801_v24, %v1803_v14 }
 0x5b2   : > { %v1692_v33 = vadd.f32 %v4837_v29, %v1672_v58  ;;  %v1691_v34 = vadd.f32 %v4838_v19, %v1671_v31 }
 0x5b3   : > { %v1816_v8 = vrot.slane %v1810_v22, 4  ;;  %v1817_v58 = vrot.slane %v1811_v49, 4  ;;  %v4848_v49 = vld [vmem:[#allocation51_spill] sm:$0xff] }
 0x5b4   : > { %v1712_v23 = vadd.f32 %v1708_v11, %v1692_v33  ;;  %v1812_v11 = vmul.f32 %v1809_v25, %v3979_v45  ;;  %v4846_v25 = vld [vmem:[#allocation48_spill] sm:$0xff] }
 0x5b6   : > { %v1732_v21 = vadd.f32 %v4839_v53, %v1712_v23  ;;  %v1819_v38 = vrot.slane %v1812_v11, 4  ;;  %v1818_v23 = vsel %vm684_vm7, %v1816_v8, %v1817_v58  ;;  %v4850_v8 = vld [vmem:[#allocation50_spill] sm:$0xff] }
 0x5b7   : > { %v1860_v59 = vpop.permute.xlu0 %1859  ;;  %v1706_v10 = vpop.permute.xlu1 %1705 }
 0x5b8   : > { %v1711_v48 = vadd.f32 %v1706_v10, %v1691_v34  ;;  %v1938_v35 = vpop.permute.xlu2 %1937  ;;  %v1752_v37 = vadd.f32 %v4555_v1, %v1732_v21  ;;  %v1800_v1 = vrot.slane %v1794_v26, 4  ;;  %v1820_v31 = vsel %vm684_vm7, %v1817_v58, %v1819_v38  ;;  %v4843_v21 = vld [vmem:[#allocation40_spill] sm:$0xff]  ;;  %v4849_v38 = vld [vmem:[#allocation46_spill] sm:$0xff] }
 0x5ba   : > { %v1731_v20 = vadd.f32 %v4840_v57, %v1711_v48  ;;  %v1772_v5 = vadd.f32 %v4842_v39, %v1752_v37  ;;  %v4844_v48 = vld [vmem:[#allocation44_spill] sm:$0xff] }
 0x5bc   : > { %v1751_v50 = vadd.f32 %v1746_v28, %v1731_v20  ;;  %v1802_v28 = vsel %vm684_vm7, %v1800_v1, %v1801_v24  ;;  %v4845_v20 = vld [vmem:[#allocation43_spill] sm:$0xff]  ;;  %vm2711_vm7 = vcmask 392192  }
 0x5bd   : > { %v4847_v24 = vld [vmem:[#allocation47_spill] sm:$0xff] }
 0x5be   : > { %v1771_v56 = vadd.f32 %v4841_v62, %v1751_v50 }
 0x5bf   : > { %v1898_v54 = vpop.permute.xlu0 %1897  ;;  %v1788_v0 = vpop.permute.xlu1 %1787 }
 0x5c0   : > { %v1792_v40 = vadd.f32 %v1788_v0, %v1772_v5  ;;  %v1791_v9 = vadd.f32 %v1786_v36, %v1771_v56  ;;  %v2020_v19 = vpop.permute.xlu2 %2019 }
 0x5c2   : > { %v1808_v29 = vadd.f32 %v1804_v27, %v1792_v40  ;;  %v1807_v33 = vadd.f32 %v1802_v28, %v1791_v9  ;;  %v4851_v9 = vld [vmem:[#allocation54_spill] sm:$0xff] }
 0x5c4   : > { %v1824_v34 = vadd.f32 %v1820_v31, %v1808_v29  ;;  %v1823_v53 = vadd.f32 %v1818_v23, %v1807_v33  ;;  %v2065_v29 = vstv %s2913_s15  ;;  %v4852_v23 = vld [vmem:[#allocation49_spill] sm:$0xff]  ;;  %s2763_s15 = scalar_lea.sflag [#allocation5], %s3367_s19 }
 0x5c5   : > { %v2067_v33 = vmul.f32 %v2065_v29, %v3587_v47  ;;  %v2068_v31 = vmul.f32 %v2065_v29, %v3643_v30 }
 0x5c6   : > { %v1844_v10 = vadd.f32 %v4843_v21, %v1824_v34  ;;  %v1843_v12 = vadd.f32 %v4844_v48, %v1823_v53  ;;  %v2081_v21 = vstv %s2962_s9 }
 0x5c7   : > { %v1980_v42 = vpop.permute.xlu0 %1979  ;;  %v1858_v36 = vpop.permute.xlu1 %1857  ;;  %v2082_v48 = vmul.f32 %v2081_v21, %v3619_v6 }
 0x5c8   : > { %v1863_v2 = vadd.f32 %v1858_v36, %v1843_v12  ;;  %v1864_v57 = vadd.f32 %v1860_v59, %v1844_v10  ;;  %v2058_v50 = vpop.permute.xlu2 %2057  ;;  %v2066_v10 = vmul.f32 %v2065_v29, %v3581_v43  ;;  %v2075_v36 = vrot.slane %v2068_v31, 5 }
 0x5ca   : > { %v1883_v37 = vadd.f32 %v4845_v20, %v1863_v2  ;;  %v1884_v11 = vadd.f32 %v4846_v25, %v1864_v57  ;;  %v2083_v2 = vmul.f32 %v2081_v21, %v3609_v7  ;;  %v4853_v57 = vld [vmem:[#allocation57_spill] sm:$0xff] }
 0x5cc   : > { %v1903_v26 = vadd.f32 %v1898_v54, %v1883_v37  ;;  %v1904_v22 = vadd.f32 %v1900_v17, %v1884_v11  ;;  %v4854_v37 = vld [vmem:[#allocation53_spill] sm:$0xff] }
 0x5ce   : > { %v1924_v14 = vadd.f32 %v4847_v24, %v1904_v22  ;;  %v1923_v62 = vadd.f32 %v4848_v49, %v1903_v26  ;;  %v2088_v24 = vrot.slane %v2082_v48, 5 }
 0x5cf   : > { %v2018_v56 = vpop.permute.xlu0 %2017  ;;  %v1940_v39 = vpop.permute.xlu1 %1939 }
 0x5d0   : > { %v1944_v5 = vadd.f32 %v1940_v39, %v1924_v14  ;;  %v1943_v1 = vadd.f32 %v1938_v35, %v1923_v62  ;;  %v2172_v58 = vpop.permute.xlu2 %2171  ;;  %v2084_v35 = vmul.f32 %v2081_v21, %v3979_v45  ;;  %v2089_v39 = vrot.slane %v2083_v2, 5 }
 0x5d2   : > { %v1964_v0 = vadd.f32 %v4849_v38, %v1944_v5  ;;  %v1963_v40 = vadd.f32 %v4850_v8, %v1943_v1  ;;  %v2091_v26 = vrot.slane %v2084_v35, 5 }
 0x5d4   : > { %v1984_v59 = vadd.f32 %v1980_v42, %v1964_v0  ;;  %v2073_v42 = vrot.slane %v2067_v33, 5  ;;  %v2092_v1 = vsel %vm682_vm6, %v2089_v39, %v2091_v26 }
 0x5d6   : > { %v2004_v27 = vadd.f32 %v4851_v9, %v1984_v59  ;;  %v2076_v62 = vsel %vm682_vm6, %v2073_v42, %v2075_v36  ;;  %v2090_v59 = vsel %vm682_vm6, %v2088_v24, %v2089_v39  ;;  %v4855_v9 = vld [vmem:[#allocation52_spill] sm:$0xff]  ;;  %v4861_v39 = vld [vmem:[#allocation61_spill] sm:$0xff] }
 0x5d7   : > { %v2132_v54 = vpop.permute.xlu0 %2131  ;;  %v1978_v17 = vpop.permute.xlu1 %1977 }
 0x5d8   : > { %v1983_v28 = vadd.f32 %v1978_v17, %v1963_v40  ;;  %v2024_v53 = vadd.f32 %v2020_v19, %v2004_v27  ;;  %v2072_v19 = vrot.slane %v2066_v10, 5  ;;  %v2210_v5 = vpop.permute.xlu2 %2209  ;;  %v4856_v17 = vld [vmem:[#allocation56_spill] sm:$0xff] }
 0x5da   : > { %v2003_v34 = vadd.f32 %v4852_v23, %v1983_v28  ;;  %v2044_v25 = vadd.f32 %v4854_v37, %v2024_v53  ;;  %v4857_v23 = vld [vmem:[#allocation55_spill] sm:$0xff]  ;;  %v4858_v53 = vld [vmem:[#allocation60_spill] sm:$0xff]  ;;  %v4860_v37 = vld [vmem:[#allocation58_spill] sm:$0xff] }
 0x5dc   : > { %v2023_v12 = vadd.f32 %v2018_v56, %v2003_v34  ;;  %v2074_v56 = vsel %vm682_vm6, %v2072_v19, %v2073_v42  ;;  %vm2708_vm6 = vcmask 130048  }
 0x5de   : > { %v2043_v20 = vadd.f32 %v4853_v57, %v2023_v12  ;;  %v4859_v12 = vld [vmem:[#allocation59_spill] sm:$0xff] }
 0x5df   : > { %v2170_v11 = vpop.permute.xlu0 %2169  ;;  %v2060_v22 = vpop.permute.xlu1 %2059 }
 0x5e0   : > { %v2064_v14 = vadd.f32 %v2060_v22, %v2044_v25  ;;  %v2063_v49 = vadd.f32 %v2058_v50, %v2043_v20  ;;  %v2292_v35 = vpop.permute.xlu2 %2291 }
 0x5e2   : > { %v2080_v38 = vadd.f32 %v2076_v62, %v2064_v14  ;;  %v2079_v0 = vadd.f32 %v2074_v56, %v2063_v49  ;;  %v2337_v49 = vstv %s2920_s10 }
 0x5e3   : > { %v2340_v62 = vmul.f32 %v2337_v49, %v3643_v30 }
 0x5e4   : > { %v2096_v8 = vadd.f32 %v2092_v1, %v2080_v38  ;;  %v2095_v40 = vadd.f32 %v2090_v59, %v2079_v0  ;;  %v2353_v0 = vstv %s2969_s18  ;;  %v2338_v1 = vmul.f32 %v2337_v49, %v3581_v43 }
 0x5e6   : > { %v2116_v27 = vadd.f32 %v4855_v9, %v2096_v8  ;;  %v2115_v28 = vadd.f32 %v4856_v17, %v2095_v40  ;;  %v2347_v8 = vrot.slane %v2340_v62, 6  ;;  %v2355_v40 = vmul.f32 %v2353_v0, %v3609_v7 }
 0x5e7   : > { %v2252_v29 = vpop.permute.xlu0 %2251  ;;  %v2130_v50 = vpop.permute.xlu1 %2129 }
 0x5e8   : > { %v2135_v33 = vadd.f32 %v2130_v50, %v2115_v28  ;;  %v2136_v31 = vadd.f32 %v2132_v54, %v2116_v27  ;;  %v2330_v22 = vpop.permute.xlu2 %2329  ;;  %v2344_v28 = vrot.slane %v2338_v1, 6 }
 0x5ea   : > { %v2155_v34 = vadd.f32 %v4857_v23, %v2135_v33  ;;  %v2156_v21 = vadd.f32 %v4858_v53, %v2136_v31 }
 0x5ec   : > { %v2175_v10 = vadd.f32 %v2170_v11, %v2155_v34  ;;  %v2176_v48 = vadd.f32 %v2172_v58, %v2156_v21 }
 0x5ee   : > { %v2196_v42 = vadd.f32 %v4859_v12, %v2176_v48  ;;  %v2195_v36 = vadd.f32 %v4184_v4, %v2175_v10  ;;  %v2339_v4 = vmul.f32 %v2337_v49, %v3587_v47 }
 0x5ef   : > { %v2290_v2 = vpop.permute.xlu0 %2289  ;;  %v2212_v57 = vpop.permute.xlu1 %2211 }
 0x5f0   : > { %v2216_v20 = vadd.f32 %v2212_v57, %v2196_v42  ;;  %v2215_v26 = vadd.f32 %v2210_v5, %v2195_v36  ;;  %v2356_v5 = vmul.f32 %v2353_v0, %v3979_v45  ;;  %v2444_v33 = vpop.permute.xlu2 %2443 }
 0x5f2   : > { %v2236_v25 = vadd.f32 %v4860_v37, %v2216_v20  ;;  %v2235_v19 = vadd.f32 %v4182_v41, %v2215_v26  ;;  %v2354_v41 = vmul.f32 %v2353_v0, %v3619_v6  ;;  %v2363_v27 = vrot.slane %v2356_v5, 6 }
 0x5f3   : > { %v2361_v6 = vrot.slane %v2355_v40, 6 }
 0x5f4   : > { %v2256_v54 = vadd.f32 %v2252_v29, %v2236_v25  ;;  %v2360_v29 = vrot.slane %v2354_v41, 6 }
 0x5f5   : > { %v2364_v7 = vsel %vm680_vm5, %v2361_v6, %v2363_v27 }
 0x5f6   : > { %v2276_v24 = vadd.f32 %v4206_v60, %v2256_v54  ;;  %v2345_v60 = vrot.slane %v2339_v4, 6 }
 0x5f7   : > { %v2404_v11 = vpop.permute.xlu0 %2403  ;;  %v2250_v58 = vpop.permute.xlu1 %2249 }
 0x5f8   : > { %v2255_v14 = vadd.f32 %v2250_v58, %v2235_v19  ;;  %v2296_v38 = vadd.f32 %v2292_v35, %v2276_v24  ;;  %v2348_v43 = vsel %vm680_vm5, %v2345_v60, %v2347_v8  ;;  %v2346_v31 = vsel %vm680_vm5, %v2344_v28, %v2345_v60  ;;  %v2482_v57 = vpop.permute.xlu2 %2481 }
 0x5fa   : > { %v2275_v56 = vadd.f32 %v4861_v39, %v2255_v14  ;;  %v2316_v47 = vadd.f32 %v4204_v63, %v2296_v38 }
 0x5fc   : > { %v2295_v59 = vadd.f32 %v2290_v2, %v2275_v56  ;;  %v2609_v56 = vstv %s471_s27 }
 0x5fe   : > { %v2315_v9 = vadd.f32 %v4229_v55, %v2295_v59  ;;  %v2362_v55 = vsel %vm680_vm5, %v2360_v29, %v2361_v6 }
 0x5ff   : > { %v2442_v30 = vpop.permute.xlu0 %2441  ;;  %v2332_v17 = vpop.permute.xlu1 %2331 }
 0x600   : > { %v2336_v50 = vadd.f32 %v2332_v17, %v2316_v47  ;;  %v2335_v45 = vadd.f32 %v2330_v22, %v2315_v9 }
 0x602   : > { %v2352_v23 = vadd.f32 %v2348_v43, %v2336_v50  ;;  %v2351_v34 = vadd.f32 %v2346_v31, %v2335_v45 }
 0x604   : > { %v2368_v63 = vadd.f32 %v2364_v7, %v2352_v23  ;;  %v2367_v53 = vadd.f32 %v2362_v55, %v2351_v34 }
 0x606   : > { %v2388_v21 = vadd.f32 %v4187_v15, %v2368_v63  ;;  %v2387_v35 = vadd.f32 %v4227_v32, %v2367_v53 }
 0x607   : > { %v2402_v10 = vpop.permute.xlu1 %2401  ;;  %v2524_v42 = vpop.permute.xlu0 %2523 }
 0x608   : > { %v2407_v48 = vadd.f32 %v2402_v10, %v2387_v35  ;;  %v2408_v12 = vadd.f32 %v2404_v11, %v2388_v21  ;;  %v2564_v11 = vpop.permute.xlu2 %2563 }
 0x60a   : > { %v2427_v36 = vadd.f32 %v4210_v13, %v2407_v48  ;;  %v2428_v2 = vadd.f32 %v4251_v61, %v2408_v12 }
 0x60c   : > { %v2447_v20 = vadd.f32 %v2442_v30, %v2427_v36  ;;  %v2448_v37 = vadd.f32 %v2444_v33, %v2428_v2 }
 0x60e   : > { %v2468_v25 = vadd.f32 %v4249_v46, %v2448_v37  ;;  %v2467_v26 = vadd.f32 %v4286_v44, %v2447_v20 }
 0x60f   : > { %v2484_v54 = vpop.permute.xlu1 %2483  ;;  %v2562_v19 = vpop.permute.xlu0 %2561 }
 0x610   : > { %v2488_v22 = vadd.f32 %v2484_v54, %v2468_v25  ;;  %v2487_v32 = vadd.f32 %v2482_v57, %v2467_v26 }
 0x612   : > { %v2508_v15 = vadd.f32 %v4232_v51, %v2488_v22  ;;  %v2507_v13 = vadd.f32 %v4284_v18, %v2487_v32  ;;  %v2602_v51 = vpop.permute.xlu2 %2601 }
 0x614   : > { %v2528_v24 = vadd.f32 %v2524_v42, %v2508_v15 }
 0x616   : > { %v2548_v58 = vadd.f32 %v4317_v3, %v2528_v24 }
 0x617   : > { %v2522_v61 = vpop.permute.xlu1 %2521  ;;  %v2584_v44 = vpop.permute.xlu0 %2583 }
 0x618   : > { %v2527_v14 = vadd.f32 %v2522_v61, %v2507_v13  ;;  %v2568_v49 = vadd.f32 %v2564_v11, %v2548_v58 }
 0x61a   : > { %v2547_v46 = vadd.f32 %v4254_v52, %v2527_v14  ;;  %v2588_v62 = vadd.f32 %v2584_v44, %v2568_v49 }
 0x61c   : > { %v2567_v4 = vadd.f32 %v2562_v19, %v2547_v46 }
 0x61e   : > { %v2587_v39 = vadd.f32 %v4339_v16, %v2567_v4 }
 0x61f   : > { %v2604_v38 = vpop.permute.xlu1 %2603 }
 0x620   : > { %v2607_v0 = vadd.f32 %v2602_v51, %v2587_v39  ;;  %v2608_v5 = vadd.f32 %v2604_v38, %v2588_v62 }
 0x622   : > { %v2610_v1 = vadd.f32 %v2609_v56, %v2607_v0  ;;  %v2611_v3 = vadd.f32 %v2609_v56, %v2608_v5 }
 0x624   : > { %v2980_v41 = vmul.f32 -1.442695, %v2610_v1  ;;  %v2981_v18 = vmul.f32 -1.442695, %v2611_v3 }
 0x626   : > { %3085 = vpow2.f32 %v2980_v41 }
 0x627   : > { %3087 = vpow2.f32 %v2981_v18 }
 0x62c   : > { %v3086_v59 = vpop.eup %3085 }
 0x62d   : > { %v3088_v60 = vpop.eup %3087  ;;  %v2618_v8 = vadd.f32 1.0, %v3086_v59  ;;  %v4865_v59 = vld [vmem:[#allocation14_spill] sm:$0xff] }
 0x62e   : > { %v2619_v52 = vadd.f32 1.0, %v3088_v60 }
 0x62f   : > { %3089 = vrcp.f32 %v2618_v8  ;;  %v2631_v27 = vand.u32 2147483648, %v2618_v8  ;;  %v2629_v29 = vand.u32 2147483647, %v2618_v8  ;;  %vm2625_vm15 = vweird.f32 %v2618_v8 }
 0x630   : > { %3091 = vrcp.f32 %v2619_v52  ;;  %v2646_v50 = vand.u32 2147483648, %v2619_v52  ;;  %v2644_v33 = vand.u32 2147483647, %v2619_v52  ;;  %vm2640_vm2 = vweird.f32 %v2619_v52 }
 0x631   : > { %v2632_v6 = vor.u32 1.1754944e-38, %v2631_v27  ;;  %vm2630_vm3 = vcmp.eq.f32.partialorder %v2629_v29, 8.507059e+37 }
 0x632   : > { %v2647_v34 = vor.u32 1.1754944e-38, %v2646_v50  ;;  %vm2645_vm5 = vcmp.eq.f32.partialorder %v2644_v33, 8.507059e+37  ;;  %v3093_v33 = vld [vmem:[%s3373_s26 + $0x8] sm:$0xff] }
 0x635   : > { %v3090_v40 = vpop.eup %3089 }
 0x636   : > { %v3092_v9 = vpop.eup %3091  ;;  %v2621_v16 = vmul.f32 %v3090_v40, %v2618_v8  ;;  %vm2626_vm13 = vweird.f32 %v3090_v40  ;;  %v4866_v8 = vld [vmem:[#allocation12_spill] sm:$0xff] }
 0x637   : > { %v2636_v47 = vmul.f32 %v3092_v9, %v2619_v52  ;;  %vm2641_vm14 = vweird.f32 %v3092_v9  ;;  %vm2627_vm0 = vmor %vm2625_vm15, %vm2626_vm13 }
 0x638   : > { %v2622_v30 = vsub.f32 1.0, %v2621_v16  ;;  %vm2642_vm4 = vmor %vm2640_vm2, %vm2641_vm14  ;;  %v4868_v16 = vld [vmem:[#allocation13_spill] sm:$0xff] }
 0x639   : > { %v2637_v17 = vsub.f32 1.0, %v2636_v47 }
 0x63a   : > { %v2623_v28 = vmul.f32 %v3090_v40, %v2622_v30 }
 0x63b   : > { %v2638_v45 = vmul.f32 %v3092_v9, %v2637_v17 }
 0x63c   : > { %v2624_v43 = vadd.f32 %v3090_v40, %v2623_v28 }
 0x63d   : > { %v2639_v31 = vadd.f32 %v3092_v9, %v2638_v45 }
 0x63e   : > { %v2628_v23 = vsel %vm2627_vm0, %v3090_v40, %v2624_v43  ;;  %v4867_v40 = vld [vmem:[#allocation15_spill] sm:$0xff] }
 0x63f   : > { %v2633_v7 = vsel %vm2630_vm3, %v2632_v6, %v2628_v23  ;;  %v2643_v55 = vsel %vm2642_vm4, %v3092_v9, %v2639_v31  ;;  %v3094_v6 = vld [vmem:[%s3373_s26 + $0x18] sm:$0xff]  ;;  %v3095_v23 = vld [vmem:[%s3373_s26 + $0x28] sm:$0xff] }
 0x640   : > { %v2648_v63 = vsel %vm2645_vm5, %v2647_v34, %v2643_v55  ;;  %v2655_v53 = vrot.slane %v2633_v7, 2  ;;  %v2651_v21 = vrot.slane %v2633_v7, 1  ;;  %v2659_v12 = vrot.slane %v2633_v7, 3 }
 0x641   : > { %v2680_v35 = vrot.slane %v2648_v63, 1  ;;  %v2688_v10 = vrot.slane %v2648_v63, 3  ;;  %v2684_v48 = vrot.slane %v2648_v63, 2  ;;  %v2667_v42 = vrot.slane %v2633_v7, 5 }
 0x642   : > { %2656 = vrot.lane.b32.xlu1 %v2655_v53, %s3226_s24  ;;  %2652 = vrot.lane.b32.xlu0 %v2651_v21, %s3229_s13  ;;  %v2663_v36 = vrot.slane %v2633_v7, 4  ;;  %v2692_v2 = vrot.slane %v2648_v63, 4  ;;  %v2700_v57 = vrot.slane %v2648_v63, 6  ;;  %v2696_v20 = vrot.slane %v2648_v63, 5 }
 0x643   : > { %2681 = vrot.lane.b32.xlu2 %v2680_v35, %s3229_s13  ;;  %v2671_v37 = vrot.slane %v2633_v7, 6  ;;  %v2675_v25 = vrot.slane %v2633_v7, 7  ;;  %v2704_v26 = vrot.slane %v2648_v63, 7 }
 0x64a   : > { %2689 = vrot.lane.b32.xlu1 %v2688_v10, %s3227_s30  ;;  %2685 = vrot.lane.b32.xlu0 %v2684_v48, %s3226_s24  ;;  %s4864_s24 = smov 112  }
 0x64b   : > { %2660 = vrot.lane.b32.xlu2 %v2659_v12, %s3227_s30  ;;  %s4869_s30 = sshll.u32 %s3367_s19, 6 }
 0x64c   : > { %s259_s8 = scalar_lea.vmem [#allocation8], %s4869_s30 }
 0x64d   : > { %s2775_s3 = sshll.u32 %s259_s8, 4  ;;  %s2776_s3 = int_to_ptr.vmem [resolvable:$true] %s2775_s3 }
 0x652   : > { %2668 = vrot.lane.b32.xlu1 %v2667_v42, %s3223_s17  ;;  %2664 = vrot.lane.b32.xlu0 %v2663_v36, %s4862_s16 }
 0x653   : > { %2693 = vrot.lane.b32.xlu2 %v2692_v2, %s4862_s16  ;;  %v3097_v2 = vld [vmem:[%s3373_s26] sm:$0xff]  ;;  %s3166_s16 = scalar_lea.hbm %s4736_s5, 128 }
 0x65a   : > { %2701 = vrot.lane.b32.xlu1 %v2700_v57, %s4863_s12  ;;  %2697 = vrot.lane.b32.xlu0 %v2696_v20, %s3223_s17  ;;  %s2988_s17 = sshll.u32 %s3291_s4, 6  ;;  %v3098_v20 = vld [vmem:[%s3373_s26 + $0x10] sm:$0xff] }
 0x65b   : > { %2672 = vrot.lane.b32.xlu2 %v2671_v37, %s4863_s12  ;;  %s2774_s4 = scalar_lea.hbm %s4736_s5, %s2988_s17 }
 0x65c   : > { %s2777_s11 = sshll.u32 %s2774_s4, 4  ;;  %s2778_s11 = int_to_ptr.hbm [resolvable:$true] %s2777_s11 }
 0x65d   : > { %s3160_s9 = sshra.s32 %s2778_s11, 4  ;;  %s3161_s9 = int_to_ptr.hbm [resolvable:$true] %s3160_s9 }
 0x65e   : > { %s3162_s10 = scalar_lea.hbm %s3161_s9, 64  ;;  %p3167_p0 = scmp.lt.s32.totalorder %s3161_s9, %s4736_s5 }
 0x65f   : > { %p3163_p4 = scmp.ne.s32.totalorder %s3161_s9, %s3162_s10  ;;  %p3168_p3 = scmp.lt.s32.totalorder %s3166_s16, %s3162_s10 }
 0x661   : > { %p3164_p6 = pnand %p3163_p4, %p3322_p11  ;;  %p3169_p5 = por %p3168_p3, %p3167_p0 }
 0x662   : > { %2676 = vrot.lane.b32.xlu0 %v2675_v25, %s4864_s24  ;;  %v3099_v25 = vld [vmem:[%s3373_s26 + $0x20] sm:$0xff] }
 0x663   : > { %2705 = vrot.lane.b32.xlu2 %v2704_v26, %s4864_s24  ;;  %p3165_p13 = pneg %p3164_p6 }
 0x665   : > { %p3170_p8 = pnand %p3169_p5, %p3165_p13 }
 0x69d   : > { %v2682_v54 = vpop.permute.xlu2 %2681 }
 0x69e   : > { %v2721_v14 = vsel %vm2708_vm6, %v2648_v63, %v2682_v54  ;;  %v3100_v54 = vld [vmem:[%s3373_s26 + $0x30] sm:$0xff] }
 0x6a5   : > { %v2661_v22 = vpop.permute.xlu2 %2660 }
 0x6ad   : > { %v2694_v19 = vpop.permute.xlu2 %2693 }
 0x6b4   : > { %v2653_v15 = vpop.permute.xlu0 %2652  ;;  %v2657_v32 = vpop.permute.xlu1 %2656 }
 0x6b5   : > { %v2673_v58 = vpop.permute.xlu2 %2672  ;;  %v2709_v49 = vsel %vm2708_vm6, %v2633_v7, %v2653_v15  ;;  %v3096_v7 = vld [vmem:[%s3373_s26 + $0x38] sm:$0xff] }
 0x6b6   : > { %v2710_v4 = vsel %vm306_vm1, %v2709_v49, %v2657_v32 }
 0x6b7   : > { %v2712_v62 = vsel %vm2711_vm7, %v2710_v4, %v2661_v22 }
 0x6bc   : > { %v2686_v24 = vpop.permute.xlu0 %2685  ;;  %v2690_v11 = vpop.permute.xlu1 %2689 }
 0x6bd   : > { %v2722_v46 = vsel %vm306_vm1, %v2721_v14, %v2686_v24  ;;  %v2706_v5 = vpop.permute.xlu2 %2705 }
 0x6be   : > { %v2723_v44 = vsel %vm2711_vm7, %v2722_v46, %v2690_v11 }
 0x6bf   : > { %v2724_v51 = vsel %vm2713_vm8, %v2723_v44, %v2694_v19 }
 0x6c4   : > { %v2665_v13 = vpop.permute.xlu0 %2664  ;;  %v2669_v61 = vpop.permute.xlu1 %2668 }
 0x6c5   : > { %v2714_v38 = vsel %vm2713_vm8, %v2712_v62, %v2665_v13 }
 0x6c6   : > { %v2716_v41 = vsel %vm2715_vm9, %v2714_v38, %v2669_v61 }
 0x6c7   : > { %v2718_v30 = vsel %vm2717_vm11, %v2716_v41, %v2673_v58 }
 0x6cc   : > { %v2698_v39 = vpop.permute.xlu0 %2697  ;;  %v2702_v56 = vpop.permute.xlu1 %2701 }
 0x6cd   : > { %v2725_v0 = vsel %vm2715_vm9, %v2724_v51, %v2698_v39 }
 0x6ce   : > { %v2726_v1 = vsel %vm2717_vm11, %v2725_v0, %v2702_v56 }
 0x6cf   : > { %v2727_v3 = vsel %vm2719_vm10, %v2726_v1, %v2706_v5 }
 0x6d0   : > { %v2729_v18 = vperm.slane %v2727_v3, 0 }
 0x6d2   : > { %v2731_v60 = vmul.f32 %v2729_v18, %v4865_v59  ;;  %v2733_v52 = vmul.f32 %v2729_v18, %v4866_v8  ;;  %v2735_v9 = vmul.f32 %v2729_v18, %v4867_v40  ;;  %v2737_v47 = vmul.f32 %v2729_v18, %v4868_v16 }
 0x6d4   : > { %v2739_v27 = vadd.f32 1.0, %v2731_v60  ;;  %v2741_v17 = vadd.f32 1.0, %v2733_v52  ;;  %v2743_v28 = vadd.f32 1.0, %v2735_v9  ;;  %v2745_v29 = vadd.f32 1.0, %v2737_v47  ;;  %v2677_v50 = vpop.permute.xlu0 %2676 }
 0x6d5   : > { %v2720_v45 = vsel %vm2719_vm10, %v2718_v30, %v2677_v50 }
 0x6d6   : > { %v2747_v43 = vmul.f32 %v3093_v33, %v2739_v27  ;;  %v2749_v31 = vmul.f32 %v3094_v6, %v2741_v17  ;;  %v2751_v34 = vmul.f32 %v3095_v23, %v2743_v28  ;;  %v2753_v55 = vmul.f32 %v3096_v7, %v2745_v29 }
 0x6d7   : > { %v2728_v63 = vperm.slane %v2720_v45, 0 }
 0x6d8   : > { %2755 = vst [vmem:[%s259_s8 + $0x8] sm:$0xff] %v2747_v43 }
 0x6d9   : > { %2757 = vst [vmem:[%s259_s8 + $0x18] sm:$0xff] %v2749_v31  ;;  %v2730_v53 = vmul.f32 %v2728_v63, %v4865_v59  ;;  %v2732_v21 = vmul.f32 %v2728_v63, %v4866_v8  ;;  %v2734_v35 = vmul.f32 %v2728_v63, %v4867_v40  ;;  %v2736_v10 = vmul.f32 %v2728_v63, %v4868_v16 }
 0x6da   : > { %2759 = vst [vmem:[%s259_s8 + $0x28] sm:$0xff] %v2751_v34 }
 0x6db   : > { %2761 = vst [vmem:[%s259_s8 + $0x38] sm:$0xff] %v2753_v55  ;;  %v2738_v48 = vadd.f32 1.0, %v2730_v53  ;;  %v2740_v12 = vadd.f32 1.0, %v2732_v21  ;;  %v2742_v42 = vadd.f32 1.0, %v2734_v35  ;;  %v2744_v36 = vadd.f32 1.0, %v2736_v10 }
 0x6dd   : > { %v2746_v57 = vmul.f32 %v3097_v2, %v2738_v48  ;;  %v2748_v37 = vmul.f32 %v3098_v20, %v2740_v12  ;;  %v2750_v26 = vmul.f32 %v3099_v25, %v2742_v42  ;;  %v2752_v22 = vmul.f32 %v3100_v54, %v2744_v36 }
 0x6df   : > { %2754 = vst [vmem:[%s259_s8] sm:$0xff] %v2746_v57 }
 0x6e0   : > { %2756 = vst [vmem:[%s259_s8 + $0x10] sm:$0xff] %v2748_v37 }
 0x6e1   : > { %2758 = vst [vmem:[%s259_s8 + $0x20] sm:$0xff] %v2750_v26 }
 0x6e2   : > { %2760 = vst [vmem:[%s259_s8 + $0x30] sm:$0xff] %v2752_v22 }
 0x6e3   : > { %3173 = shalt.err (!%p3170_p8)
}
 0x6e4   : > { %s3236_s19 = smov 256  }
 0x6e5   : > { %2997 = dma.vmem_to_hbm [thread:$0]  (%p3322_p11), %s2776_s3, 1024, %s2778_s11, %s2763_s15, %s3236_s19, %s3236_s19, %s3229_s13  }
 0x6e6 PF: > { %s2792_s24 = sand.u32 1, %s3204_s20   ;;  %p4870_p9 = scmp.ge.s32.totalorder %s3216_s23, 2 }
 0x6e7   : > { %s2793_s17 = scalar_lea.sflag [#allocation5], %s2792_s24 }
 0x6e8   : > { %p3008_p10 = pnand %p4870_p9, %p3326_p12 }
 0x6ea   : > { %p3009_p1 = pneg %p3008_p10 }
 0x6ec   : > { %3199 = dma.done.wait (%p3009_p1), %s2793_s17, 1024  }
 0x6ed   : > { %3201 = vsyncadd (%p3009_p1), %s2793_s17, 4294966272  ;;  %p20_p2 = scmp.ge.s32.totalorder %s3295_s25, 4   ;;  %s4871_s20 = smov %s3208_s21 }
 0x6ee   : > { %s4872_s21 = smov %s3212_s22  ;;  %s4873_s22 = smov %s3307_s28 }
 0x6ef   : > { %s4874_s23 = smov %s3295_s25  ;;  %22 = sbr.rel (!%p20_p2) target bundleno = 9 (0x9), region = 90 }
 0x6f4   :  { %2799 = vsyncpa [#allocation4], 1 }
 0x6f5   :  { %2801 = vsyncpa [#allocation4 + $0x1], 1 }
 0x6f6   :  { %2802 = vsyncpa [#allocation5], 1 }
 0x6f7   :  { %2804 = vsyncpa [#allocation5 + $0x1], 1 }
 0x6f8   :  { %2805 = vsyncpa [#allocation6], 1 }
 0x6f9   :  { %2807 = vsyncpa [#allocation6 + $0x1], 1 }

</bundles_post_ra>
